<compile_context>
chip_gen: v7x
topology: tpu7x:2x2x1
jax: 0.10.0
libtpu: 0.0.40
codegen_flags: <defaults>
</compile_context>

<pallas_src>
import functools

import jax
import jax.numpy as jnp
from jax.experimental import pallas as pl
from jax.experimental.pallas import tpu as pltpu

H = W = 2          # fixed spatial size implied by fc1 = Linear(256*2*2, 256)
LANE = 128


# ----------------------------------------------------------------------------
# Fused whole-network kernel: 7 chained matmul+bias(+ReLU) ops, all in VMEM.
# ----------------------------------------------------------------------------
def _fused_nn_kernel(x_ref,
                     c1w, c1b, c2w, c2b, c3w, c3b, c4w, c4b,
                     f1w, f1b, f2w, f2b, f3w, f3b,
                     o_ref):
    def layer(a, w_ref, b_ref, relu=False):
        y = jnp.dot(a, w_ref[...], preferred_element_type=jnp.float32) + b_ref[...]
        if relu:
            y = jnp.maximum(y, 0.0)
        return y

    a = x_ref[...]                      # (M, 4)    per-sample (h, w, c) flatten
    a = layer(a, c1w, c1b)              # (M, 128)  conv1 as block-Toeplitz matmul
    a = layer(a, c2w, c2b)              # (M, 256)  conv2
    a = layer(a, c3w, c3b)              # (M, 512)  conv3
    a = layer(a, c4w, c4b)              # (M, 1024) conv4
    a = layer(a, f1w, f1b, relu=True)   # (M, 256)  fc1 + ReLU
    # TODO(synk): Dropout(p=0.5) is identity here (inference / eval mode).
    a = layer(a, f2w, f2b, relu=True)   # (M, 128)  fc2 + ReLU
    a = layer(a, f3w, f3b)              # (M, 128)  fc3, zero-padded lanes
    o_ref[...] = a.astype(o_ref.dtype)


# ----------------------------------------------------------------------------
# Offline weight packing (done once, outside the kernel call path).
# ----------------------------------------------------------------------------
def _conv_as_dense(w_oihw):
    """3x3/pad-1/stride-1 conv on the fixed HxW grid as a dense
    (H*W*Cin, H*W*Cout) matrix.  Row index = (h_in*W + w_in)*Cin + ci,
    column index = (h_out*W + w_out)*Cout + co."""
    cout, cin = int(w_oihw.shape[0]), int(w_oihw.shape[1])
    dense = jnp.zeros((H * W * cin, H * W * cout), jnp.float32)
    for ho in range(H):
        for wo in range(W):
            po = ho * W + wo
            for dh in range(3):
                for dw in range(3):
                    hi, wi = ho + dh - 1, wo + dw - 1
                    if 0 <= hi < H and 0 <= wi < W:        # padding taps read zeros
                        pi = hi * W + wi
                        dense = dense.at[pi * cin:(pi + 1) * cin,
                                         po * cout:(po + 1) * cout].set(
                            w_oihw[:, :, dh, dw].T)        # (cin, cout)
    return dense


def pack_params(params, out_size):
    """Fold convs into block-Toeplitz matmuls, fold the (C,H,W) flatten into
    fc1's rows, pre-shape biases to (1, N), zero-pad fc3 to 128 lanes.
    Returns the flat operand list in kernel argument order."""
    packed = []
    for w, b in params["convs"]:
        packed.append(_conv_as_dense(w))
        packed.append(jnp.tile(b, H * W).reshape(1, -1))   # bias per spatial pos

    # fc1: PyTorch flattens conv4 output as (C, H, W); our activation is
    # flattened as (H, W, C) -> permute fc1's input rows accordingly.
    w1, b1 = params["fc1"]                                  # (1024, 256), (256,)
    c4 = int(params["convs"][-1][0].shape[0])               # 256
    perm = jnp.asarray([c * (H * W) + p for p in range(H * W) for c in range(c4)],
                       jnp.int32)
    packed.append(jnp.take(w1, perm, axis=0))
    packed.append(b1.reshape(1, -1))

    w2, b2 = params["fc2"]
    packed.append(w2)
    packed.append(b2.reshape(1, -1))

    # fc3: pad output dim to a lane-dense multiple of 128 (sliced in wrapper).
    w3, b3 = params["fc3"]
    n_pad = max(LANE, ((out_size + LANE - 1) // LANE) * LANE)
    packed.append(jnp.zeros((int(w3.shape[0]), n_pad), jnp.float32).at[:, :out_size].set(w3))
    packed.append(jnp.zeros((1, n_pad), jnp.float32).at[:, :out_size].set(b3))
    return packed


# ----------------------------------------------------------------------------
# Forward pass (single pallas_call)
# ----------------------------------------------------------------------------
@functools.partial(jax.jit, static_argnames=("out_size",))
def nn_forward(x_nchw, packed, *, out_size):
    n, cin = x_nchw.shape[0], x_nchw.shape[1]
    # NCHW -> per-sample (h, w, c) flatten (cin == 1 here, so this is trivial).
    x = jnp.transpose(x_nchw.astype(jnp.float32), (0, 2, 3, 1)).reshape(n, H * W * cin)

    operands = [x] + list(packed)
    n_pad = packed[-1].shape[-1]

    weights = packed[0::2]
    flops = 2 * n * sum(int(w.shape[0]) * int(w.shape[1]) for w in weights)
    bytes_accessed = sum(int(a.size) * 4 for a in operands) + n * int(n_pad) * 4

    out = pl.pallas_call(
        _fused_nn_kernel,
        out_shape=jax.ShapeDtypeStruct((n, n_pad), jnp.float32),
        in_specs=[pl.BlockSpec(a.shape, lambda: (0, 0)) for a in operands],
        out_specs=pl.BlockSpec((n, n_pad), lambda: (0, 0)),
        compiler_params=pltpu.CompilerParams(vmem_limit_bytes=16 * 1024 * 1024),
        cost_estimate=pl.CostEstimate(flops=flops, transcendentals=0,
                                      bytes_accessed=bytes_accessed),
    )(*operands)
    return out[:, :out_size]


# ----------------------------------------------------------------------------
# Parameters (deterministic synthetic init; shapes follow the PyTorch module)
# ----------------------------------------------------------------------------
def init_params(key, out_size):
    keys = jax.random.split(key, 14)

    def conv_param(kw, kb, cout, cin):
        fan_in = 9.0 * cin
        w = jax.random.normal(kw, (cout, cin, 3, 3), jnp.float32) / jnp.sqrt(fan_in)
        b = jax.random.normal(kb, (cout,), jnp.float32) * 0.01
        return w, b

    def fc_param(kw, kb, fin, fout):
        w = jax.random.normal(kw, (fin, fout), jnp.float32) / jnp.sqrt(float(fin))
        b = jax.random.normal(kb, (fout,), jnp.float32) * 0.01
        return w, b

    return {
        "convs": [
            conv_param(keys[0], keys[1], 32, 1),
            conv_param(keys[2], keys[3], 64, 32),
            conv_param(keys[4], keys[5], 128, 64),
            conv_param(keys[6], keys[7], 256, 128),
        ],
        "fc1": fc_param(keys[8], keys[9], 256 * 2 * 2, 256),
        "fc2": fc_param(keys[10], keys[11], 256, 128),
        "fc3": fc_param(keys[12], keys[13], 128, out_size),
    }


# Pure-JAX reference (matches NN.forward, eval mode) for correctness checking.
def nn_forward_reference(x_nchw, params):
    x = x_nchw.astype(jnp.float32)
    for w, b in params["convs"]:
        x = jax.lax.conv_general_dilated(
            x, w, window_strides=(1, 1), padding=((1, 1), (1, 1)),
            dimension_numbers=("NCHW", "OIHW", "NCHW")) + b.reshape(1, -1, 1, 1)
    n = x.shape[0]
    x = x.reshape(n, -1)                 # PyTorch view(-1, 256*2*2): (C,H,W) order
    w1, b1 = params["fc1"]
    w2, b2 = params["fc2"]
    w3, b3 = params["fc3"]
    x = jnp.maximum(x @ w1 + b1, 0.0)
    x = jnp.maximum(x @ w2 + b2, 0.0)
    return x @ w3 + b3


if __name__ == "__main__":
    out_size = 10
    key = jax.random.PRNGKey(0)
    k_params, k_x = jax.random.split(key)

    params = init_params(k_params, out_size)
    packed = pack_params(params, out_size)

    # Convs are shape-preserving and fc1 expects 256*2*2 -> input is (N, 1, 2, 2).
    x = jax.random.normal(k_x, (2, 1, 2, 2), jnp.float32)

    out = nn_forward(x, packed, out_size=out_size)
    jax.block_until_ready(out)
    assert out.shape == (2, out_size), out.shape

    ref = nn_forward_reference(x, params)
    max_err = float(jnp.max(jnp.abs(out - ref)))
    assert jnp.allclose(out, ref, atol=1e-2, rtol=1e-2), max_err

    print("KERNEL_OK")
</pallas_src>

<mosaic_0001>
module attributes {stable_mosaic.version = 11 : i64} {
  func.func @_fused_nn_kernel(%arg0: memref<2x4xf32, #tpu.memory_space<vmem>>, %arg1: memref<4x128xf32, #tpu.memory_space<vmem>>, %arg2: memref<1x128xf32, #tpu.memory_space<vmem>>, %arg3: memref<128x256xf32, #tpu.memory_space<vmem>>, %arg4: memref<1x256xf32, #tpu.memory_space<vmem>>, %arg5: memref<256x512xf32, #tpu.memory_space<vmem>>, %arg6: memref<1x512xf32, #tpu.memory_space<vmem>>, %arg7: memref<512x1024xf32, #tpu.memory_space<vmem>>, %arg8: memref<1x1024xf32, #tpu.memory_space<vmem>>, %arg9: memref<1024x256xf32, #tpu.memory_space<vmem>>, %arg10: memref<1x256xf32, #tpu.memory_space<vmem>>, %arg11: memref<256x128xf32, #tpu.memory_space<vmem>>, %arg12: memref<1x128xf32, #tpu.memory_space<vmem>>, %arg13: memref<128x128xf32, #tpu.memory_space<vmem>>, %arg14: memref<1x128xf32, #tpu.memory_space<vmem>>, %arg15: memref<2x128xf32, #tpu.memory_space<vmem>>) attributes {dimension_semantics = [], scalar_prefetch = 0 : i64, scratch_operands = 0 : i64, tpu.core_type = #tpu.core_type<tc>} {
    %c0 = arith.constant 0 : index
    %c0_0 = arith.constant 0 : index
    %0 = vector.load %arg0[%c0, %c0_0] : memref<2x4xf32, #tpu.memory_space<vmem>>, vector<2x4xf32>
    %c0_1 = arith.constant 0 : index
    %c0_2 = arith.constant 0 : index
    %1 = vector.load %arg1[%c0_1, %c0_2] : memref<4x128xf32, #tpu.memory_space<vmem>>, vector<4x128xf32>
    %cst = arith.constant dense<0.000000e+00> : vector<2x128xf32>
    %2 = tpu.matmul %0, %1, %cst {dimension_numbers = #tpu.dot_dimension_numbers<[1], [0], [0], [1], [0, 0, 1, 1], [], []>} : vector<2x4xf32>, vector<4x128xf32>, vector<2x128xf32> -> vector<2x128xf32>
    %c0_3 = arith.constant 0 : index
    %c0_4 = arith.constant 0 : index
    %3 = vector.load %arg2[%c0_3, %c0_4] : memref<1x128xf32, #tpu.memory_space<vmem>>, vector<1x128xf32>
    %4 = vector.broadcast %3 : vector<1x128xf32> to vector<2x128xf32>
    %5 = arith.addf %2, %4 : vector<2x128xf32>
    %c0_5 = arith.constant 0 : index
    %c0_6 = arith.constant 0 : index
    %6 = vector.load %arg3[%c0_5, %c0_6] : memref<128x256xf32, #tpu.memory_space<vmem>>, vector<128x256xf32>
    %cst_7 = arith.constant dense<0.000000e+00> : vector<2x256xf32>
    %7 = tpu.matmul %5, %6, %cst_7 {dimension_numbers = #tpu.dot_dimension_numbers<[1], [0], [0], [1], [0, 0, 1, 1], [], []>} : vector<2x128xf32>, vector<128x256xf32>, vector<2x256xf32> -> vector<2x256xf32>
    %c0_8 = arith.constant 0 : index
    %c0_9 = arith.constant 0 : index
    %8 = vector.load %arg4[%c0_8, %c0_9] : memref<1x256xf32, #tpu.memory_space<vmem>>, vector<1x256xf32>
    %9 = vector.broadcast %8 : vector<1x256xf32> to vector<2x256xf32>
    %10 = arith.addf %7, %9 : vector<2x256xf32>
    %c0_10 = arith.constant 0 : index
    %c0_11 = arith.constant 0 : index
    %11 = vector.load %arg5[%c0_10, %c0_11] : memref<256x512xf32, #tpu.memory_space<vmem>>, vector<256x512xf32>
    %cst_12 = arith.constant dense<0.000000e+00> : vector<2x512xf32>
    %12 = tpu.matmul %10, %11, %cst_12 {dimension_numbers = #tpu.dot_dimension_numbers<[1], [0], [0], [1], [0, 0, 1, 1], [], []>} : vector<2x256xf32>, vector<256x512xf32>, vector<2x512xf32> -> vector<2x512xf32>
    %c0_13 = arith.constant 0 : index
    %c0_14 = arith.constant 0 : index
    %13 = vector.load %arg6[%c0_13, %c0_14] : memref<1x512xf32, #tpu.memory_space<vmem>>, vector<1x512xf32>
    %14 = vector.broadcast %13 : vector<1x512xf32> to vector<2x512xf32>
    %15 = arith.addf %12, %14 : vector<2x512xf32>
    %c0_15 = arith.constant 0 : index
    %c0_16 = arith.constant 0 : index
    %16 = vector.load %arg7[%c0_15, %c0_16] : memref<512x1024xf32, #tpu.memory_space<vmem>>, vector<512x1024xf32>
    %cst_17 = arith.constant dense<0.000000e+00> : vector<2x1024xf32>
    %17 = tpu.matmul %15, %16, %cst_17 {dimension_numbers = #tpu.dot_dimension_numbers<[1], [0], [0], [1], [0, 0, 1, 1], [], []>} : vector<2x512xf32>, vector<512x1024xf32>, vector<2x1024xf32> -> vector<2x1024xf32>
    %c0_18 = arith.constant 0 : index
    %c0_19 = arith.constant 0 : index
    %18 = vector.load %arg8[%c0_18, %c0_19] : memref<1x1024xf32, #tpu.memory_space<vmem>>, vector<1x1024xf32>
    %19 = vector.broadcast %18 : vector<1x1024xf32> to vector<2x1024xf32>
    %20 = arith.addf %17, %19 : vector<2x1024xf32>
    %c0_20 = arith.constant 0 : index
    %c0_21 = arith.constant 0 : index
    %21 = vector.load %arg9[%c0_20, %c0_21] : memref<1024x256xf32, #tpu.memory_space<vmem>>, vector<1024x256xf32>
    %cst_22 = arith.constant dense<0.000000e+00> : vector<2x256xf32>
    %22 = tpu.matmul %20, %21, %cst_22 {dimension_numbers = #tpu.dot_dimension_numbers<[1], [0], [0], [1], [0, 0, 1, 1], [], []>} : vector<2x1024xf32>, vector<1024x256xf32>, vector<2x256xf32> -> vector<2x256xf32>
    %c0_23 = arith.constant 0 : index
    %c0_24 = arith.constant 0 : index
    %23 = vector.load %arg10[%c0_23, %c0_24] : memref<1x256xf32, #tpu.memory_space<vmem>>, vector<1x256xf32>
    %24 = vector.broadcast %23 : vector<1x256xf32> to vector<2x256xf32>
    %25 = arith.addf %22, %24 : vector<2x256xf32>
    %cst_25 = arith.constant 0.000000e+00 : f32
    %26 = vector.broadcast %cst_25 : f32 to vector<2x256xf32>
    %27 = arith.maximumf %25, %26 : vector<2x256xf32>
    %c0_26 = arith.constant 0 : index
    %c0_27 = arith.constant 0 : index
    %28 = vector.load %arg11[%c0_26, %c0_27] : memref<256x128xf32, #tpu.memory_space<vmem>>, vector<256x128xf32>
    %cst_28 = arith.constant dense<0.000000e+00> : vector<2x128xf32>
    %29 = tpu.matmul %27, %28, %cst_28 {dimension_numbers = #tpu.dot_dimension_numbers<[1], [0], [0], [1], [0, 0, 1, 1], [], []>} : vector<2x256xf32>, vector<256x128xf32>, vector<2x128xf32> -> vector<2x128xf32>
    %c0_29 = arith.constant 0 : index
    %c0_30 = arith.constant 0 : index
    %30 = vector.load %arg12[%c0_29, %c0_30] : memref<1x128xf32, #tpu.memory_space<vmem>>, vector<1x128xf32>
    %31 = vector.broadcast %30 : vector<1x128xf32> to vector<2x128xf32>
    %32 = arith.addf %29, %31 : vector<2x128xf32>
    %cst_31 = arith.constant 0.000000e+00 : f32
    %33 = vector.broadcast %cst_31 : f32 to vector<2x128xf32>
    %34 = arith.maximumf %32, %33 : vector<2x128xf32>
    %c0_32 = arith.constant 0 : index
    %c0_33 = arith.constant 0 : index
    %35 = vector.load %arg13[%c0_32, %c0_33] : memref<128x128xf32, #tpu.memory_space<vmem>>, vector<128x128xf32>
    %cst_34 = arith.constant dense<0.000000e+00> : vector<2x128xf32>
    %36 = tpu.matmul %34, %35, %cst_34 {dimension_numbers = #tpu.dot_dimension_numbers<[1], [0], [0], [1], [0, 0, 1, 1], [], []>} : vector<2x128xf32>, vector<128x128xf32>, vector<2x128xf32> -> vector<2x128xf32>
    %c0_35 = arith.constant 0 : index
    %c0_36 = arith.constant 0 : index
    %37 = vector.load %arg14[%c0_35, %c0_36] : memref<1x128xf32, #tpu.memory_space<vmem>>, vector<1x128xf32>
    %38 = vector.broadcast %37 : vector<1x128xf32> to vector<2x128xf32>
    %39 = arith.addf %36, %38 : vector<2x128xf32>
    %c0_37 = arith.constant 0 : index
    %c0_38 = arith.constant 0 : index
    %40 = vector.load %arg15[%c0_37, %c0_38] : memref<2x128xf32, #tpu.memory_space<vmem>>, vector<2x128xf32>
    tpu.vector_store %arg15[%c0_37, %c0_38], %39 {strides = array<i32>} : memref<2x128xf32, #tpu.memory_space<vmem>>, vector<2x128xf32>,
    return
  }
}

</mosaic_0001>

<bundles_post_ra>
// kernel: nn_forward.1
= control target key start
LH: loop header
LB: loop body
LE: loop exit
PB: predicated region body
PF: predicated region fallthrough
CT: control target
= control target key end

     0   :  { %20 = vsyncpa [#allocation3], 0  ;;  %s4497_s0 = inlined_call_operand.vmem [shape: f32[2,4], index: 0, kind: input, shape index: {}]   ;;  %s4498_s1 = inlined_call_operand.hbm [shape: f32[4,128], index: 1, kind: input, shape index: {}]   ;;  %s4499_s2 = inlined_call_operand.hbm [shape: f32[1,128], index: 2, kind: input, shape index: {}]   ;;  %s4500_s3 = inlined_call_operand.hbm [shape: f32[128,256], index: 3, kind: input, shape index: {}]   ;;  %s4501_s4 = inlined_call_operand.hbm [shape: f32[1,256], index: 4, kind: input, shape index: {}]   ;;  %s4502_s5 = inlined_call_operand.hbm [shape: f32[256,512], index: 5, kind: input, shape index: {}]   ;;  %s4503_s6 = inlined_call_operand.hbm [shape: f32[1,512], index: 6, kind: input, shape index: {}]   ;;  %s4504_s7 = inlined_call_operand.hbm [shape: f32[512,1024], index: 7, kind: input, shape index: {}]   ;;  %s4505_s8 = inlined_call_operand.hbm [shape: f32[1,1024], index: 8, kind: input, shape index: {}]   ;;  %s4506_s9 = inlined_call_operand.hbm [shape: f32[1024,256], index: 9, kind: input, shape index: {}]   ;;  %s4507_s10 = inlined_call_operand.hbm [shape: f32[1,256], index: 10, kind: input, shape index: {}]   ;;  %s4508_s11 = inlined_call_operand.hbm [shape: f32[256,128], index: 11, kind: input, shape index: {}]   ;;  %s4509_s12 = inlined_call_operand.hbm [shape: f32[1,128], index: 12, kind: input, shape index: {}]   ;;  %s4510_s13 = inlined_call_operand.hbm [shape: f32[128,128], index: 13, kind: input, shape index: {}]   ;;  %s4511_s14 = inlined_call_operand.hbm [shape: f32[1,128], index: 14, kind: input, shape index: {}]   ;;  %s4512_s15 = inlined_call_operand.hbm [shape: f32[2,128], index: 15, kind: output, shape index: {}]  }
   0x1   :  { %21 = vsyncpa [#allocation6], 0 }
   0x2   :  { %22 = vsyncpa [#allocation9], 0 }
   0x3   :  { %23 = vsyncpa [#allocation12], 0 }
   0x4   :  { %24 = vsyncpa [#allocation15], 0 }
   0x5   :  { %25 = vsyncpa [#allocation18], 0 }
   0x6   :  { %26 = vsyncpa [#allocation21], 0 }
   0x7   :  { %27 = vsyncpa [#allocation24], 0 }
   0x8   :  { %28 = vsyncpa [#allocation4], 0  ;;  %s4102_s18 = smov [#allocation5]   ;;  %s4103_s20 = smov [#allocation8]  }
   0x9   :  { %s47_s19 = sshll.u32 %s4102_s18, 4  ;;  %s69_s21 = sshll.u32 %s4103_s20, 4  ;;  %s48_s19 = int_to_ptr.vmem [resolvable:$true] %s47_s19  ;;  %s70_s21 = int_to_ptr.vmem [resolvable:$true] %s69_s21 }
   0xa   :  { %s3754_s24 = scalar_lea.hbm %s4499_s2, 16 }
   0xb   :  { %p3755_p0 = scmp.ne.s32.totalorder %s4499_s2, %s3754_s24  ;;  %p3758_p1 = scmp.lt.u32.totalorder %s3754_s24, %s4499_s2 }
   0xd   :  { %p3760_p2 = pnand %p3758_p1, %p3755_p0 }
   0xf   :  { %3763 = shalt.err (!%p3760_p2)
}
  0x10   :  { %s3764_s29 = scalar_lea.vmem %s48_s19, 16  ;;  %s3768_s30 = scalar_lea.vmem %s48_s19, 32 }
  0x11   :  { %p3765_p3 = scmp.ne.s32.totalorder %s48_s19, %s3764_s29  ;;  %p3769_p4 = scmp.lt.s32.totalorder %s48_s19, %s48_s19 }
  0x12   :  { %p3770_p5 = scmp.lt.s32.totalorder %s3768_s30, %s3764_s29 }
  0x14   :  { %p3771_p6 = por %p3770_p5, %p3769_p4 }
  0x16   :  { %p3772_p7 = pnand %p3771_p6, %p3765_p3 }
  0x18   :  { %3775 = shalt.err (!%p3772_p7)
}
  0x19   :  { %50 = dma.hbm_to_vmem [thread:$0]  %s4499_s2, 16, %s48_s19, [#allocation6]  }
  0x1a   :  { %s3776_s22 = scalar_lea.hbm %s4501_s4, 32 }
  0x1b   :  { %p3777_p8 = scmp.ne.s32.totalorder %s4501_s4, %s3776_s22  ;;  %p3780_p9 = scmp.lt.u32.totalorder %s3776_s22, %s4501_s4 }
  0x1d   :  { %p3782_p10 = pnand %p3780_p9, %p3777_p8 }
  0x1f   :  { %3785 = shalt.err (!%p3782_p10)
}
  0x20   :  { %s3786_s27 = scalar_lea.vmem %s70_s21, 32  ;;  %p3791_p12 = scmp.lt.s32.totalorder %s70_s21, %s70_s21 }
  0x21   :  { %p3787_p11 = scmp.ne.s32.totalorder %s70_s21, %s3786_s27  ;;  %p3792_p13 = scmp.lt.s32.totalorder %s3786_s27, %s3786_s27 }
  0x23   :  { %p3793_p0 = por %p3792_p13, %p3791_p12 }
  0x25   :  { %p3794_p1 = pnand %p3793_p0, %p3787_p11 }
  0x27   :  { %3797 = shalt.err (!%p3794_p1)
}
  0x28   :  { %72 = dma.hbm_to_vmem [thread:$0]  %s4501_s4, 32, %s70_s21, [#allocation9]  }
  0x29   :  { %s4104_s28 = smov [#allocation11]   ;;  %s4105_s30 = smov [#allocation14]  }
  0x2a   :  { %s91_s29 = sshll.u32 %s4104_s28, 4  ;;  %s113_s16 = sshll.u32 %s4105_s30, 4  ;;  %s92_s29 = int_to_ptr.vmem [resolvable:$true] %s91_s29  ;;  %s114_s16 = int_to_ptr.vmem [resolvable:$true] %s113_s16 }
  0x2b   :  { %s3798_s20 = scalar_lea.hbm %s4503_s6, 64 }
  0x2c   :  { %p3799_p2 = scmp.ne.s32.totalorder %s4503_s6, %s3798_s20  ;;  %p3802_p3 = scmp.lt.u32.totalorder %s3798_s20, %s4503_s6 }
  0x2e   :  { %p3804_p4 = pnand %p3802_p3, %p3799_p2 }
  0x30   :  { %3807 = shalt.err (!%p3804_p4)
}
  0x31   :  { %s3808_s4 = scalar_lea.vmem %s92_s29, 64  ;;  %p3813_p6 = scmp.lt.s32.totalorder %s92_s29, %s92_s29 }
  0x32   :  { %p3809_p5 = scmp.ne.s32.totalorder %s92_s29, %s3808_s4  ;;  %p3814_p7 = scmp.lt.s32.totalorder %s3808_s4, %s3808_s4 }
  0x34   :  { %p3815_p8 = por %p3814_p7, %p3813_p6 }
  0x36   :  { %p3816_p9 = pnand %p3815_p8, %p3809_p5 }
  0x38   :  { %3819 = shalt.err (!%p3816_p9)
}
  0x39   :  { %94 = dma.hbm_to_vmem [thread:$0]  %s4503_s6, 64, %s92_s29, [#allocation12]  }
  0x3a   :  { %s3820_s19 = scalar_lea.hbm %s4505_s8, 128 }
  0x3b   :  { %p3821_p10 = scmp.ne.s32.totalorder %s4505_s8, %s3820_s19  ;;  %p3824_p11 = scmp.lt.u32.totalorder %s3820_s19, %s4505_s8 }
  0x3d   :  { %p3826_p12 = pnand %p3824_p11, %p3821_p10 }
  0x3f   :  { %3829 = shalt.err (!%p3826_p12)
}
  0x40   :  { %s3830_s20 = scalar_lea.vmem %s114_s16, 128  ;;  %p3835_p0 = scmp.lt.s32.totalorder %s114_s16, %s114_s16 }
  0x41   :  { %p3831_p13 = scmp.ne.s32.totalorder %s114_s16, %s3830_s20  ;;  %p3836_p1 = scmp.lt.s32.totalorder %s3830_s20, %s3830_s20 }
  0x43   :  { %p3837_p2 = por %p3836_p1, %p3835_p0 }
  0x45   :  { %p3838_p3 = pnand %p3837_p2, %p3831_p13 }
  0x47   :  { %3841 = shalt.err (!%p3838_p3)
}
  0x48   :  { %116 = dma.hbm_to_vmem [thread:$0]  %s4505_s8, 128, %s114_s16, [#allocation15]  }
  0x49   :  { %s4106_s22 = smov [#allocation17]   ;;  %s4107_s24 = smov [#allocation20]  }
  0x4a   :  { %s135_s23 = sshll.u32 %s4106_s22, 4  ;;  %s157_s25 = sshll.u32 %s4107_s24, 4  ;;  %s136_s23 = int_to_ptr.vmem [resolvable:$true] %s135_s23  ;;  %s158_s25 = int_to_ptr.vmem [resolvable:$true] %s157_s25 }
  0x4b   :  { %s3842_s26 = scalar_lea.hbm %s4507_s10, 32 }
  0x4c   :  { %p3843_p4 = scmp.ne.s32.totalorder %s4507_s10, %s3842_s26  ;;  %p3846_p5 = scmp.lt.u32.totalorder %s3842_s26, %s4507_s10 }
  0x4e   :  { %p3848_p6 = pnand %p3846_p5, %p3843_p4 }
  0x50   :  { %3851 = shalt.err (!%p3848_p6)
}
  0x51   :  { %s3852_s8 = scalar_lea.vmem %s136_s23, 32  ;;  %p3857_p8 = scmp.lt.s32.totalorder %s136_s23, %s136_s23 }
  0x52   :  { %p3853_p7 = scmp.ne.s32.totalorder %s136_s23, %s3852_s8  ;;  %p3858_p9 = scmp.lt.s32.totalorder %s3852_s8, %s3852_s8 }
  0x54   :  { %p3859_p10 = por %p3858_p9, %p3857_p8 }
  0x56   :  { %p3860_p11 = pnand %p3859_p10, %p3853_p7 }
  0x58   :  { %3863 = shalt.err (!%p3860_p11)
}
  0x59   :  { %138 = dma.hbm_to_vmem [thread:$0]  %s4507_s10, 32, %s136_s23, [#allocation18]  }
  0x5a   :  { %s3864_s20 = scalar_lea.hbm %s4509_s12, 16 }
  0x5b   :  { %p3865_p12 = scmp.ne.s32.totalorder %s4509_s12, %s3864_s20  ;;  %p3868_p13 = scmp.lt.u32.totalorder %s3864_s20, %s4509_s12 }
  0x5d   :  { %p3870_p0 = pnand %p3868_p13, %p3865_p12 }
  0x5f   :  { %3873 = shalt.err (!%p3870_p0)
}
  0x60   :  { %s3874_s4 = scalar_lea.vmem %s158_s25, 16  ;;  %s3878_s21 = scalar_lea.vmem %s158_s25, 32 }
  0x61   :  { %p3875_p1 = scmp.ne.s32.totalorder %s158_s25, %s3874_s4  ;;  %p3879_p2 = scmp.lt.s32.totalorder %s158_s25, %s158_s25 }
  0x62   :  { %p3880_p3 = scmp.lt.s32.totalorder %s3878_s21, %s3874_s4 }
  0x64   :  { %p3881_p4 = por %p3880_p3, %p3879_p2 }
  0x66   :  { %p3882_p5 = pnand %p3881_p4, %p3875_p1 }
  0x68   :  { %3885 = shalt.err (!%p3882_p5)
}
  0x69   :  { %160 = dma.hbm_to_vmem [thread:$0]  %s4509_s12, 16, %s158_s25, [#allocation21]  }
  0x6a   :  { %s4108_s26 = smov [#allocation2]   ;;  %s4109_s2 = smov [#allocation7]  }
  0x6b   :  { %s37_s27 = sshll.u32 %s4108_s26, 4  ;;  %s56_s19 = sshll.u32 %s4109_s2, 4  ;;  %s38_s27 = int_to_ptr.vmem [resolvable:$true] %s37_s27  ;;  %s4280_s19 = int_to_ptr.vmem [resolvable:$true] %s56_s19 }
  0x6c   :  { %s3886_s16 = scalar_lea.hbm %s4498_s1, 64 }
  0x6d   :  { %p3887_p6 = scmp.ne.s32.totalorder %s4498_s1, %s3886_s16  ;;  %p3890_p7 = scmp.lt.u32.totalorder %s3886_s16, %s4498_s1 }
  0x6f   :  { %p3892_p8 = pnand %p3890_p7, %p3887_p6 }
  0x71   :  { %3895 = shalt.err (!%p3892_p8)
}
  0x72   :  { %s3896_s12 = scalar_lea.vmem %s38_s27, 64  ;;  %p3901_p10 = scmp.lt.s32.totalorder %s38_s27, %s38_s27 }
  0x73   :  { %p3897_p9 = scmp.ne.s32.totalorder %s38_s27, %s3896_s12  ;;  %p3902_p11 = scmp.lt.s32.totalorder %s3896_s12, %s3896_s12 }
  0x75   :  { %p3903_p12 = por %p3902_p11, %p3901_p10 }
  0x77   :  { %p3904_p13 = pnand %p3903_p12, %p3897_p9 }
  0x79   :  { %3907 = shalt.err (!%p3904_p13)
}
  0x7a   :  { %40 = dma.hbm_to_vmem [thread:$0]  %s4498_s1, 64, %s38_s27, [#allocation3]  }
  0x7b   :  { %s3908_s24 = scalar_lea.hbm %s4500_s3, 4096 }
  0x7c   :  { %p3909_p0 = scmp.ne.s32.totalorder %s4500_s3, %s3908_s24  ;;  %p3912_p1 = scmp.lt.u32.totalorder %s3908_s24, %s4500_s3 }
  0x7e   :  { %p3914_p2 = pnand %p3912_p1, %p3909_p0 }
  0x80   :  { %3917 = shalt.err (!%p3914_p2)
}
  0x81   :  { %s3918_s26 = scalar_lea.vmem %s4280_s19, 4096  ;;  %p3923_p4 = scmp.lt.s32.totalorder %s4280_s19, %s4280_s19 }
  0x82   :  { %p3919_p3 = scmp.ne.s32.totalorder %s4280_s19, %s3918_s26  ;;  %p3924_p5 = scmp.lt.s32.totalorder %s3918_s26, %s3918_s26 }
  0x84   :  { %p3925_p6 = por %p3924_p5, %p3923_p4 }
  0x86   :  { %p3926_p7 = pnand %p3925_p6, %p3919_p3 }
  0x88   :  { %3929 = shalt.err (!%p3926_p7)
}
  0x89   :  { %s4110_s1 = smov 256   ;;  %s4111_s27 = smov 16  }
  0x8a   :  { %62 = dma.hbm_to_vmem [thread:$0]  %s4500_s3, 4096, %s4280_s19, [#allocation6], %s4110_s1, %s4110_s1, %s4111_s27  }
  0x8b   :  { %s4112_s8 = smov [#allocation10]   ;;  %s3930_s18 = scalar_lea.hbm %s4502_s5, 16384 }
  0x8c   :  { %s78_s16 = sshll.u32 %s4112_s8, 4  ;;  %p3931_p8 = scmp.ne.s32.totalorder %s4502_s5, %s3930_s18  ;;  %s79_s16 = int_to_ptr.vmem [resolvable:$true] %s78_s16 }
  0x8d   :  { %p3934_p9 = scmp.lt.u32.totalorder %s3930_s18, %s4502_s5 }
  0x8f   :  { %p3936_p10 = pnand %p3934_p9, %p3931_p8 }
  0x91   :  { %3939 = shalt.err (!%p3936_p10)
}
  0x92   :  { %s3940_s29 = scalar_lea.vmem %s79_s16, 16384  ;;  %p3945_p12 = scmp.lt.s32.totalorder %s79_s16, %s79_s16 }
  0x93   :  { %p3941_p11 = scmp.ne.s32.totalorder %s79_s16, %s3940_s29  ;;  %p3946_p13 = scmp.lt.s32.totalorder %s3940_s29, %s3940_s29 }
  0x95   :  { %p3947_p0 = por %p3946_p13, %p3945_p12 }
  0x97   :  { %p3948_p1 = pnand %p3947_p0, %p3941_p11 }
  0x99   :  { %3951 = shalt.err (!%p3948_p1)
}
  0x9a   :  { %s4113_s3 = smov 512   ;;  %s4114_s19 = smov 32  }
  0x9b   :  { %84 = dma.hbm_to_vmem [thread:$0]  %s4502_s5, 16384, %s79_s16, [#allocation9], %s4113_s3, %s4113_s3, %s4114_s19  }
  0x9c   :  { %s4115_s4 = smov [#allocation13]   ;;  %s3952_s26 = scalar_lea.hbm %s4504_s7, 65536 }
  0x9d   :  { %s100_s21 = sshll.u32 %s4115_s4, 4  ;;  %p3953_p2 = scmp.ne.s32.totalorder %s4504_s7, %s3952_s26  ;;  %s101_s21 = int_to_ptr.vmem [resolvable:$true] %s100_s21 }
  0x9e   :  { %p3956_p3 = scmp.lt.u32.totalorder %s3952_s26, %s4504_s7 }
  0xa0   :  { %p3958_p4 = pnand %p3956_p3, %p3953_p2 }
  0xa2   :  { %3961 = shalt.err (!%p3958_p4)
}
  0xa3   :  { %s3962_s17 = scalar_lea.vmem %s101_s21, 65536  ;;  %p3967_p6 = scmp.lt.s32.totalorder %s101_s21, %s101_s21 }
  0xa4   :  { %p3963_p5 = scmp.ne.s32.totalorder %s101_s21, %s3962_s17  ;;  %p3968_p7 = scmp.lt.s32.totalorder %s3962_s17, %s3962_s17 }
  0xa6   :  { %p3969_p8 = por %p3968_p7, %p3967_p6 }
  0xa8   :  { %p3970_p9 = pnand %p3969_p8, %p3963_p5 }
  0xaa   :  { %3973 = shalt.err (!%p3970_p9)
}
  0xab   :  { %s4116_s5 = smov 1024   ;;  %s4117_s16 = smov 64  }
  0xac   :  { %106 = dma.hbm_to_vmem [thread:$0]  %s4504_s7, 65536, %s101_s21, [#allocation12], %s4116_s5, %s4116_s5, %s4117_s16  }
  0xad   :  { %s4118_s12 = smov [#allocation16]   ;;  %s4119_s6 = smov [#allocation19]  }
  0xae   :  { %s122_s25 = sshll.u32 %s4118_s12, 4  ;;  %s144_s29 = sshll.u32 %s4119_s6, 4  ;;  %s123_s25 = int_to_ptr.vmem [resolvable:$true] %s122_s25  ;;  %s4338_s29 = int_to_ptr.vmem [resolvable:$true] %s144_s29 }
  0xaf   :  { %s3974_s22 = scalar_lea.hbm %s4506_s9, 32768 }
  0xb0   :  { %p3975_p10 = scmp.ne.s32.totalorder %s4506_s9, %s3974_s22  ;;  %p3978_p11 = scmp.lt.u32.totalorder %s3974_s22, %s4506_s9 }
  0xb2   :  { %p3980_p12 = pnand %p3978_p11, %p3975_p10 }
  0xb4   :  { %3983 = shalt.err (!%p3980_p12)
}
  0xb5   :  { %s3984_s7 = scalar_lea.vmem %s123_s25, 32768  ;;  %p3989_p0 = scmp.lt.s32.totalorder %s123_s25, %s123_s25 }
  0xb6   :  { %p3985_p13 = scmp.ne.s32.totalorder %s123_s25, %s3984_s7  ;;  %p3990_p1 = scmp.lt.s32.totalorder %s3984_s7, %s3984_s7 }
  0xb8   :  { %p3991_p2 = por %p3990_p1, %p3989_p0 }
  0xba   :  { %p3992_p3 = pnand %p3991_p2, %p3985_p13 }
  0xbc   :  { %3995 = shalt.err (!%p3992_p3)
}
  0xbd   :  { %128 = dma.hbm_to_vmem [thread:$0]  %s4506_s9, 32768, %s123_s25, [#allocation15], %s4110_s1, %s4110_s1, %s4111_s27  }
  0xbe   :  { %s3996_s8 = scalar_lea.hbm %s4508_s11, 4096 }
  0xbf   :  { %p3997_p4 = scmp.ne.s32.totalorder %s4508_s11, %s3996_s8  ;;  %p4000_p5 = scmp.lt.u32.totalorder %s3996_s8, %s4508_s11 }
  0xc1   :  { %p4002_p6 = pnand %p4000_p5, %p3997_p4 }
  0xc3   :  { %4005 = shalt.err (!%p4002_p6)
}
  0xc4   :  { %s4006_s18 = scalar_lea.vmem %s4338_s29, 4096  ;;  %p4011_p8 = scmp.lt.s32.totalorder %s4338_s29, %s4338_s29 }
  0xc5   :  { %p4007_p7 = scmp.ne.s32.totalorder %s4338_s29, %s4006_s18  ;;  %p4012_p9 = scmp.lt.s32.totalorder %s4006_s18, %s4006_s18 }
  0xc7   :  { %p4013_p10 = por %p4012_p9, %p4011_p8 }
  0xc9   :  { %p4014_p11 = pnand %p4013_p10, %p4007_p7 }
  0xcb   :  { %4017 = shalt.err (!%p4014_p11)
}
  0xcc   :  { %s4120_s9 = smov 128   ;;  %s4121_s1 = smov 8  }
  0xcd   :  { %150 = dma.hbm_to_vmem [thread:$0]  %s4508_s11, 4096, %s4338_s29, [#allocation18], %s4120_s9, %s4120_s9, %s4121_s1  }
  0xce   :  { %s4122_s12 = smov [#allocation22]   ;;  %s4123_s6 = smov [#allocation23]  }
  0xcf   :  { %s166_s25 = sshll.u32 %s4122_s12, 4  ;;  %s179_s3 = sshll.u32 %s4123_s6, 4  ;;  %s167_s25 = int_to_ptr.vmem [resolvable:$true] %s166_s25  ;;  %s180_s3 = int_to_ptr.vmem [resolvable:$true] %s179_s3 }
  0xd0   :  { %s4018_s24 = scalar_lea.hbm %s4510_s13, 2048 }
  0xd1   :  { %p4019_p12 = scmp.ne.s32.totalorder %s4510_s13, %s4018_s24  ;;  %p4022_p13 = scmp.lt.u32.totalorder %s4018_s24, %s4510_s13 }
  0xd3   :  { %p4024_p0 = pnand %p4022_p13, %p4019_p12 }
  0xd5   :  { %4027 = shalt.err (!%p4024_p0)
}
  0xd6   :  { %s4028_s11 = scalar_lea.vmem %s167_s25, 2048  ;;  %p4033_p2 = scmp.lt.s32.totalorder %s167_s25, %s167_s25 }
  0xd7   :  { %p4029_p1 = scmp.ne.s32.totalorder %s167_s25, %s4028_s11  ;;  %p4034_p3 = scmp.lt.s32.totalorder %s4028_s11, %s4028_s11 }
  0xd9   :  { %p4035_p4 = por %p4034_p3, %p4033_p2 }
  0xdb   :  { %p4036_p5 = pnand %p4035_p4, %p4029_p1 }
  0xdd   :  { %4039 = shalt.err (!%p4036_p5)
}
  0xde   :  { %172 = dma.hbm_to_vmem [thread:$0]  %s4510_s13, 2048, %s167_s25, [#allocation21], %s4120_s9, %s4120_s9, %s4121_s1  }
  0xdf   :  { %s4040_s28 = scalar_lea.hbm %s4511_s14, 16 }
  0xe0   :  { %p4041_p6 = scmp.ne.s32.totalorder %s4511_s14, %s4040_s28  ;;  %p4044_p7 = scmp.lt.u32.totalorder %s4040_s28, %s4511_s14 }
  0xe2   :  { %p4046_p8 = pnand %p4044_p7, %p4041_p6 }
  0xe4   :  { %4049 = shalt.err (!%p4046_p8)
}
  0xe5   :  { %s4050_s16 = scalar_lea.vmem %s180_s3, 16  ;;  %s4054_s18 = scalar_lea.vmem %s180_s3, 32 }
  0xe6   :  { %p4051_p9 = scmp.ne.s32.totalorder %s180_s3, %s4050_s16  ;;  %p4055_p10 = scmp.lt.s32.totalorder %s180_s3, %s180_s3 }
  0xe7   :  { %p4056_p11 = scmp.lt.s32.totalorder %s4054_s18, %s4050_s16 }
  0xe9   :  { %p4057_p12 = por %p4056_p11, %p4055_p10 }
  0xeb   :  { %p4058_p13 = pnand %p4057_p12, %p4051_p9 }
  0xed   :  { %4061 = shalt.err (!%p4058_p13)
}
  0xee   :  { %182 = dma.hbm_to_vmem [thread:$0]  %s4511_s14, 16, %s180_s3, [#allocation24]  }
  0xef   :  { %4084 = dma.done.wait [#allocation3], 64  }
  0xf0   :  { %4085 = vsyncadd [#allocation3], 4294967232 }
  0xf1   :  { %4086 = dma.done.wait [#allocation6], 4112  }
  0xf2   :  { %4087 = vsyncadd [#allocation6], 4294963184 }
  0xf3   :  { %4088 = dma.done.wait [#allocation9], 16416  }
  0xf4   :  { %4089 = vsyncadd [#allocation9], 4294950880 }
  0xf5   :  { %4090 = dma.done.wait [#allocation12], 65600  }
  0xf6   :  { %4091 = vsyncadd [#allocation12], 4294901696 }
  0xf7   :  { %4092 = dma.done.wait [#allocation15], 32896  }
  0xf8   :  { %4093 = vsyncadd [#allocation15], 4294934400 }
  0xf9   :  { %4094 = dma.done.wait [#allocation18], 4128  }
  0xfa   :  { %4095 = vsyncadd [#allocation18], 4294963168 }
  0xfb   :  { %4096 = dma.done.wait [#allocation21], 2064  }
  0xfc   :  { %4097 = vsyncadd [#allocation21], 4294965232 }
  0xfd   :  { %4098 = dma.done.wait [#allocation24], 16  }
  0xfe   :  { %4099 = vsyncadd [#allocation24], 4294967280  ;;  %v4124_v0 = vmov 0.0   ;;  %vm4125_vm0 = vmmov 0   ;;  %vm238_vm1 = vcmask 1043456   ;;  %vm234_vm2 = vcmask 31744  }
  0xff   :  { %2680 = vmatprep.subr.mxu1 %v4124_v0  ;;  %2682 = vmatprep.mubr.msk.f32.mxu1 %vm4125_vm0, %v4124_v0  ;;  %v226_v1 = vld [vmem:[#allocation2] sm:$0xf]  ;;  %v225_v2 = vld [vmem:[%s4497_s0] sm:$0x3]  ;;  %v313_v3 = vld [vmem:[#allocation7 + $0x8] sm:$0xff]  ;;  %s4127_s0 = smov [#allocation25]  }
 0x100   :  { %2681 = vmatpush3.msk.msra.mxu1 %vm238_vm1, %v226_v1  ;;  %v315_v4 = vld [vmem:[#allocation7 + $0x18] sm:$0xff]  ;;  %v312_v5 = vld [vmem:[#allocation7] sm:$0xff]  ;;  %v314_v6 = vld [vmem:[#allocation7 + $0x10] sm:$0xff]  ;;  %s2605_s27 = sshll.u32 %s4127_s0, 4  ;;  %s2606_s27 = int_to_ptr.vmem [resolvable:$true] %s2605_s27 }
 0x101   :  { %2683 = vmatmul.mubr.msk.f32.vlgmr.msra.gmra.mrb[0].mxu1 %vm234_vm2, %v225_v2  ;;  %v2720_v7 = vpack.c.bf16 %v315_v4, %v313_v3  ;;  %v2722_v8 = vpack.c.bf16 %v314_v6, %v312_v5  ;;  %v317_v9 = vld [vmem:[#allocation7 + $0x28] sm:$0xff]  ;;  %v319_v10 = vld [vmem:[#allocation7 + $0x38] sm:$0xff]  ;;  %v316_v11 = vld [vmem:[#allocation7 + $0x20] sm:$0xff]  ;;  %s4062_s20 = scalar_lea.vmem %s2606_s27, 32  ;;  %p4067_p1 = scmp.lt.s32.totalorder %s2606_s27, %s2606_s27 }
 0x102   :  { %v2724_v12 = vpack.c.bf16 %v319_v10, %v317_v9  ;;  %v318_v13 = vld [vmem:[#allocation7 + $0x30] sm:$0xff]  ;;  %v321_v14 = vld [vmem:[#allocation7 + $0x48] sm:$0xff]  ;;  %v323_v15 = vld [vmem:[#allocation7 + $0x58] sm:$0xff]  ;;  %420 = vmatprep.mubr.f32.mxu1 %v4124_v0  ;;  %p4063_p0 = scmp.ne.s32.totalorder %s2606_s27, %s4062_s20  ;;  %p4068_p2 = scmp.lt.s32.totalorder %s4062_s20, %s4062_s20 }
 0x103   :  { %2721 = vmatprep.subr.bf16.mxu1 %v2720_v7  ;;  %v2726_v16 = vpack.c.bf16 %v318_v13, %v316_v11  ;;  %v2728_v17 = vpack.c.bf16 %v323_v15, %v321_v14  ;;  %v320_v18 = vld [vmem:[#allocation7 + $0x40] sm:$0xff]  ;;  %v322_v19 = vld [vmem:[#allocation7 + $0x50] sm:$0xff]  ;;  %v325_v20 = vld [vmem:[#allocation7 + $0x68] sm:$0xff] }
 0x104   :  { %2723 = vmatpush1.bf16.msra.mxu1 %v2722_v8  ;;  %v327_v21 = vld [vmem:[#allocation7 + $0x78] sm:$0xff]  ;;  %v2730_v22 = vpack.c.bf16 %v322_v19, %v320_v18  ;;  %v324_v24 = vld [vmem:[#allocation7 + $0x60] sm:$0xff]  ;;  %v326_v25 = vld [vmem:[#allocation7 + $0x70] sm:$0xff]  ;;  %p4069_p3 = por %p4068_p2, %p4067_p1 }
 0x105   :  { %2725 = vmatprep.subr.bf16.mxu1 %v2724_v12  ;;  %v2732_v23 = vpack.c.bf16 %v327_v21, %v325_v20  ;;  %v329_v26 = vld [vmem:[#allocation7 + $0x88] sm:$0xff]  ;;  %v331_v27 = vld [vmem:[#allocation7 + $0x98] sm:$0xff]  ;;  %v2734_v28 = vpack.c.bf16 %v326_v25, %v324_v24  ;;  %v328_v30 = vld [vmem:[#allocation7 + $0x80] sm:$0xff] }
 0x106   :  { %v2736_v29 = vpack.c.bf16 %v331_v27, %v329_v26  ;;  %v330_v31 = vld [vmem:[#allocation7 + $0x90] sm:$0xff]  ;;  %v333_v32 = vld [vmem:[#allocation7 + $0xa8] sm:$0xff]  ;;  %v335_v33 = vld [vmem:[#allocation7 + $0xb8] sm:$0xff]  ;;  %p4070_p4 = pnand %p4069_p3, %p4063_p0 }
 0x107   :  { %v2738_v34 = vpack.c.bf16 %v330_v31, %v328_v30  ;;  %v2740_v35 = vpack.c.bf16 %v335_v33, %v333_v32  ;;  %v332_v36 = vld [vmem:[#allocation7 + $0xa0] sm:$0xff]  ;;  %v334_v37 = vld [vmem:[#allocation7 + $0xb0] sm:$0xff]  ;;  %v337_v38 = vld [vmem:[#allocation7 + $0xc8] sm:$0xff] }
 0x108   :  { %2727 = vmatpush1.bf16.msra.mxu1 %v2726_v16  ;;  %v339_v39 = vld [vmem:[#allocation7 + $0xd8] sm:$0xff]  ;;  %v2742_v40 = vpack.c.bf16 %v334_v37, %v332_v36  ;;  %v336_v42 = vld [vmem:[#allocation7 + $0xc0] sm:$0xff]  ;;  %v338_v43 = vld [vmem:[#allocation7 + $0xd0] sm:$0xff] }
 0x109   :  { %2729 = vmatprep.subr.bf16.mxu1 %v2728_v17  ;;  %v2744_v41 = vpack.c.bf16 %v339_v39, %v337_v38  ;;  %v341_v44 = vld [vmem:[#allocation7 + $0xe8] sm:$0xff]  ;;  %v343_v45 = vld [vmem:[#allocation7 + $0xf8] sm:$0xff]  ;;  %v2746_v46 = vpack.c.bf16 %v338_v43, %v336_v42  ;;  %v340_v48 = vld [vmem:[#allocation7 + $0xe0] sm:$0xff] }
 0x10a   :  { %v2748_v47 = vpack.c.bf16 %v343_v45, %v341_v44  ;;  %v342_v49 = vld [vmem:[#allocation7 + $0xf0] sm:$0xff]  ;;  %v427_v54 = vld [vmem:[#allocation10] sm:$0xff]  ;;  %v2621_v56 = vld [vmem:[#allocation5] ss:$0 sm:$0xff] }
 0x10b   :  { %v2750_v50 = vpack.c.bf16 %v342_v49, %v340_v48  ;;  %v428_v51 = vld [vmem:[#allocation10 + $0x8] sm:$0xff]  ;;  %v431_v55 = vld [vmem:[#allocation10 + $0x20] sm:$0xff] }
 0x10c   :  { %2731 = vmatpush1.bf16.msra.mxu1 %v2730_v22  ;;  %v432_v52 = vld [vmem:[#allocation10 + $0x28] sm:$0xff]  ;;  %v2754_v60 = vpack.c.bf16 %v431_v55, %v427_v54  ;;  %v435_v1 = vld [vmem:[#allocation10 + $0x40] sm:$0xff] }
 0x10d   :  { %2733 = vmatprep.subr.bf16.mxu1 %v2732_v23  ;;  %v2752_v53 = vpack.c.bf16 %v432_v52, %v428_v51  ;;  %v436_v57 = vld [vmem:[#allocation10 + $0x48] sm:$0xff]  ;;  %v439_v2 = vld [vmem:[#allocation10 + $0x60] sm:$0xff] }
 0x10e   :  { %v440_v58 = vld [vmem:[#allocation10 + $0x68] sm:$0xff]  ;;  %v2758_v5 = vpack.c.bf16 %v439_v2, %v435_v1  ;;  %v443_v7 = vld [vmem:[#allocation10 + $0x80] sm:$0xff] }
 0x10f   :  { %v2756_v63 = vpack.c.bf16 %v440_v58, %v436_v57  ;;  %v444_v3 = vld [vmem:[#allocation10 + $0x88] sm:$0xff]  ;;  %v447_v8 = vld [vmem:[#allocation10 + $0xa0] sm:$0xff] }
 0x110   :  { %2735 = vmatpush1.bf16.msra.mxu1 %v2734_v28  ;;  %v448_v4 = vld [vmem:[#allocation10 + $0xa8] sm:$0xff]  ;;  %v2762_v11 = vpack.c.bf16 %v447_v8, %v443_v7  ;;  %v451_v13 = vld [vmem:[#allocation10 + $0xc0] sm:$0xff] }
 0x111   :  { %2737 = vmatprep.subr.bf16.mxu1 %v2736_v29  ;;  %v2760_v6 = vpack.c.bf16 %v448_v4, %v444_v3  ;;  %v452_v9 = vld [vmem:[#allocation10 + $0xc8] sm:$0xff]  ;;  %v455_v14 = vld [vmem:[#allocation10 + $0xe0] sm:$0xff] }
 0x112   :  { %v456_v10 = vld [vmem:[#allocation10 + $0xe8] sm:$0xff]  ;;  %v2766_v17 = vpack.c.bf16 %v455_v14, %v451_v13  ;;  %v459_v19 = vld [vmem:[#allocation10 + $0x100] sm:$0xff] }
 0x113   :  { %v2764_v12 = vpack.c.bf16 %v456_v10, %v452_v9  ;;  %v460_v15 = vld [vmem:[#allocation10 + $0x108] sm:$0xff]  ;;  %v463_v20 = vld [vmem:[#allocation10 + $0x120] sm:$0xff] }
 0x114   :  { %2739 = vmatpush1.bf16.msra.mxu1 %v2738_v34  ;;  %v464_v16 = vld [vmem:[#allocation10 + $0x128] sm:$0xff]  ;;  %v2770_v23 = vpack.c.bf16 %v463_v20, %v459_v19  ;;  %v467_v25 = vld [vmem:[#allocation10 + $0x140] sm:$0xff] }
 0x115   :  { %2741 = vmatprep.subr.bf16.mxu1 %v2740_v35  ;;  %v2768_v18 = vpack.c.bf16 %v464_v16, %v460_v15  ;;  %v468_v21 = vld [vmem:[#allocation10 + $0x148] sm:$0xff]  ;;  %v471_v26 = vld [vmem:[#allocation10 + $0x160] sm:$0xff] }
 0x116   :  { %v472_v22 = vld [vmem:[#allocation10 + $0x168] sm:$0xff]  ;;  %v2774_v29 = vpack.c.bf16 %v471_v26, %v467_v25  ;;  %v475_v31 = vld [vmem:[#allocation10 + $0x180] sm:$0xff]  ;;  %v430_v25 = vld [vmem:[#allocation10 + $0x18] sm:$0xff] }
 0x117   :  { %v2772_v24 = vpack.c.bf16 %v472_v22, %v468_v21  ;;  %v476_v27 = vld [vmem:[#allocation10 + $0x188] sm:$0xff]  ;;  %v479_v32 = vld [vmem:[#allocation10 + $0x1a0] sm:$0xff]  ;;  %v434_v26 = vld [vmem:[#allocation10 + $0x38] sm:$0xff] }
 0x118   :  { %2743 = vmatpush1.bf16.msra.mxu1 %v2742_v40  ;;  %v480_v28 = vld [vmem:[#allocation10 + $0x1a8] sm:$0xff]  ;;  %v2778_v35 = vpack.c.bf16 %v479_v32, %v475_v31  ;;  %v483_v37 = vld [vmem:[#allocation10 + $0x1c0] sm:$0xff] }
 0x119   :  { %2745 = vmatprep.subr.bf16.mxu1 %v2744_v41  ;;  %v2776_v30 = vpack.c.bf16 %v480_v28, %v476_v27  ;;  %v484_v33 = vld [vmem:[#allocation10 + $0x1c8] sm:$0xff]  ;;  %v487_v38 = vld [vmem:[#allocation10 + $0x1e0] sm:$0xff]  ;;  %v2816_v27 = vpack.c.bf16 %v434_v26, %v430_v25 }
 0x11a   :  { %v488_v34 = vld [vmem:[#allocation10 + $0x1e8] sm:$0xff]  ;;  %v2782_v41 = vpack.c.bf16 %v487_v38, %v483_v37  ;;  %v491_v43 = vld [vmem:[#allocation10 + $0x200] sm:$0xff] }
 0x11b   :  { %v2780_v36 = vpack.c.bf16 %v488_v34, %v484_v33  ;;  %v492_v39 = vld [vmem:[#allocation10 + $0x208] sm:$0xff]  ;;  %v495_v44 = vld [vmem:[#allocation10 + $0x220] sm:$0xff] }
 0x11c   :  { %2747 = vmatpush1.bf16.msra.mxu1 %v2746_v46  ;;  %v496_v40 = vld [vmem:[#allocation10 + $0x228] sm:$0xff]  ;;  %v499_v49 = vld [vmem:[#allocation10 + $0x240] sm:$0xff] }
 0x11d   :  { %2749 = vmatprep.subr.bf16.mxu1 %v2748_v47  ;;  %v2784_v42 = vpack.c.bf16 %v496_v40, %v492_v39  ;;  %v500_v45 = vld [vmem:[#allocation10 + $0x248] sm:$0xff]  ;;  %v2786_v47 = vpack.c.bf16 %v495_v44, %v491_v43  ;;  %v507_v55 = vld [vmem:[#allocation10 + $0x280] sm:$0xff] }
 0x11e   :  { %v504_v46 = vld [vmem:[#allocation10 + $0x268] sm:$0xff]  ;;  %v523_v4 = vld [vmem:[#allocation10 + $0x300] sm:$0xff] }
 0x11f   :  { %v2788_v48 = vpack.c.bf16 %v504_v46, %v500_v45  ;;  %v508_v51 = vld [vmem:[#allocation10 + $0x288] sm:$0xff]  ;;  %v531_v10 = vld [vmem:[#allocation10 + $0x340] sm:$0xff] }
 0x120   :  { %2751 = vmatpush1.bf16.msra.mxu1 %v2750_v50  ;;  %v503_v50 = vld [vmem:[#allocation10 + $0x260] sm:$0xff]  ;;  %v512_v52 = vld [vmem:[#allocation10 + $0x2a8] sm:$0xff] }
 0x121   :  { %2753 = vmatprep.subr.bf16.mxu1 %v2752_v53  ;;  %v2790_v53 = vpack.c.bf16 %v503_v50, %v499_v49  ;;  %v2792_v54 = vpack.c.bf16 %v512_v52, %v508_v51  ;;  %v516_v57 = vld [vmem:[#allocation10 + $0x2c8] sm:$0xff]  ;;  %v539_v16 = vld [vmem:[#allocation10 + $0x380] sm:$0xff] }
 0x122   :  { %v520_v58 = vld [vmem:[#allocation10 + $0x2e8] sm:$0xff]  ;;  %v547_v22 = vld [vmem:[#allocation10 + $0x3c0] sm:$0xff] }
 0x123   :  { %v528_v1 = vld [vmem:[#allocation10 + $0x328] sm:$0xff] }
 0x124   :  { %v536_v7 = vld [vmem:[#allocation10 + $0x368] sm:$0xff] }
 0x125   :  { %v544_v13 = vld [vmem:[#allocation10 + $0x3a8] sm:$0xff] }
 0x126   :  { %v548_v19 = vld [vmem:[#allocation10 + $0x3c8] sm:$0xff] }
 0x127   :  { %v552_v20 = vld [vmem:[#allocation10 + $0x3e8] sm:$0xff] }
 0x128   :  { %v2812_v21 = vpack.c.bf16 %v552_v20, %v548_v19  ;;  %v720_v28 = vld [vmem:[#allocation13 + $0x8] sm:$0xff]  ;;  %v719_v31 = vld [vmem:[#allocation13] sm:$0xff] }
 0x129   :  { %v727_v32 = vld [vmem:[#allocation13 + $0x40] sm:$0xff]  ;;  %v736_v34 = vld [vmem:[#allocation13 + $0x88] sm:$0xff] }
 0x12a   :  { %v2882_v33 = vpack.c.bf16 %v727_v32, %v719_v31  ;;  %v735_v37 = vld [vmem:[#allocation13 + $0x80] sm:$0xff]  ;;  %v752_v40 = vld [vmem:[#allocation13 + $0x108] sm:$0xff] }
 0x12b   :  { %v743_v38 = vld [vmem:[#allocation13 + $0xc0] sm:$0xff]  ;;  %v768_v46 = vld [vmem:[#allocation13 + $0x188] sm:$0xff] }
 0x12c   :  { %v2886_v39 = vpack.c.bf16 %v743_v38, %v735_v37  ;;  %v751_v43 = vld [vmem:[#allocation13 + $0x100] sm:$0xff]  ;;  %v784_v52 = vld [vmem:[#allocation13 + $0x208] sm:$0xff]  ;;  %v346_v37 = vlaneseq }
 0x12d   :  { %v759_v44 = vld [vmem:[#allocation13 + $0x140] sm:$0xff]  ;;  %v864_v19 = vld [vmem:[#allocation13 + $0x488] sm:$0xff] }
 0x12e   :  { %v2890_v45 = vpack.c.bf16 %v759_v44, %v751_v43  ;;  %v767_v49 = vld [vmem:[#allocation13 + $0x180] sm:$0xff]  ;;  %v872_v20 = vld [vmem:[#allocation13 + $0x4c8] sm:$0xff]  ;;  %v4403_v44 = vshrl.u32 %v346_v37, 7 }
 0x12f   :  { %v775_v50 = vld [vmem:[#allocation13 + $0x1c0] sm:$0xff]  ;;  %v880_v25 = vld [vmem:[#allocation13 + $0x508] sm:$0xff] }
 0x130   :  { %v2894_v51 = vpack.c.bf16 %v775_v50, %v767_v49  ;;  %v888_v26 = vld [vmem:[#allocation13 + $0x548] sm:$0xff]  ;;  %v935_v49 = vld [vmem:[#allocation13 + $0x6c0] sm:$0xff] }
 0x131   :  { %v896_v31 = vld [vmem:[#allocation13 + $0x588] sm:$0xff] }
 0x132   :  { %v904_v32 = vld [vmem:[#allocation13 + $0x5c8] sm:$0xff] }
 0x133   :  { %v912_v38 = vld [vmem:[#allocation13 + $0x608] sm:$0xff] }
 0x1d4   :  { %v308_v59 = vpop.f32.mrb[0].mxu1 }
 0x1d5   :  { %v309_v61 = vadd.f32 %v2621_v56, %v308_v59  ;;  %v2684_v62 = vpop.f32.mrb[1].mxu1  ;;  %v511_v56 = vld [vmem:[#allocation10 + $0x2a0] sm:$0xff] }
 0x1d6   :  { %v2794_v59 = vpack.c.bf16 %v511_v56, %v507_v55  ;;  %v519_v62 = vld [vmem:[#allocation10 + $0x2e0] sm:$0xff] }
 0x1d7   :  { %421 = vmatmul.mubr.f32.vlgmr.msra.gmra.mrb[2].mxu1 %v309_v61  ;;  %v515_v61 = vld [vmem:[#allocation10 + $0x2c0] sm:$0xff] }
 0x1d8   :  { %2755 = vmatpush1.bf16.msra.mxu1 %v2754_v60  ;;  %v2796_v60 = vpack.c.bf16 %v520_v58, %v516_v57  ;;  %v2798_v2 = vpack.c.bf16 %v519_v62, %v515_v61  ;;  %v783_v55 = vld [vmem:[#allocation13 + $0x200] sm:$0xff]  ;;  %v800_v58 = vld [vmem:[#allocation13 + $0x288] sm:$0xff] }
 0x1d9   :  { %2757 = vmatprep.subr.bf16.mxu1 %v2756_v63  ;;  %v524_v63 = vld [vmem:[#allocation10 + $0x308] sm:$0xff] }
 0x1da   :  { %v2800_v3 = vpack.c.bf16 %v528_v1, %v524_v63  ;;  %v791_v56 = vld [vmem:[#allocation13 + $0x240] sm:$0xff]  ;;  %v816_v1 = vld [vmem:[#allocation13 + $0x308] sm:$0xff] }
 0x1db   :  { %v2898_v57 = vpack.c.bf16 %v791_v56, %v783_v55  ;;  %v799_v61 = vld [vmem:[#allocation13 + $0x280] sm:$0xff]  ;;  %v4409_v55 = vsub.s32 0, %v4403_v44 }
 0x1dc   :  { %2759 = vmatpush1.bf16.msra.mxu1 %v2758_v5  ;;  %v527_v5 = vld [vmem:[#allocation10 + $0x320] sm:$0xff] }
 0x1dd   :  { %2761 = vmatprep.subr.bf16.mxu1 %v2760_v6  ;;  %v532_v6 = vld [vmem:[#allocation10 + $0x348] sm:$0xff]  ;;  %v2802_v8 = vpack.c.bf16 %v527_v5, %v523_v4 }
 0x1de   :  { %v2804_v9 = vpack.c.bf16 %v536_v7, %v532_v6  ;;  %v807_v62 = vld [vmem:[#allocation13 + $0x2c0] sm:$0xff]  ;;  %v832_v7 = vld [vmem:[#allocation13 + $0x388] sm:$0xff] }
 0x1df   :  { %v2902_v63 = vpack.c.bf16 %v807_v62, %v799_v61  ;;  %v815_v4 = vld [vmem:[#allocation13 + $0x300] sm:$0xff]  ;;  %v429_v62 = vld [vmem:[#allocation10 + $0x10] sm:$0xff] }
 0x1e0   :  { %2763 = vmatpush1.bf16.msra.mxu1 %v2762_v11  ;;  %v535_v11 = vld [vmem:[#allocation10 + $0x360] sm:$0xff] }
 0x1e1   :  { %2765 = vmatprep.subr.bf16.mxu1 %v2764_v12  ;;  %v540_v12 = vld [vmem:[#allocation10 + $0x388] sm:$0xff]  ;;  %v2806_v14 = vpack.c.bf16 %v535_v11, %v531_v10 }
 0x1e2   :  { %v2808_v15 = vpack.c.bf16 %v544_v13, %v540_v12  ;;  %v823_v5 = vld [vmem:[#allocation13 + $0x340] sm:$0xff]  ;;  %v848_v13 = vld [vmem:[#allocation13 + $0x408] sm:$0xff] }
 0x1e3   :  { %v2906_v6 = vpack.c.bf16 %v823_v5, %v815_v4  ;;  %v831_v10 = vld [vmem:[#allocation13 + $0x380] sm:$0xff] }
 0x1e4   :  { %2767 = vmatpush1.bf16.msra.mxu1 %v2766_v17  ;;  %v543_v17 = vld [vmem:[#allocation10 + $0x3a0] sm:$0xff] }
 0x1e5   :  { %2769 = vmatprep.subr.bf16.mxu1 %v2768_v18  ;;  %v2810_v18 = vpack.c.bf16 %v543_v17, %v539_v16  ;;  %v839_v11 = vld [vmem:[#allocation13 + $0x3c0] sm:$0xff] }
 0x1e6   :  { %v2910_v12 = vpack.c.bf16 %v839_v11, %v831_v10  ;;  %v847_v16 = vld [vmem:[#allocation13 + $0x400] sm:$0xff]  ;;  %v441_v10 = vld [vmem:[#allocation10 + $0x70] sm:$0xff]  ;;  %v446_v11 = vld [vmem:[#allocation10 + $0x98] sm:$0xff] }
 0x1e7   :  { %v855_v17 = vld [vmem:[#allocation13 + $0x440] sm:$0xff] }
 0x1e8   :  { %2771 = vmatpush1.bf16.msra.mxu1 %v2770_v23  ;;  %v551_v23 = vld [vmem:[#allocation10 + $0x3e0] sm:$0xff] }
 0x1e9   :  { %2773 = vmatprep.subr.bf16.mxu1 %v2772_v24  ;;  %v2814_v24 = vpack.c.bf16 %v551_v23, %v547_v22  ;;  %v863_v22 = vld [vmem:[#allocation13 + $0x480] sm:$0xff] }
 0x1ea   :  { %v871_v23 = vld [vmem:[#allocation13 + $0x4c0] sm:$0xff] }
 0x1ec   :  { %2775 = vmatpush1.bf16.msra.mxu1 %v2774_v29  ;;  %v728_v29 = vld [vmem:[#allocation13 + $0x48] sm:$0xff] }
 0x1ed   :  { %2777 = vmatprep.subr.bf16.mxu1 %v2776_v30  ;;  %v2880_v30 = vpack.c.bf16 %v728_v29, %v720_v28  ;;  %v879_v28 = vld [vmem:[#allocation13 + $0x500] sm:$0xff] }
 0x1ee   :  { %v887_v29 = vld [vmem:[#allocation13 + $0x540] sm:$0xff] }
 0x1ef   :  { %2881 = vmatprep.subr.bf16.mxu0 %v2880_v30  ;;  %v2922_v30 = vpack.c.bf16 %v887_v29, %v879_v28  ;;  %v465_v28 = vld [vmem:[#allocation10 + $0x130] sm:$0xff]  ;;  %v470_v29 = vld [vmem:[#allocation10 + $0x158] sm:$0xff] }
 0x1f0   :  { %2779 = vmatpush1.bf16.msra.mxu1 %v2778_v35  ;;  %v744_v35 = vld [vmem:[#allocation13 + $0xc8] sm:$0xff]  ;;  %2883 = vmatpush1.bf16.msra.mxu0 %v2882_v33  ;;  %v2924_v33 = vpack.c.bf16 %v904_v32, %v896_v31 }
 0x1f1   :  { %2781 = vmatprep.subr.bf16.mxu1 %v2780_v36  ;;  %v2884_v36 = vpack.c.bf16 %v744_v35, %v736_v34  ;;  %v895_v34 = vld [vmem:[#allocation13 + $0x580] sm:$0xff] }
 0x1f2   :  { %v903_v35 = vld [vmem:[#allocation13 + $0x5c0] sm:$0xff] }
 0x1f3   :  { %2885 = vmatprep.subr.bf16.mxu0 %v2884_v36  ;;  %v2926_v36 = vpack.c.bf16 %v903_v35, %v895_v34  ;;  %v473_v34 = vld [vmem:[#allocation10 + $0x170] sm:$0xff]  ;;  %v478_v35 = vld [vmem:[#allocation10 + $0x198] sm:$0xff] }
 0x1f4   :  { %2783 = vmatpush1.bf16.msra.mxu1 %v2782_v41  ;;  %v760_v41 = vld [vmem:[#allocation13 + $0x148] sm:$0xff]  ;;  %2887 = vmatpush1.bf16.msra.mxu0 %v2886_v39 }
 0x1f5   :  { %2785 = vmatprep.subr.bf16.mxu1 %v2784_v42  ;;  %v2888_v42 = vpack.c.bf16 %v760_v41, %v752_v40  ;;  %v920_v39 = vld [vmem:[#allocation13 + $0x648] sm:$0xff]  ;;  %v911_v41 = vld [vmem:[#allocation13 + $0x600] sm:$0xff] }
 0x1f6   :  { %v2928_v40 = vpack.c.bf16 %v920_v39, %v912_v38  ;;  %v477_v39 = vld [vmem:[#allocation10 + $0x190] sm:$0xff] }
 0x1f7   :  { %2889 = vmatprep.subr.bf16.mxu0 %v2888_v42  ;;  %v919_v42 = vld [vmem:[#allocation13 + $0x640] sm:$0xff] }
 0x1f8   :  { %2787 = vmatpush1.bf16.msra.mxu1 %v2786_v47  ;;  %v776_v47 = vld [vmem:[#allocation13 + $0x1c8] sm:$0xff]  ;;  %2891 = vmatpush1.bf16.msra.mxu0 %v2890_v45  ;;  %v2930_v43 = vpack.c.bf16 %v919_v42, %v911_v41  ;;  %v486_v41 = vld [vmem:[#allocation10 + $0x1d8] sm:$0xff] }
 0x1f9   :  { %2789 = vmatprep.subr.bf16.mxu1 %v2788_v48  ;;  %v2892_v48 = vpack.c.bf16 %v776_v47, %v768_v46  ;;  %v928_v45 = vld [vmem:[#allocation13 + $0x688] sm:$0xff]  ;;  %v490_v42 = vld [vmem:[#allocation10 + $0x1f8] sm:$0xff] }
 0x1fa   :  { %v936_v46 = vld [vmem:[#allocation13 + $0x6c8] sm:$0xff] }
 0x1fb   :  { %2893 = vmatprep.subr.bf16.mxu0 %v2892_v48  ;;  %v2932_v47 = vpack.c.bf16 %v936_v46, %v928_v45  ;;  %v927_v48 = vld [vmem:[#allocation13 + $0x680] sm:$0xff]  ;;  %v2844_v45 = vpack.c.bf16 %v490_v42, %v486_v41  ;;  %v485_v46 = vld [vmem:[#allocation10 + $0x1d0] sm:$0xff]  ;;  %v738_v42 = vld [vmem:[#allocation13 + $0x98] sm:$0xff] }
 0x1fc   :  { %2791 = vmatpush1.bf16.msra.mxu1 %v2790_v53  ;;  %v792_v53 = vld [vmem:[#allocation13 + $0x248] sm:$0xff]  ;;  %2895 = vmatpush1.bf16.msra.mxu0 %v2894_v51  ;;  %v2934_v50 = vpack.c.bf16 %v935_v49, %v927_v48  ;;  %v4406_v51 = vsub.s32 1, %v4403_v44  ;;  %v494_v48 = vld [vmem:[#allocation10 + $0x218] sm:$0xff] }
 0x1fd   :  { %2793 = vmatprep.subr.bf16.mxu1 %v2792_v54  ;;  %v2896_v54 = vpack.c.bf16 %v792_v53, %v784_v52  ;;  %v944_v52 = vld [vmem:[#allocation13 + $0x708] sm:$0xff]  ;;  %v498_v49 = vld [vmem:[#allocation10 + $0x238] sm:$0xff] }
 0x1fe   :  { %v952_v53 = vld [vmem:[#allocation13 + $0x748] sm:$0xff]  ;;  %v729_v41 = vld [vmem:[#allocation13 + $0x50] sm:$0xff] }
 0x1ff   :  { %2897 = vmatprep.subr.bf16.mxu0 %v2896_v54  ;;  %v344_v54 = vld [vmem:[#allocation8] sm:$0x3]  ;;  %v2936_v56 = vpack.c.bf16 %v952_v53, %v944_v52  ;;  %v2848_v52 = vpack.c.bf16 %v498_v49, %v494_v48  ;;  %v493_v53 = vld [vmem:[#allocation10 + $0x210] sm:$0xff] }
 0x200   :  { %2795 = vmatpush1.bf16.msra.mxu1 %v2794_v59  ;;  %v808_v59 = vld [vmem:[#allocation13 + $0x2c8] sm:$0xff]  ;;  %2899 = vmatpush1.bf16.msra.mxu0 %v2898_v57  ;;  %v943_v57 = vld [vmem:[#allocation13 + $0x700] sm:$0xff]  ;;  %v349_v61 = vrot.slane %v344_v54, %v4409_v55  ;;  %v745_v48 = vld [vmem:[#allocation13 + $0xd0] sm:$0xff] }
 0x201   :  { %2797 = vmatprep.subr.bf16.mxu1 %v2796_v60  ;;  %v2900_v60 = vpack.c.bf16 %v808_v59, %v800_v58  ;;  %v951_v58 = vld [vmem:[#allocation13 + $0x740] sm:$0xff]  ;;  %v754_v49 = vld [vmem:[#allocation13 + $0x118] sm:$0xff] }
 0x202   :  { %v2938_v59 = vpack.c.bf16 %v951_v58, %v943_v57  ;;  %v506_v57 = vld [vmem:[#allocation10 + $0x278] sm:$0xff] }
 0x203   :  { %2901 = vmatprep.subr.bf16.mxu0 %v2900_v60  ;;  %v353_v60 = vrot.slane %v344_v54, %v4406_v51  ;;  %v497_v54 = vld [vmem:[#allocation10 + $0x230] sm:$0xff] }
 0x204   :  { %2799 = vmatpush1.bf16.msra.mxu1 %v2798_v2  ;;  %v824_v2 = vld [vmem:[#allocation13 + $0x348] sm:$0xff]  ;;  %2903 = vmatpush1.bf16.msra.mxu0 %v2902_v63  ;;  %v2850_v58 = vpack.c.bf16 %v497_v54, %v493_v53  ;;  %v753_v54 = vld [vmem:[#allocation13 + $0x110] sm:$0xff] }
 0x205   :  { %2801 = vmatprep.subr.bf16.mxu1 %v2800_v3  ;;  %v2904_v3 = vpack.c.bf16 %v824_v2, %v816_v1  ;;  %v433_v63 = vld [vmem:[#allocation10 + $0x30] sm:$0xff]  ;;  %v438_v2 = vld [vmem:[#allocation10 + $0x58] sm:$0xff] }
 0x207   :  { %2905 = vmatprep.subr.bf16.mxu0 %v2904_v3  ;;  %v442_v3 = vld [vmem:[#allocation10 + $0x78] sm:$0xff] }
 0x208   :  { %2803 = vmatpush1.bf16.msra.mxu1 %v2802_v8  ;;  %v840_v8 = vld [vmem:[#allocation13 + $0x3c8] sm:$0xff]  ;;  %2907 = vmatpush1.bf16.msra.mxu0 %v2906_v6  ;;  %v2818_v6 = vpack.c.bf16 %v433_v63, %v429_v62  ;;  %v510_v62 = vld [vmem:[#allocation10 + $0x298] sm:$0xff] }
 0x209   :  { %2805 = vmatprep.subr.bf16.mxu1 %v2804_v9  ;;  %v2908_v9 = vpack.c.bf16 %v840_v8, %v832_v7  ;;  %v2820_v8 = vpack.c.bf16 %v442_v3, %v438_v2  ;;  %v514_v63 = vld [vmem:[#allocation10 + $0x2b8] sm:$0xff]  ;;  %v509_v3 = vld [vmem:[#allocation10 + $0x290] sm:$0xff] }
 0x20a   :  { %v2856_v2 = vpack.c.bf16 %v514_v63, %v510_v62  ;;  %v777_v62 = vld [vmem:[#allocation13 + $0x1d0] sm:$0xff]  ;;  %v786_v63 = vld [vmem:[#allocation13 + $0x218] sm:$0xff] }
 0x20b   :  { %2909 = vmatprep.subr.bf16.mxu0 %v2908_v9  ;;  %v437_v9 = vld [vmem:[#allocation10 + $0x50] sm:$0xff] }
 0x20c   :  { %2807 = vmatpush1.bf16.msra.mxu1 %v2806_v14  ;;  %v856_v14 = vld [vmem:[#allocation13 + $0x448] sm:$0xff]  ;;  %2911 = vmatpush1.bf16.msra.mxu0 %v2910_v12  ;;  %v450_v12 = vld [vmem:[#allocation10 + $0xb8] sm:$0xff] }
 0x20d   :  { %2809 = vmatprep.subr.bf16.mxu1 %v2808_v15  ;;  %v2912_v15 = vpack.c.bf16 %v856_v14, %v848_v13  ;;  %v2822_v13 = vpack.c.bf16 %v441_v10, %v437_v9  ;;  %v2824_v14 = vpack.c.bf16 %v450_v12, %v446_v11  ;;  %v517_v10 = vld [vmem:[#allocation10 + $0x2d0] sm:$0xff]  ;;  %v526_v12 = vld [vmem:[#allocation10 + $0x318] sm:$0xff] }
 0x20e   :  { %v521_v11 = vld [vmem:[#allocation10 + $0x2f0] sm:$0xff] }
 0x20f   :  { %2913 = vmatprep.subr.bf16.mxu0 %v2912_v15  ;;  %v445_v15 = vld [vmem:[#allocation10 + $0x90] sm:$0xff] }
 0x210   :  { %2811 = vmatpush1.bf16.msra.mxu1 %v2810_v18  ;;  %v2914_v18 = vpack.c.bf16 %v855_v17, %v847_v16  ;;  %v449_v16 = vld [vmem:[#allocation10 + $0xb0] sm:$0xff]  ;;  %v454_v17 = vld [vmem:[#allocation10 + $0xd8] sm:$0xff] }
 0x211   :  { %2813 = vmatprep.subr.bf16.mxu1 %v2812_v21  ;;  %v2916_v21 = vpack.c.bf16 %v872_v20, %v864_v19  ;;  %v2826_v19 = vpack.c.bf16 %v449_v16, %v445_v15  ;;  %v525_v16 = vld [vmem:[#allocation10 + $0x310] sm:$0xff] }
 0x212   :  { %2915 = vmatpush1.bf16.msra.mxu0 %v2914_v18  ;;  %v458_v18 = vld [vmem:[#allocation10 + $0xf8] sm:$0xff] }
 0x213   :  { %2917 = vmatprep.subr.bf16.mxu0 %v2916_v21  ;;  %v2828_v20 = vpack.c.bf16 %v458_v18, %v454_v17  ;;  %v453_v21 = vld [vmem:[#allocation10 + $0xd0] sm:$0xff]  ;;  %v534_v18 = vld [vmem:[#allocation10 + $0x358] sm:$0xff] }
 0x214   :  { %2815 = vmatpush1.bf16.msra.mxu1 %v2814_v24  ;;  %v2918_v24 = vpack.c.bf16 %v871_v23, %v863_v22  ;;  %v457_v22 = vld [vmem:[#allocation10 + $0xf0] sm:$0xff]  ;;  %v462_v23 = vld [vmem:[#allocation10 + $0x118] sm:$0xff] }
 0x215   :  { %2817 = vmatprep.subr.bf16.mxu1 %v2816_v27  ;;  %v2920_v27 = vpack.c.bf16 %v888_v26, %v880_v25  ;;  %v2830_v25 = vpack.c.bf16 %v457_v22, %v453_v21  ;;  %v529_v17 = vld [vmem:[#allocation10 + $0x330] sm:$0xff] }
 0x216   :  { %2919 = vmatpush1.bf16.msra.mxu0 %v2918_v24  ;;  %v466_v24 = vld [vmem:[#allocation10 + $0x138] sm:$0xff]  ;;  %v533_v22 = vld [vmem:[#allocation10 + $0x350] sm:$0xff] }
 0x217   :  { %2921 = vmatprep.subr.bf16.mxu0 %v2920_v27  ;;  %v2832_v26 = vpack.c.bf16 %v466_v24, %v462_v23  ;;  %v461_v27 = vld [vmem:[#allocation10 + $0x110] sm:$0xff]  ;;  %v542_v24 = vld [vmem:[#allocation10 + $0x398] sm:$0xff] }
 0x218   :  { %v2834_v31 = vpack.c.bf16 %v465_v28, %v461_v27  ;;  %v537_v23 = vld [vmem:[#allocation10 + $0x370] sm:$0xff] }
 0x219   :  { %v541_v28 = vld [vmem:[#allocation10 + $0x390] sm:$0xff] }
 0x21a   :  { %2923 = vmatpush1.bf16.msra.mxu0 %v2922_v30  ;;  %v474_v30 = vld [vmem:[#allocation10 + $0x178] sm:$0xff] }
 0x21b   :  { %2925 = vmatprep.subr.bf16.mxu0 %v2924_v33  ;;  %v2836_v32 = vpack.c.bf16 %v474_v30, %v470_v29  ;;  %v469_v33 = vld [vmem:[#allocation10 + $0x150] sm:$0xff]  ;;  %v550_v30 = vld [vmem:[#allocation10 + $0x3d8] sm:$0xff] }
 0x21c   :  { %v2838_v37 = vpack.c.bf16 %v473_v34, %v469_v33  ;;  %v545_v29 = vld [vmem:[#allocation10 + $0x3b0] sm:$0xff] }
 0x21d   :  { %v549_v34 = vld [vmem:[#allocation10 + $0x3d0] sm:$0xff] }
 0x21e   :  { %2927 = vmatpush1.bf16.msra.mxu0 %v2926_v36  ;;  %v482_v36 = vld [vmem:[#allocation10 + $0x1b8] sm:$0xff] }
 0x21f   :  { %2929 = vmatprep.subr.bf16.mxu0 %v2928_v40  ;;  %v2840_v38 = vpack.c.bf16 %v482_v36, %v478_v35  ;;  %v481_v40 = vld [vmem:[#allocation10 + $0x1b0] sm:$0xff]  ;;  %v722_v36 = vld [vmem:[#allocation13 + $0x18] sm:$0xff] }
 0x220   :  { %v553_v35 = vld [vmem:[#allocation10 + $0x3f0] sm:$0xff] }
 0x222   :  { %2931 = vmatpush1.bf16.msra.mxu0 %v2930_v43  ;;  %v2842_v43 = vpack.c.bf16 %v481_v40, %v477_v39  ;;  %v721_v40 = vld [vmem:[#allocation13 + $0x10] sm:$0xff] }
 0x223   :  { %2933 = vmatprep.subr.bf16.mxu0 %v2932_v47  ;;  %v489_v47 = vld [vmem:[#allocation10 + $0x1f0] sm:$0xff] }
 0x226   :  { %2935 = vmatpush1.bf16.msra.mxu0 %v2934_v50  ;;  %v2846_v50 = vpack.c.bf16 %v489_v47, %v485_v46  ;;  %v737_v47 = vld [vmem:[#allocation13 + $0x90] sm:$0xff] }
 0x227   :  { %2937 = vmatprep.subr.bf16.mxu0 %v2936_v56  ;;  %v502_v56 = vld [vmem:[#allocation10 + $0x258] sm:$0xff] }
 0x22a   :  { %2939 = vmatpush1.bf16.msra.mxu0 %v2938_v59  ;;  %v2852_v59 = vpack.c.bf16 %v506_v57, %v502_v56  ;;  %v761_v56 = vld [vmem:[#allocation13 + $0x150] sm:$0xff]  ;;  %v770_v57 = vld [vmem:[#allocation13 + $0x198] sm:$0xff] }
 0x2aa   :  { %v422_v1 = vpop.f32.mrb[2].mxu1 }
 0x2ab   :  { %v424_v4 = vpop.f32.mrb[3].mxu1  ;;  %v4413_v7 = vadd.f32 %v422_v1, %v349_v61  ;;  %v505_v61 = vld [vmem:[#allocation10 + $0x270] sm:$0xff] }
 0x2ac   :  { %v425_v5 = vadd.f32 %v424_v4, %v353_v60  ;;  %v501_v60 = vld [vmem:[#allocation10 + $0x250] sm:$0xff] }
 0x2ad   :  { %v2854_v1 = vpack.c.bf16 %v505_v61, %v501_v60  ;;  %v513_v4 = vld [vmem:[#allocation10 + $0x2b0] sm:$0xff] }
 0x2ae   :  { %641 = vmatprep.mubr.f32.mxu1 %v425_v5  ;;  %v769_v61 = vld [vmem:[#allocation13 + $0x190] sm:$0xff] }
 0x2af   :  { %642 = vmatmul.mubr.f32.vlgmr.msra.gmra.mrb[4].mxu1 %v4413_v7 }
 0x2b0   :  { %2819 = vmatpush1.bf16.msra.mxu1 %v2818_v6  ;;  %712 = vmatprep.mubr.f32.mxu1 %v425_v5  ;;  %v518_v5 = vld [vmem:[#allocation10 + $0x2d8] sm:$0xff] }
 0x2b1   :  { %2821 = vmatprep.subr.bf16.mxu1 %v2820_v8  ;;  %v522_v6 = vld [vmem:[#allocation10 + $0x2f8] sm:$0xff]  ;;  %v2858_v8 = vpack.c.bf16 %v513_v4, %v509_v3 }
 0x2b2   :  { %v2860_v9 = vpack.c.bf16 %v522_v6, %v518_v5  ;;  %v785_v3 = vld [vmem:[#allocation13 + $0x210] sm:$0xff]  ;;  %v802_v5 = vld [vmem:[#allocation13 + $0x298] sm:$0xff] }
 0x2b3   :  { %v793_v4 = vld [vmem:[#allocation13 + $0x250] sm:$0xff]  ;;  %v810_v6 = vld [vmem:[#allocation13 + $0x2d8] sm:$0xff] }
 0x2b4   :  { %2823 = vmatpush1.bf16.msra.mxu1 %v2822_v13  ;;  %v530_v13 = vld [vmem:[#allocation10 + $0x338] sm:$0xff] }
 0x2b5   :  { %2825 = vmatprep.subr.bf16.mxu1 %v2824_v14  ;;  %v2862_v14 = vpack.c.bf16 %v521_v11, %v517_v10  ;;  %v2864_v15 = vpack.c.bf16 %v530_v13, %v526_v12  ;;  %v801_v10 = vld [vmem:[#allocation13 + $0x290] sm:$0xff]  ;;  %v818_v12 = vld [vmem:[#allocation13 + $0x318] sm:$0xff] }
 0x2b6   :  { %v809_v11 = vld [vmem:[#allocation13 + $0x2d0] sm:$0xff]  ;;  %v826_v13 = vld [vmem:[#allocation13 + $0x358] sm:$0xff] }
 0x2b8   :  { %2827 = vmatpush1.bf16.msra.mxu1 %v2826_v19  ;;  %v538_v19 = vld [vmem:[#allocation10 + $0x378] sm:$0xff] }
 0x2b9   :  { %2829 = vmatprep.subr.bf16.mxu1 %v2828_v20  ;;  %v2866_v20 = vpack.c.bf16 %v529_v17, %v525_v16  ;;  %v2868_v21 = vpack.c.bf16 %v538_v19, %v534_v18  ;;  %v960_v16 = vld [vmem:[#allocation13 + $0x788] sm:$0xff]  ;;  %v3032_v18 = vpack.c.bf16 %v826_v13, %v818_v12  ;;  %v825_v19 = vld [vmem:[#allocation13 + $0x350] sm:$0xff] }
 0x2ba   :  { %v968_v17 = vld [vmem:[#allocation13 + $0x7c8] sm:$0xff]  ;;  %v945_v13 = vld [vmem:[#allocation13 + $0x710] sm:$0xff] }
 0x2bc   :  { %2831 = vmatpush1.bf16.msra.mxu1 %v2830_v25  ;;  %v546_v25 = vld [vmem:[#allocation10 + $0x3b8] sm:$0xff] }
 0x2bd   :  { %2833 = vmatprep.subr.bf16.mxu1 %v2832_v26  ;;  %v2870_v26 = vpack.c.bf16 %v537_v23, %v533_v22  ;;  %v2872_v27 = vpack.c.bf16 %v546_v25, %v542_v24  ;;  %v967_v22 = vld [vmem:[#allocation13 + $0x7c0] sm:$0xff]  ;;  %v834_v23 = vld [vmem:[#allocation13 + $0x398] sm:$0xff] }
 0x2be   :  { %v842_v24 = vld [vmem:[#allocation13 + $0x3d8] sm:$0xff] }
 0x2c0   :  { %2835 = vmatpush1.bf16.msra.mxu1 %v2834_v31  ;;  %v554_v31 = vld [vmem:[#allocation10 + $0x3f8] sm:$0xff] }
 0x2c1   :  { %2837 = vmatprep.subr.bf16.mxu1 %v2836_v32  ;;  %v2874_v32 = vpack.c.bf16 %v545_v29, %v541_v28  ;;  %v2876_v33 = vpack.c.bf16 %v554_v31, %v550_v30  ;;  %v984_v28 = vld [vmem:[#allocation13 + $0x848] sm:$0xff]  ;;  %v3036_v29 = vpack.c.bf16 %v842_v24, %v834_v23  ;;  %v833_v30 = vld [vmem:[#allocation13 + $0x390] sm:$0xff] }
 0x2c2   :  { %v841_v31 = vld [vmem:[#allocation13 + $0x3d0] sm:$0xff] }
 0x2c4   :  { %2839 = vmatpush1.bf16.msra.mxu1 %v2838_v37  ;;  %v730_v37 = vld [vmem:[#allocation13 + $0x58] sm:$0xff] }
 0x2c5   :  { %2841 = vmatprep.subr.bf16.mxu1 %v2840_v38  ;;  %v2878_v38 = vpack.c.bf16 %v553_v35, %v549_v34  ;;  %v3008_v39 = vpack.c.bf16 %v730_v37, %v722_v36  ;;  %v858_v34 = vld [vmem:[#allocation13 + $0x458] sm:$0xff]  ;;  %v3038_v35 = vpack.c.bf16 %v841_v31, %v833_v30  ;;  %v849_v37 = vld [vmem:[#allocation13 + $0x410] sm:$0xff] }
 0x2c6   :  { %v977_v30 = vld [vmem:[#allocation13 + $0x810] sm:$0xff] }
 0x2c7   :  { %v985_v31 = vld [vmem:[#allocation13 + $0x850] sm:$0xff] }
 0x2c8   :  { %2843 = vmatpush1.bf16.msra.mxu1 %v2842_v43  ;;  %v746_v43 = vld [vmem:[#allocation13 + $0xd8] sm:$0xff] }
 0x2c9   :  { %2845 = vmatprep.subr.bf16.mxu1 %v2844_v45  ;;  %v3010_v45 = vpack.c.bf16 %v729_v41, %v721_v40  ;;  %v3012_v46 = vpack.c.bf16 %v746_v43, %v738_v42  ;;  %v874_v40 = vld [vmem:[#allocation13 + $0x4d8] sm:$0xff]  ;;  %v865_v43 = vld [vmem:[#allocation13 + $0x490] sm:$0xff] }
 0x2cc   :  { %2847 = vmatpush1.bf16.msra.mxu1 %v2846_v50  ;;  %v762_v50 = vld [vmem:[#allocation13 + $0x158] sm:$0xff] }
 0x2cd   :  { %2849 = vmatprep.subr.bf16.mxu1 %v2848_v52  ;;  %v3014_v52 = vpack.c.bf16 %v745_v48, %v737_v47  ;;  %v3016_v53 = vpack.c.bf16 %v762_v50, %v754_v49  ;;  %v890_v47 = vld [vmem:[#allocation13 + $0x558] sm:$0xff]  ;;  %v881_v50 = vld [vmem:[#allocation13 + $0x510] sm:$0xff] }
 0x2d0   :  { %2851 = vmatpush1.bf16.msra.mxu1 %v2850_v58  ;;  %v778_v58 = vld [vmem:[#allocation13 + $0x1d8] sm:$0xff] }
 0x2d1   :  { %2853 = vmatprep.subr.bf16.mxu1 %v2852_v59  ;;  %v3018_v59 = vpack.c.bf16 %v761_v56, %v753_v54  ;;  %v3020_v60 = vpack.c.bf16 %v778_v58, %v770_v57  ;;  %v906_v54 = vld [vmem:[#allocation13 + $0x5d8] sm:$0xff]  ;;  %v897_v58 = vld [vmem:[#allocation13 + $0x590] sm:$0xff] }
 0x2d4   :  { %2855 = vmatpush1.bf16.msra.mxu1 %v2854_v1  ;;  %v794_v1 = vld [vmem:[#allocation13 + $0x258] sm:$0xff] }
 0x2d5   :  { %2857 = vmatprep.subr.bf16.mxu1 %v2856_v2  ;;  %v3022_v2 = vpack.c.bf16 %v777_v62, %v769_v61  ;;  %v922_v61 = vld [vmem:[#allocation13 + $0x658] sm:$0xff] }
 0x2d8   :  { %2859 = vmatpush1.bf16.msra.mxu1 %v2858_v8  ;;  %v3026_v8 = vpack.c.bf16 %v793_v4, %v785_v3  ;;  %v938_v3 = vld [vmem:[#allocation13 + $0x6d8] sm:$0xff] }
 0x2d9   :  { %2861 = vmatprep.subr.bf16.mxu1 %v2860_v9  ;;  %v3028_v9 = vpack.c.bf16 %v810_v6, %v802_v5  ;;  %v929_v6 = vld [vmem:[#allocation13 + $0x690] sm:$0xff] }
 0x2dc   :  { %2863 = vmatpush1.bf16.msra.mxu1 %v2862_v14  ;;  %v3030_v14 = vpack.c.bf16 %v809_v11, %v801_v10  ;;  %v954_v10 = vld [vmem:[#allocation13 + $0x758] sm:$0xff] }
 0x2dd   :  { %2865 = vmatprep.subr.bf16.mxu1 %v2864_v15  ;;  %v817_v15 = vld [vmem:[#allocation13 + $0x310] sm:$0xff] }
 0x2e0   :  { %2867 = vmatpush1.bf16.msra.mxu1 %v2866_v20  ;;  %v2940_v20 = vpack.c.bf16 %v968_v17, %v960_v16  ;;  %v970_v16 = vld [vmem:[#allocation13 + $0x7d8] sm:$0xff] }
 0x2e1   :  { %2869 = vmatprep.subr.bf16.mxu1 %v2868_v21  ;;  %v959_v21 = vld [vmem:[#allocation13 + $0x780] sm:$0xff] }
 0x2e2   :  { %v2942_v25 = vpack.c.bf16 %v967_v22, %v959_v21  ;;  %2941 = vmatprep.subr.bf16.mxu0 %v2940_v20  ;;  %v969_v20 = vld [vmem:[#allocation13 + $0x7d0] sm:$0xff]  ;;  %v978_v21 = vld [vmem:[#allocation13 + $0x818] sm:$0xff] }
 0x2e3   :  { %v986_v22 = vld [vmem:[#allocation13 + $0x858] sm:$0xff] }
 0x2e4   :  { %2871 = vmatpush1.bf16.msra.mxu1 %v2870_v26  ;;  %v3034_v26 = vpack.c.bf16 %v825_v19, %v817_v15  ;;  %2943 = vmatpush1.bf16.msra.mxu0 %v2942_v25  ;;  %v962_v15 = vld [vmem:[#allocation13 + $0x798] sm:$0xff]  ;;  %v961_v19 = vld [vmem:[#allocation13 + $0x790] sm:$0xff]  ;;  %v3072_v24 = vpack.c.bf16 %v986_v22, %v978_v21 }
 0x2e5   :  { %2873 = vmatprep.subr.bf16.mxu1 %v2872_v27  ;;  %v976_v27 = vld [vmem:[#allocation13 + $0x808] sm:$0xff]  ;;  %v3070_v23 = vpack.c.bf16 %v969_v20, %v961_v19  ;;  %v4417_v25 = vld [vmem:[#allocation11] sm:$0xf]  ;;  %v1047_v19 = vld [vmem:[#allocation13 + $0xa40] sm:$0xff] }
 0x2e6   :  { %v1041_v22 = vld [vmem:[#allocation13 + $0xa10] sm:$0xff] }
 0x2e8   :  { %2875 = vmatpush1.bf16.msra.mxu1 %v2874_v32  ;;  %v2944_v32 = vpack.c.bf16 %v984_v28, %v976_v27  ;;  %v975_v27 = vld [vmem:[#allocation13 + $0x800] sm:$0xff] }
 0x2e9   :  { %2877 = vmatprep.subr.bf16.mxu1 %v2876_v33  ;;  %v850_v33 = vld [vmem:[#allocation13 + $0x418] sm:$0xff]  ;;  %v983_v28 = vld [vmem:[#allocation13 + $0x840] sm:$0xff] }
 0x2ea   :  { %2945 = vmatprep.subr.bf16.mxu0 %v2944_v32  ;;  %v3040_v36 = vpack.c.bf16 %v858_v34, %v850_v33  ;;  %v992_v32 = vld [vmem:[#allocation13 + $0x888] sm:$0xff] }
 0x2eb   :  { %v1000_v34 = vld [vmem:[#allocation13 + $0x8c8] sm:$0xff] }
 0x2ec   :  { %2879 = vmatpush1.bf16.msra.mxu1 %v2878_v38  ;;  %v857_v38 = vld [vmem:[#allocation13 + $0x450] sm:$0xff] }
 0x2ed   :  { %3009 = vmatprep.subr.bf16.mxu1 %v3008_v39  ;;  %v866_v39 = vld [vmem:[#allocation13 + $0x498] sm:$0xff]  ;;  %v3042_v41 = vpack.c.bf16 %v857_v38, %v849_v37 }
 0x2ee   :  { %v3044_v42 = vpack.c.bf16 %v874_v40, %v866_v39  ;;  %v2946_v39 = vpack.c.bf16 %v983_v28, %v975_v27  ;;  %v3074_v40 = vpack.c.bf16 %v985_v31, %v977_v30  ;;  %v1058_v27 = vld [vmem:[#allocation13 + $0xa98] sm:$0xff]  ;;  %v1055_v31 = vld [vmem:[#allocation13 + $0xa80] sm:$0xff] }
 0x2ef   :  { %713 = vmatmul.mubr.f32.vlgmr.msra.gmra.mrb[6].mxu1 %v4413_v7  ;;  %v3024_v7 = vpack.c.bf16 %v794_v1, %v786_v63  ;;  %v913_v1 = vld [vmem:[#allocation13 + $0x610] sm:$0xff]  ;;  %v1066_v28 = vld [vmem:[#allocation13 + $0xad8] sm:$0xff] }
 0x2f0   :  { %3011 = vmatpush1.bf16.msra.mxu1 %v3010_v45  ;;  %v873_v45 = vld [vmem:[#allocation13 + $0x4d0] sm:$0xff] }
 0x2f1   :  { %3013 = vmatprep.subr.bf16.mxu1 %v3012_v46  ;;  %v882_v46 = vld [vmem:[#allocation13 + $0x518] sm:$0xff]  ;;  %v3046_v48 = vpack.c.bf16 %v873_v45, %v865_v43  ;;  %v2948_v45 = vpack.c.bf16 %v1000_v34, %v992_v32  ;;  %v1063_v32 = vld [vmem:[#allocation13 + $0xac0] sm:$0xff]  ;;  %v3092_v34 = vpack.c.bf16 %v1066_v28, %v1058_v27  ;;  %v1129_v27 = vld [vmem:[#allocation13 + $0xcd0] sm:$0xff] }
 0x2f2   :  { %v3048_v49 = vpack.c.bf16 %v890_v47, %v882_v46  ;;  %v993_v47 = vld [vmem:[#allocation13 + $0x890] sm:$0xff]  ;;  %v1136_v28 = vld [vmem:[#allocation13 + $0xd08] sm:$0xff] }
 0x2f4   :  { %3015 = vmatpush1.bf16.msra.mxu1 %v3014_v52  ;;  %v889_v52 = vld [vmem:[#allocation13 + $0x550] sm:$0xff] }
 0x2f5   :  { %3017 = vmatprep.subr.bf16.mxu1 %v3016_v53  ;;  %v898_v53 = vld [vmem:[#allocation13 + $0x598] sm:$0xff]  ;;  %v3050_v56 = vpack.c.bf16 %v889_v52, %v881_v50  ;;  %v1016_v50 = vld [vmem:[#allocation13 + $0x948] sm:$0xff] }
 0x2f6   :  { %v3052_v57 = vpack.c.bf16 %v906_v54, %v898_v53  ;;  %v1010_v52 = vld [vmem:[#allocation13 + $0x918] sm:$0xff] }
 0x2f7   :  { %v1018_v53 = vld [vmem:[#allocation13 + $0x958] sm:$0xff] }
 0x2f8   :  { %3019 = vmatpush1.bf16.msra.mxu1 %v3018_v59  ;;  %v905_v59 = vld [vmem:[#allocation13 + $0x5d0] sm:$0xff] }
 0x2f9   :  { %3021 = vmatprep.subr.bf16.mxu1 %v3020_v60  ;;  %v914_v60 = vld [vmem:[#allocation13 + $0x618] sm:$0xff]  ;;  %v3054_v62 = vpack.c.bf16 %v905_v59, %v897_v58  ;;  %v1015_v58 = vld [vmem:[#allocation13 + $0x940] sm:$0xff] }
 0x2fa   :  { %v3056_v63 = vpack.c.bf16 %v922_v61, %v914_v60  ;;  %v3080_v60 = vpack.c.bf16 %v1018_v53, %v1010_v52  ;;  %v1009_v61 = vld [vmem:[#allocation13 + $0x910] sm:$0xff]  ;;  %v1088_v53 = vld [vmem:[#allocation13 + $0xb88] sm:$0xff] }
 0x2fb   :  { %v1081_v52 = vld [vmem:[#allocation13 + $0xb50] sm:$0xff] }
 0x2fc   :  { %3023 = vmatpush1.bf16.msra.mxu1 %v3022_v2  ;;  %v921_v2 = vld [vmem:[#allocation13 + $0x650] sm:$0xff] }
 0x2fd   :  { %3025 = vmatprep.subr.bf16.mxu1 %v3024_v7  ;;  %v930_v7 = vld [vmem:[#allocation13 + $0x698] sm:$0xff]  ;;  %v3058_v4 = vpack.c.bf16 %v921_v2, %v913_v1  ;;  %v1032_v1 = vld [vmem:[#allocation13 + $0x9c8] sm:$0xff] }
 0x2fe   :  { %v3060_v5 = vpack.c.bf16 %v938_v3, %v930_v7  ;;  %v1026_v2 = vld [vmem:[#allocation13 + $0x998] sm:$0xff] }
 0x2ff   :  { %v1034_v7 = vld [vmem:[#allocation13 + $0x9d8] sm:$0xff] }
 0x300   :  { %3027 = vmatpush1.bf16.msra.mxu1 %v3026_v8  ;;  %v937_v8 = vld [vmem:[#allocation13 + $0x6d0] sm:$0xff] }
 0x301   :  { %3029 = vmatprep.subr.bf16.mxu1 %v3028_v9  ;;  %v946_v9 = vld [vmem:[#allocation13 + $0x718] sm:$0xff]  ;;  %v3062_v11 = vpack.c.bf16 %v937_v8, %v929_v6  ;;  %v1031_v6 = vld [vmem:[#allocation13 + $0x9c0] sm:$0xff] }
 0x302   :  { %v3064_v12 = vpack.c.bf16 %v954_v10, %v946_v9  ;;  %v3084_v9 = vpack.c.bf16 %v1034_v7, %v1026_v2  ;;  %v1025_v10 = vld [vmem:[#allocation13 + $0x990] sm:$0xff]  ;;  %v1104_v7 = vld [vmem:[#allocation13 + $0xc08] sm:$0xff] }
 0x303   :  { %v1097_v2 = vld [vmem:[#allocation13 + $0xbd0] sm:$0xff] }
 0x304   :  { %3031 = vmatpush1.bf16.msra.mxu1 %v3030_v14  ;;  %v953_v14 = vld [vmem:[#allocation13 + $0x750] sm:$0xff] }
 0x305   :  { %3033 = vmatprep.subr.bf16.mxu1 %v3032_v18  ;;  %v3066_v17 = vpack.c.bf16 %v953_v14, %v945_v13  ;;  %v3068_v18 = vpack.c.bf16 %v970_v16, %v962_v15  ;;  %v1048_v13 = vld [vmem:[#allocation13 + $0xa48] sm:$0xff]  ;;  %v1042_v14 = vld [vmem:[#allocation13 + $0xa18] sm:$0xff] }
 0x306   :  { %v1050_v15 = vld [vmem:[#allocation13 + $0xa58] sm:$0xff] }
 0x307   :  { %v3088_v21 = vpack.c.bf16 %v1050_v15, %v1042_v14  ;;  %v1113_v14 = vld [vmem:[#allocation13 + $0xc50] sm:$0xff]  ;;  %v1120_v15 = vld [vmem:[#allocation13 + $0xc88] sm:$0xff] }
 0x308   :  { %3035 = vmatpush1.bf16.msra.mxu1 %v3034_v26  ;;  %v564_v26 = vrot.slane %v4417_v25, %v4406_v51 }
 0x309   :  { %3037 = vmatprep.subr.bf16.mxu1 %v3036_v29  ;;  %v560_v29 = vrot.slane %v4417_v25, %v4409_v55 }
 0x30c   :  { %3039 = vmatpush1.bf16.msra.mxu1 %v3038_v35  ;;  %v994_v35 = vld [vmem:[#allocation13 + $0x898] sm:$0xff] }
 0x30d   :  { %3041 = vmatprep.subr.bf16.mxu1 %v3040_v36  ;;  %v1002_v36 = vld [vmem:[#allocation13 + $0x8d8] sm:$0xff] }
 0x30e   :  { %v3076_v46 = vpack.c.bf16 %v1002_v36, %v994_v35  ;;  %v1057_v35 = vld [vmem:[#allocation13 + $0xa90] sm:$0xff] }
 0x30f   :  { %v1065_v36 = vld [vmem:[#allocation13 + $0xad0] sm:$0xff] }
 0x310   :  { %3043 = vmatpush1.bf16.msra.mxu1 %v3042_v41  ;;  %v991_v41 = vld [vmem:[#allocation13 + $0x880] sm:$0xff] }
 0x311   :  { %3045 = vmatprep.subr.bf16.mxu1 %v3044_v42  ;;  %v999_v42 = vld [vmem:[#allocation13 + $0x8c0] sm:$0xff] }
 0x312   :  { %v2950_v54 = vpack.c.bf16 %v999_v42, %v991_v41  ;;  %v1082_v41 = vld [vmem:[#allocation13 + $0xb58] sm:$0xff]  ;;  %v2966_v42 = vpack.c.bf16 %v1063_v32, %v1055_v31 }
 0x313   :  { %v1146_v31 = vld [vmem:[#allocation13 + $0xd58] sm:$0xff] }
 0x314   :  { %3047 = vmatpush1.bf16.msra.mxu1 %v3046_v48  ;;  %v1001_v48 = vld [vmem:[#allocation13 + $0x8d0] sm:$0xff] }
 0x315   :  { %3049 = vmatprep.subr.bf16.mxu1 %v3048_v49  ;;  %v1008_v49 = vld [vmem:[#allocation13 + $0x908] sm:$0xff] }
 0x316   :  { %v2952_v59 = vpack.c.bf16 %v1016_v50, %v1008_v49  ;;  %v1073_v50 = vld [vmem:[#allocation13 + $0xb10] sm:$0xff] }
 0x318   :  { %3051 = vmatpush1.bf16.msra.mxu1 %v3050_v56  ;;  %v3078_v56 = vpack.c.bf16 %v1001_v48, %v993_v47  ;;  %v1079_v47 = vld [vmem:[#allocation13 + $0xb40] sm:$0xff] }
 0x319   :  { %3053 = vmatprep.subr.bf16.mxu1 %v3052_v57  ;;  %v1007_v57 = vld [vmem:[#allocation13 + $0x900] sm:$0xff] }
 0x31a   :  { %v2954_v3 = vpack.c.bf16 %v1015_v58, %v1007_v57  ;;  %v1098_v57 = vld [vmem:[#allocation13 + $0xbd8] sm:$0xff] }
 0x31c   :  { %3055 = vmatpush1.bf16.msra.mxu1 %v3054_v62  ;;  %v1017_v62 = vld [vmem:[#allocation13 + $0x950] sm:$0xff] }
 0x31d   :  { %3057 = vmatprep.subr.bf16.mxu1 %v3056_v63  ;;  %v1024_v63 = vld [vmem:[#allocation13 + $0x988] sm:$0xff] }
 0x31e   :  { %v2956_v8 = vpack.c.bf16 %v1032_v1, %v1024_v63  ;;  %v1089_v1 = vld [vmem:[#allocation13 + $0xb90] sm:$0xff] }
 0x320   :  { %3059 = vmatpush1.bf16.msra.mxu1 %v3058_v4  ;;  %v3082_v4 = vpack.c.bf16 %v1017_v62, %v1009_v61  ;;  %v1095_v61 = vld [vmem:[#allocation13 + $0xbc0] sm:$0xff] }
 0x321   :  { %3061 = vmatprep.subr.bf16.mxu1 %v3060_v5  ;;  %v1023_v5 = vld [vmem:[#allocation13 + $0x980] sm:$0xff] }
 0x322   :  { %v2958_v16 = vpack.c.bf16 %v1031_v6, %v1023_v5  ;;  %v1114_v5 = vld [vmem:[#allocation13 + $0xc58] sm:$0xff] }
 0x324   :  { %3063 = vmatpush1.bf16.msra.mxu1 %v3062_v11  ;;  %v1033_v11 = vld [vmem:[#allocation13 + $0x9d0] sm:$0xff] }
 0x325   :  { %3065 = vmatprep.subr.bf16.mxu1 %v3064_v12  ;;  %v1040_v12 = vld [vmem:[#allocation13 + $0xa08] sm:$0xff] }
 0x326   :  { %v2960_v20 = vpack.c.bf16 %v1048_v13, %v1040_v12  ;;  %v1105_v13 = vld [vmem:[#allocation13 + $0xc10] sm:$0xff] }
 0x328   :  { %3067 = vmatpush1.bf16.msra.mxu1 %v3066_v17  ;;  %v3086_v17 = vpack.c.bf16 %v1033_v11, %v1025_v10  ;;  %v1111_v10 = vld [vmem:[#allocation13 + $0xc40] sm:$0xff] }
 0x329   :  { %3069 = vmatprep.subr.bf16.mxu1 %v3068_v18  ;;  %v1039_v18 = vld [vmem:[#allocation13 + $0xa00] sm:$0xff] }
 0x32c   :  { %3071 = vmatpush1.bf16.msra.mxu1 %v3070_v23  ;;  %v1049_v23 = vld [vmem:[#allocation13 + $0xa50] sm:$0xff] }
 0x32d   :  { %3073 = vmatprep.subr.bf16.mxu1 %v3072_v24  ;;  %v1056_v24 = vld [vmem:[#allocation13 + $0xa88] sm:$0xff]  ;;  %v3090_v30 = vpack.c.bf16 %v1049_v23, %v1041_v22  ;;  %v1127_v22 = vld [vmem:[#allocation13 + $0xcc0] sm:$0xff] }
 0x382   :  { %v643_v33 = vpop.f32.mrb[4].mxu1 }
 0x383   :  { %v645_v37 = vpop.f32.mrb[5].mxu1  ;;  %v4425_v43 = vadd.f32 %v643_v33, %v560_v29  ;;  %v2962_v29 = vpack.c.bf16 %v1047_v19, %v1039_v18  ;;  %v1130_v18 = vld [vmem:[#allocation13 + $0xcd8] sm:$0xff] }
 0x384   :  { %v4423_v38 = vadd.f32 %v645_v37, %v564_v26  ;;  %v1064_v26 = vld [vmem:[#allocation13 + $0xac8] sm:$0xff] }
 0x385   :  { %v2964_v33 = vpack.c.bf16 %v1064_v26, %v1056_v24  ;;  %v1072_v37 = vld [vmem:[#allocation13 + $0xb08] sm:$0xff]  ;;  %v1121_v26 = vld [vmem:[#allocation13 + $0xc90] sm:$0xff] }
 0x386   :  { %1337 = vmatprep.mubr.f32.mxu0 %v4423_v38  ;;  %1479 = vmatprep.mubr.f32.mxu1 %v4423_v38 }
 0x387   :  { %1338 = vmatmul.mubr.f32.vlgmr.msra.gmra.mrb[0].mxu0 %v4425_v43  ;;  %1480 = vmatmul.mubr.f32.vlgmr.msra.gmra.mrb[8].mxu1 %v4425_v43 }
 0x388   :  { %2947 = vmatpush1.bf16.msra.mxu0 %v2946_v39  ;;  %3075 = vmatpush1.bf16.msra.mxu1 %v3074_v40  ;;  %v1080_v39 = vld [vmem:[#allocation13 + $0xb48] sm:$0xff]  ;;  %v1074_v40 = vld [vmem:[#allocation13 + $0xb18] sm:$0xff] }
 0x389   :  { %2949 = vmatprep.subr.bf16.mxu0 %v2948_v45  ;;  %3077 = vmatprep.subr.bf16.mxu1 %v3076_v46  ;;  %v3094_v45 = vpack.c.bf16 %v1065_v36, %v1057_v35  ;;  %v1071_v46 = vld [vmem:[#allocation13 + $0xb00] sm:$0xff]  ;;  %v2968_v48 = vpack.c.bf16 %v1080_v39, %v1072_v37  ;;  %v3096_v49 = vpack.c.bf16 %v1082_v41, %v1074_v40  ;;  %v1137_v39 = vld [vmem:[#allocation13 + $0xd10] sm:$0xff]  ;;  %v1152_v41 = vld [vmem:[#allocation13 + $0xd88] sm:$0xff] }
 0x38a   :  { %v2970_v58 = vpack.c.bf16 %v1079_v47, %v1071_v46  ;;  %v1143_v35 = vld [vmem:[#allocation13 + $0xd40] sm:$0xff]  ;;  %v1145_v40 = vld [vmem:[#allocation13 + $0xd50] sm:$0xff]  ;;  %v1162_v46 = vld [vmem:[#allocation13 + $0xdd8] sm:$0xff] }
 0x38c   :  { %2951 = vmatpush1.bf16.msra.mxu0 %v2950_v54  ;;  %3079 = vmatpush1.bf16.msra.mxu1 %v3078_v56  ;;  %v1096_v54 = vld [vmem:[#allocation13 + $0xbc8] sm:$0xff]  ;;  %v1090_v56 = vld [vmem:[#allocation13 + $0xb98] sm:$0xff] }
 0x38d   :  { %2953 = vmatprep.subr.bf16.mxu0 %v2952_v59  ;;  %3081 = vmatprep.subr.bf16.mxu1 %v3080_v60  ;;  %v3098_v59 = vpack.c.bf16 %v1081_v52, %v1073_v50  ;;  %v1087_v60 = vld [vmem:[#allocation13 + $0xb80] sm:$0xff]  ;;  %v2972_v62 = vpack.c.bf16 %v1096_v54, %v1088_v53  ;;  %v3100_v63 = vpack.c.bf16 %v1098_v57, %v1090_v56  ;;  %v1153_v54 = vld [vmem:[#allocation13 + $0xd90] sm:$0xff]  ;;  %v1168_v57 = vld [vmem:[#allocation13 + $0xe08] sm:$0xff] }
 0x38e   :  { %v2974_v6 = vpack.c.bf16 %v1095_v61, %v1087_v60  ;;  %v1159_v50 = vld [vmem:[#allocation13 + $0xdc0] sm:$0xff]  ;;  %v1161_v56 = vld [vmem:[#allocation13 + $0xdd0] sm:$0xff]  ;;  %v1178_v60 = vld [vmem:[#allocation13 + $0xe58] sm:$0xff] }
 0x390   :  { %2955 = vmatpush1.bf16.msra.mxu0 %v2954_v3  ;;  %3083 = vmatpush1.bf16.msra.mxu1 %v3082_v4  ;;  %v1112_v3 = vld [vmem:[#allocation13 + $0xc48] sm:$0xff]  ;;  %v1106_v4 = vld [vmem:[#allocation13 + $0xc18] sm:$0xff] }
 0x391   :  { %2957 = vmatprep.subr.bf16.mxu0 %v2956_v8  ;;  %3085 = vmatprep.subr.bf16.mxu1 %v3084_v9  ;;  %v3102_v8 = vpack.c.bf16 %v1097_v2, %v1089_v1  ;;  %v1103_v9 = vld [vmem:[#allocation13 + $0xc00] sm:$0xff]  ;;  %v2976_v11 = vpack.c.bf16 %v1112_v3, %v1104_v7  ;;  %v3104_v12 = vpack.c.bf16 %v1114_v5, %v1106_v4  ;;  %v1169_v3 = vld [vmem:[#allocation13 + $0xe10] sm:$0xff]  ;;  %v1184_v5 = vld [vmem:[#allocation13 + $0xe88] sm:$0xff] }
 0x392   :  { %v2978_v19 = vpack.c.bf16 %v1111_v10, %v1103_v9  ;;  %v1175_v1 = vld [vmem:[#allocation13 + $0xe40] sm:$0xff]  ;;  %v1177_v4 = vld [vmem:[#allocation13 + $0xe50] sm:$0xff]  ;;  %v1194_v9 = vld [vmem:[#allocation13 + $0xed8] sm:$0xff] }
 0x394   :  { %2959 = vmatpush1.bf16.msra.mxu0 %v2958_v16  ;;  %3087 = vmatpush1.bf16.msra.mxu1 %v3086_v17  ;;  %v1128_v16 = vld [vmem:[#allocation13 + $0xcc8] sm:$0xff]  ;;  %v1122_v17 = vld [vmem:[#allocation13 + $0xc98] sm:$0xff] }
 0x395   :  { %2961 = vmatprep.subr.bf16.mxu0 %v2960_v20  ;;  %3089 = vmatprep.subr.bf16.mxu1 %v3088_v21  ;;  %v3106_v20 = vpack.c.bf16 %v1113_v14, %v1105_v13  ;;  %v1119_v21 = vld [vmem:[#allocation13 + $0xc80] sm:$0xff]  ;;  %v2980_v23 = vpack.c.bf16 %v1128_v16, %v1120_v15  ;;  %v3108_v24 = vpack.c.bf16 %v1130_v18, %v1122_v17  ;;  %v1185_v16 = vld [vmem:[#allocation13 + $0xe90] sm:$0xff]  ;;  %v1200_v18 = vld [vmem:[#allocation13 + $0xf08] sm:$0xff] }
 0x396   :  { %v2982_v32 = vpack.c.bf16 %v1127_v22, %v1119_v21  ;;  %v1191_v13 = vld [vmem:[#allocation13 + $0xec0] sm:$0xff]  ;;  %v1193_v17 = vld [vmem:[#allocation13 + $0xed0] sm:$0xff]  ;;  %v1210_v21 = vld [vmem:[#allocation13 + $0xf58] sm:$0xff] }
 0x398   :  { %2963 = vmatpush1.bf16.msra.mxu0 %v2962_v29  ;;  %3091 = vmatpush1.bf16.msra.mxu1 %v3090_v30  ;;  %v1144_v29 = vld [vmem:[#allocation13 + $0xd48] sm:$0xff]  ;;  %v1138_v30 = vld [vmem:[#allocation13 + $0xd18] sm:$0xff] }
 0x399   :  { %2965 = vmatprep.subr.bf16.mxu0 %v2964_v33  ;;  %3093 = vmatprep.subr.bf16.mxu1 %v3092_v34  ;;  %v3110_v33 = vpack.c.bf16 %v1129_v27, %v1121_v26  ;;  %v1135_v34 = vld [vmem:[#allocation13 + $0xd00] sm:$0xff]  ;;  %v2984_v36 = vpack.c.bf16 %v1144_v29, %v1136_v28  ;;  %v3112_v37 = vpack.c.bf16 %v1146_v31, %v1138_v30  ;;  %v1201_v29 = vld [vmem:[#allocation13 + $0xf10] sm:$0xff]  ;;  %v1216_v31 = vld [vmem:[#allocation13 + $0xf88] sm:$0xff] }
 0x39a   :  { %v2986_v47 = vpack.c.bf16 %v1143_v35, %v1135_v34  ;;  %v1207_v26 = vld [vmem:[#allocation13 + $0xf40] sm:$0xff]  ;;  %v1209_v30 = vld [vmem:[#allocation13 + $0xf50] sm:$0xff]  ;;  %v1226_v34 = vld [vmem:[#allocation13 + $0xfd8] sm:$0xff] }
 0x39c   :  { %2967 = vmatpush1.bf16.msra.mxu0 %v2966_v42  ;;  %3095 = vmatpush1.bf16.msra.mxu1 %v3094_v45  ;;  %v1160_v42 = vld [vmem:[#allocation13 + $0xdc8] sm:$0xff]  ;;  %v1154_v45 = vld [vmem:[#allocation13 + $0xd98] sm:$0xff] }
 0x39d   :  { %2969 = vmatprep.subr.bf16.mxu0 %v2968_v48  ;;  %3097 = vmatprep.subr.bf16.mxu1 %v3096_v49  ;;  %v3114_v48 = vpack.c.bf16 %v1145_v40, %v1137_v39  ;;  %v1151_v49 = vld [vmem:[#allocation13 + $0xd80] sm:$0xff]  ;;  %v2988_v52 = vpack.c.bf16 %v1160_v42, %v1152_v41  ;;  %v3116_v53 = vpack.c.bf16 %v1162_v46, %v1154_v45  ;;  %v567_v41 = vsub.s32 2, %v4403_v44  ;;  %v1217_v46 = vld [vmem:[#allocation13 + $0xf90] sm:$0xff] }
 0x39e   :  { %v2990_v61 = vpack.c.bf16 %v1159_v50, %v1151_v49  ;;  %v1215_v39 = vld [vmem:[#allocation13 + $0xf80] sm:$0xff]  ;;  %v732_v49 = vld [vmem:[#allocation13 + $0x68] sm:$0xff]  ;;  %v726_v50 = vld [vmem:[#allocation13 + $0x38] sm:$0xff] }
 0x39f   :  { %v1223_v40 = vld [vmem:[#allocation13 + $0xfc0] sm:$0xff] }
 0x3a0   :  { %2971 = vmatpush1.bf16.msra.mxu0 %v2970_v58  ;;  %3099 = vmatpush1.bf16.msra.mxu1 %v3098_v59  ;;  %v1176_v58 = vld [vmem:[#allocation13 + $0xe48] sm:$0xff]  ;;  %v1170_v59 = vld [vmem:[#allocation13 + $0xe18] sm:$0xff] }
 0x3a1   :  { %2973 = vmatprep.subr.bf16.mxu0 %v2972_v62  ;;  %3101 = vmatprep.subr.bf16.mxu1 %v3100_v63  ;;  %v3118_v62 = vpack.c.bf16 %v1161_v56, %v1153_v54  ;;  %v1167_v63 = vld [vmem:[#allocation13 + $0xe00] sm:$0xff]  ;;  %v2992_v2 = vpack.c.bf16 %v1176_v58, %v1168_v57  ;;  %v3120_v7 = vpack.c.bf16 %v1178_v60, %v1170_v59 }
 0x3a2   :  { %v2994_v10 = vpack.c.bf16 %v1175_v1, %v1167_v63  ;;  %v3006_v54 = vpack.c.bf16 %v1223_v40, %v1215_v39  ;;  %v568_v57 = vrot.slane %v4417_v25, %v567_v41  ;;  %v723_v60 = vld [vmem:[#allocation13 + $0x20] sm:$0xff]  ;;  %v725_v63 = vld [vmem:[#allocation13 + $0x30] sm:$0xff] }
 0x3a3   :  { %v733_v1 = vld [vmem:[#allocation13 + $0x70] sm:$0xff] }
 0x3a4   :  { %2975 = vmatpush1.bf16.msra.mxu0 %v2974_v6  ;;  %3103 = vmatpush1.bf16.msra.mxu1 %v3102_v8  ;;  %v1192_v6 = vld [vmem:[#allocation13 + $0xec8] sm:$0xff]  ;;  %v1186_v8 = vld [vmem:[#allocation13 + $0xe98] sm:$0xff]  ;;  %v773_v39 = vld [vmem:[#allocation13 + $0x1b0] sm:$0xff] }
 0x3a5   :  { %2977 = vmatprep.subr.bf16.mxu0 %v2976_v11  ;;  %3105 = vmatprep.subr.bf16.mxu1 %v3104_v12  ;;  %v3122_v11 = vpack.c.bf16 %v1177_v4, %v1169_v3  ;;  %v1183_v12 = vld [vmem:[#allocation13 + $0xe80] sm:$0xff]  ;;  %v2996_v14 = vpack.c.bf16 %v1192_v6, %v1184_v5  ;;  %v3124_v15 = vpack.c.bf16 %v1194_v9, %v1186_v8  ;;  %v748_v3 = vld [vmem:[#allocation13 + $0xe8] sm:$0xff]  ;;  %v742_v4 = vld [vmem:[#allocation13 + $0xb8] sm:$0xff] }
 0x3a6   :  { %v2998_v22 = vpack.c.bf16 %v1191_v13, %v1183_v12  ;;  %v750_v5 = vld [vmem:[#allocation13 + $0xf8] sm:$0xff]  ;;  %v3266_v9 = vpack.c.bf16 %v733_v1, %v725_v63  ;;  %v741_v12 = vld [vmem:[#allocation13 + $0xb0] sm:$0xff] }
 0x3a8   :  { %2979 = vmatpush1.bf16.msra.mxu0 %v2978_v19  ;;  %3107 = vmatpush1.bf16.msra.mxu1 %v3106_v20  ;;  %v1208_v19 = vld [vmem:[#allocation13 + $0xf48] sm:$0xff]  ;;  %v1202_v20 = vld [vmem:[#allocation13 + $0xf18] sm:$0xff] }
 0x3a9   :  { %2981 = vmatprep.subr.bf16.mxu0 %v2980_v23  ;;  %3109 = vmatprep.subr.bf16.mxu1 %v3108_v24  ;;  %v3126_v23 = vpack.c.bf16 %v1193_v17, %v1185_v16  ;;  %v1199_v24 = vld [vmem:[#allocation13 + $0xf00] sm:$0xff]  ;;  %v3000_v27 = vpack.c.bf16 %v1208_v19, %v1200_v18  ;;  %v3128_v28 = vpack.c.bf16 %v1210_v21, %v1202_v20  ;;  %v756_v16 = vld [vmem:[#allocation13 + $0x128] sm:$0xff]  ;;  %v758_v18 = vld [vmem:[#allocation13 + $0x138] sm:$0xff] }
 0x3aa   :  { %v3002_v35 = vpack.c.bf16 %v1207_v26, %v1199_v24  ;;  %v764_v17 = vld [vmem:[#allocation13 + $0x168] sm:$0xff]  ;;  %v766_v19 = vld [vmem:[#allocation13 + $0x178] sm:$0xff]  ;;  %v763_v24 = vld [vmem:[#allocation13 + $0x160] sm:$0xff] }
 0x3ab   :  { %v757_v26 = vld [vmem:[#allocation13 + $0x130] sm:$0xff] }
 0x3ac   :  { %2983 = vmatpush1.bf16.msra.mxu0 %v2982_v32  ;;  %3111 = vmatpush1.bf16.msra.mxu1 %v3110_v33  ;;  %v1224_v32 = vld [vmem:[#allocation13 + $0xfc8] sm:$0xff]  ;;  %v1218_v33 = vld [vmem:[#allocation13 + $0xf98] sm:$0xff] }
 0x3ad   :  { %2985 = vmatprep.subr.bf16.mxu0 %v2984_v36  ;;  %3113 = vmatprep.subr.bf16.mxu1 %v3112_v37  ;;  %v3130_v36 = vpack.c.bf16 %v1209_v30, %v1201_v29  ;;  %v571_v37 = vsub.s32 3, %v4403_v44  ;;  %v3004_v42 = vpack.c.bf16 %v1224_v32, %v1216_v31  ;;  %v3132_v45 = vpack.c.bf16 %v1226_v34, %v1218_v33  ;;  %v772_v29 = vld [vmem:[#allocation13 + $0x1a8] sm:$0xff]  ;;  %v774_v31 = vld [vmem:[#allocation13 + $0x1b8] sm:$0xff] }
 0x3ae   :  { %v780_v30 = vld [vmem:[#allocation13 + $0x1e8] sm:$0xff]  ;;  %v782_v32 = vld [vmem:[#allocation13 + $0x1f8] sm:$0xff] }
 0x3af   :  { %v3276_v40 = vpack.c.bf16 %v782_v32, %v774_v31  ;;  %v837_v31 = vld [vmem:[#allocation13 + $0x3b0] sm:$0xff] }
 0x3b0   :  { %2987 = vmatpush1.bf16.msra.mxu0 %v2986_v47  ;;  %3115 = vmatpush1.bf16.msra.mxu1 %v3114_v48  ;;  %v1225_v47 = vld [vmem:[#allocation13 + $0xfd0] sm:$0xff]  ;;  %v724_v48 = vld [vmem:[#allocation13 + $0x28] sm:$0xff] }
 0x3b1   :  { %2989 = vmatprep.subr.bf16.mxu0 %v2988_v52  ;;  %3117 = vmatprep.subr.bf16.mxu1 %v3116_v53  ;;  %v734_v52 = vld [vmem:[#allocation13 + $0x78] sm:$0xff]  ;;  %v572_v53 = vrot.slane %v4417_v25, %v571_v37  ;;  %v3134_v56 = vpack.c.bf16 %v1225_v47, %v1217_v46  ;;  %v3136_v58 = vpack.c.bf16 %v732_v49, %v724_v48  ;;  %v796_v46 = vld [vmem:[#allocation13 + $0x268] sm:$0xff] }
 0x3b2   :  { %v3264_v59 = vpack.c.bf16 %v734_v52, %v726_v50  ;;  %v790_v47 = vld [vmem:[#allocation13 + $0x238] sm:$0xff] }
 0x3b3   :  { %v798_v48 = vld [vmem:[#allocation13 + $0x278] sm:$0xff] }
 0x3b4   :  { %2991 = vmatpush1.bf16.msra.mxu0 %v2990_v61  ;;  %3119 = vmatpush1.bf16.msra.mxu1 %v3118_v62  ;;  %v731_v61 = vld [vmem:[#allocation13 + $0x60] sm:$0xff] }
 0x3b5   :  { %2993 = vmatprep.subr.bf16.mxu0 %v2992_v2  ;;  %3121 = vmatprep.subr.bf16.mxu1 %v3120_v7  ;;  %v740_v2 = vld [vmem:[#allocation13 + $0xa8] sm:$0xff]  ;;  %v3138_v8 = vpack.c.bf16 %v731_v61, %v723_v60  ;;  %v806_v61 = vld [vmem:[#allocation13 + $0x2b8] sm:$0xff] }
 0x3b6   :  { %v3140_v13 = vpack.c.bf16 %v748_v3, %v740_v2  ;;  %v812_v60 = vld [vmem:[#allocation13 + $0x2e8] sm:$0xff]  ;;  %v811_v3 = vld [vmem:[#allocation13 + $0x2e0] sm:$0xff] }
 0x3b8   :  { %2995 = vmatpush1.bf16.msra.mxu0 %v2994_v10  ;;  %3123 = vmatpush1.bf16.msra.mxu1 %v3122_v11  ;;  %v739_v10 = vld [vmem:[#allocation13 + $0xa0] sm:$0xff] }
 0x3b9   :  { %2997 = vmatprep.subr.bf16.mxu0 %v2996_v14  ;;  %3125 = vmatprep.subr.bf16.mxu1 %v3124_v15  ;;  %v747_v11 = vld [vmem:[#allocation13 + $0xe0] sm:$0xff]  ;;  %v3268_v14 = vpack.c.bf16 %v750_v5, %v742_v4  ;;  %v749_v15 = vld [vmem:[#allocation13 + $0xf0] sm:$0xff] }
 0x3ba   :  { %v3142_v20 = vpack.c.bf16 %v747_v11, %v739_v10  ;;  %v3270_v21 = vpack.c.bf16 %v749_v15, %v741_v12  ;;  %v805_v4 = vld [vmem:[#allocation13 + $0x2b0] sm:$0xff]  ;;  %v828_v10 = vld [vmem:[#allocation13 + $0x368] sm:$0xff]  ;;  %v822_v11 = vld [vmem:[#allocation13 + $0x338] sm:$0xff] }
 0x3bb   :  { %v830_v12 = vld [vmem:[#allocation13 + $0x378] sm:$0xff] }
 0x3bc   :  { %2999 = vmatpush1.bf16.msra.mxu0 %v2998_v22  ;;  %3127 = vmatpush1.bf16.msra.mxu1 %v3126_v23  ;;  %v3144_v22 = vpack.c.bf16 %v764_v17, %v756_v16  ;;  %v755_v23 = vld [vmem:[#allocation13 + $0x120] sm:$0xff] }
 0x3bd   :  { %3001 = vmatprep.subr.bf16.mxu0 %v3000_v27  ;;  %3129 = vmatprep.subr.bf16.mxu1 %v3128_v28  ;;  %v3272_v27 = vpack.c.bf16 %v766_v19, %v758_v18  ;;  %v765_v28 = vld [vmem:[#allocation13 + $0x170] sm:$0xff]  ;;  %v3146_v33 = vpack.c.bf16 %v763_v24, %v755_v23  ;;  %v819_v16 = vld [vmem:[#allocation13 + $0x320] sm:$0xff]  ;;  %v3288_v19 = vpack.c.bf16 %v830_v12, %v822_v11  ;;  %v838_v23 = vld [vmem:[#allocation13 + $0x3b8] sm:$0xff] }
 0x3be   :  { %v3274_v34 = vpack.c.bf16 %v765_v28, %v757_v26  ;;  %v827_v17 = vld [vmem:[#allocation13 + $0x360] sm:$0xff]  ;;  %v821_v18 = vld [vmem:[#allocation13 + $0x330] sm:$0xff]  ;;  %v846_v24 = vld [vmem:[#allocation13 + $0x3f8] sm:$0xff] }
 0x3bf   :  { %v3162_v26 = vpack.c.bf16 %v827_v17, %v819_v16  ;;  %v3292_v32 = vpack.c.bf16 %v846_v24, %v838_v23  ;;  %v885_v11 = vld [vmem:[#allocation13 + $0x530] sm:$0xff]  ;;  %v902_v16 = vld [vmem:[#allocation13 + $0x5b8] sm:$0xff] }
 0x3c0   :  { %3003 = vmatpush1.bf16.msra.mxu0 %v3002_v35  ;;  %3131 = vmatpush1.bf16.msra.mxu1 %v3130_v36  ;;  %v3148_v35 = vpack.c.bf16 %v780_v30, %v772_v29  ;;  %v779_v36 = vld [vmem:[#allocation13 + $0x1e0] sm:$0xff]  ;;  %v910_v17 = vld [vmem:[#allocation13 + $0x5f8] sm:$0xff]  ;;  %v901_v23 = vld [vmem:[#allocation13 + $0x5b0] sm:$0xff] }
 0x3c1   :  { %3005 = vmatprep.subr.bf16.mxu0 %v3004_v42  ;;  %3133 = vmatprep.subr.bf16.mxu1 %v3132_v45  ;;  %v781_v42 = vld [vmem:[#allocation13 + $0x1f0] sm:$0xff]  ;;  %v788_v45 = vld [vmem:[#allocation13 + $0x228] sm:$0xff]  ;;  %v835_v29 = vld [vmem:[#allocation13 + $0x3a0] sm:$0xff]  ;;  %v3308_v24 = vpack.c.bf16 %v910_v17, %v902_v16 }
 0x3c2   :  { %v714_v62 = vpop.f32.mrb[6].mxu1  ;;  %v3278_v50 = vpack.c.bf16 %v781_v42, %v773_v39  ;;  %v3152_v52 = vpack.c.bf16 %v796_v46, %v788_v45  ;;  %v843_v30 = vld [vmem:[#allocation13 + $0x3e0] sm:$0xff]  ;;  %v965_v16 = vld [vmem:[#allocation13 + $0x7b0] sm:$0xff] }
 0x3c3   :  { %v716_v7 = vpop.f32.mrb[7].mxu1  ;;  %v4441_v25 = vadd.f32 %v714_v62, %v568_v57  ;;  %v3280_v57 = vpack.c.bf16 %v798_v48, %v790_v47  ;;  %v814_v62 = vld [vmem:[#allocation13 + $0x2f8] sm:$0xff]  ;;  %v3166_v39 = vpack.c.bf16 %v843_v30, %v835_v29  ;;  %v851_v45 = vld [vmem:[#allocation13 + $0x420] sm:$0xff]  ;;  %v853_v47 = vld [vmem:[#allocation13 + $0x430] sm:$0xff] }
 0x3c4   :  { %v4439_v6 = vadd.f32 %v716_v7, %v572_v53  ;;  %3007 = vmatpush1.bf16.msra.mxu0 %v3006_v54  ;;  %3135 = vmatpush1.bf16.msra.mxu1 %v3134_v56  ;;  %v787_v53 = vld [vmem:[#allocation13 + $0x220] sm:$0xff]  ;;  %v789_v56 = vld [vmem:[#allocation13 + $0x230] sm:$0xff]  ;;  %v3284_v5 = vpack.c.bf16 %v814_v62, %v806_v61  ;;  %v918_v29 = vld [vmem:[#allocation13 + $0x638] sm:$0xff] }
 0x3c5   :  { %3137 = vmatprep.subr.bf16.mxu0 %v3136_v58  ;;  %3265 = vmatprep.subr.bf16.mxu1 %v3264_v59  ;;  %v795_v54 = vld [vmem:[#allocation13 + $0x260] sm:$0xff]  ;;  %v797_v58 = vld [vmem:[#allocation13 + $0x270] sm:$0xff]  ;;  %v804_v59 = vld [vmem:[#allocation13 + $0x2a8] sm:$0xff] }
 0x3c6   :  { %1408 = vmatprep.mubr.f32.mxu0 %v4439_v6  ;;  %1550 = vmatprep.mubr.f32.mxu1 %v4439_v6  ;;  %v3154_v63 = vpack.c.bf16 %v795_v54, %v787_v53  ;;  %v3282_v1 = vpack.c.bf16 %v797_v58, %v789_v56  ;;  %v3156_v2 = vpack.c.bf16 %v812_v60, %v804_v59  ;;  %v803_v7 = vld [vmem:[#allocation13 + $0x2a0] sm:$0xff]  ;;  %v870_v53 = vld [vmem:[#allocation13 + $0x4b8] sm:$0xff]  ;;  %v869_v61 = vld [vmem:[#allocation13 + $0x4b0] sm:$0xff] }
 0x3c7   :  { %1409 = vmatmul.mubr.f32.vlgmr.msra.gmra.mrb[0].mxu0 %v4441_v25  ;;  %1551 = vmatmul.mubr.f32.vlgmr.msra.gmra.mrb[8].mxu1 %v4441_v25  ;;  %v859_v46 = vld [vmem:[#allocation13 + $0x460] sm:$0xff]  ;;  %v878_v54 = vld [vmem:[#allocation13 + $0x4f8] sm:$0xff] }
 0x3c8   :  { %3139 = vmatpush1.bf16.msra.mxu0 %v3138_v8  ;;  %1621 = vmatprep.mubr.f32.mxu0 %v4423_v38  ;;  %v813_v8 = vld [vmem:[#allocation13 + $0x2f0] sm:$0xff]  ;;  %v3170_v56 = vpack.c.bf16 %v859_v46, %v851_v45  ;;  %v867_v59 = vld [vmem:[#allocation13 + $0x4a0] sm:$0xff]  ;;  %v3300_v62 = vpack.c.bf16 %v878_v54, %v870_v53  ;;  %v926_v30 = vld [vmem:[#allocation13 + $0x678] sm:$0xff] }
 0x3c9   :  { %3267 = vmatpush1.bf16.msra.mxu1 %v3266_v9  ;;  %1763 = vmatprep.mubr.f32.mxu1 %v4423_v38  ;;  %v771_v38 = vld [vmem:[#allocation13 + $0x1a0] sm:$0xff]  ;;  %v820_v9 = vld [vmem:[#allocation13 + $0x328] sm:$0xff]  ;;  %v934_v45 = vld [vmem:[#allocation13 + $0x6b8] sm:$0xff] }
 0x3ca   :  { %3141 = vmatprep.subr.bf16.mxu0 %v3140_v13  ;;  %3269 = vmatprep.subr.bf16.mxu1 %v3268_v14  ;;  %v3150_v49 = vpack.c.bf16 %v779_v36, %v771_v38  ;;  %v3158_v13 = vpack.c.bf16 %v811_v3, %v803_v7  ;;  %v3286_v14 = vpack.c.bf16 %v813_v8, %v805_v4  ;;  %v854_v38 = vld [vmem:[#allocation13 + $0x438] sm:$0xff]  ;;  %v875_v60 = vld [vmem:[#allocation13 + $0x4e0] sm:$0xff]  ;;  %v933_v53 = vld [vmem:[#allocation13 + $0x6b0] sm:$0xff] }
 0x3cb   :  { %v3160_v15 = vpack.c.bf16 %v828_v10, %v820_v9  ;;  %v862_v36 = vld [vmem:[#allocation13 + $0x478] sm:$0xff]  ;;  %v3174_v4 = vpack.c.bf16 %v875_v60, %v867_v59  ;;  %v883_v9 = vld [vmem:[#allocation13 + $0x520] sm:$0xff] }
 0x3cc   :  { %3143 = vmatpush1.bf16.msra.mxu0 %v3142_v20  ;;  %v829_v20 = vld [vmem:[#allocation13 + $0x370] sm:$0xff]  ;;  %v3296_v48 = vpack.c.bf16 %v862_v36, %v854_v38  ;;  %v886_v7 = vld [vmem:[#allocation13 + $0x538] sm:$0xff]  ;;  %v891_v10 = vld [vmem:[#allocation13 + $0x560] sm:$0xff]  ;;  %v3312_v36 = vpack.c.bf16 %v926_v30, %v918_v29 }
 0x3cd   :  { %3271 = vmatpush1.bf16.msra.mxu1 %v3270_v21  ;;  %3145 = vmatprep.subr.bf16.mxu0 %v3144_v22  ;;  %v836_v21 = vld [vmem:[#allocation13 + $0x3a8] sm:$0xff]  ;;  %v894_v3 = vld [vmem:[#allocation13 + $0x578] sm:$0xff]  ;;  %v917_v38 = vld [vmem:[#allocation13 + $0x630] sm:$0xff] }
 0x3ce   :  { %3273 = vmatprep.subr.bf16.mxu1 %v3272_v27  ;;  %v844_v22 = vld [vmem:[#allocation13 + $0x3e8] sm:$0xff]  ;;  %v3290_v27 = vpack.c.bf16 %v829_v20, %v821_v18  ;;  %v3304_v12 = vpack.c.bf16 %v894_v3, %v886_v7  ;;  %v3178_v18 = vpack.c.bf16 %v891_v10, %v883_v9  ;;  %v942_v46 = vld [vmem:[#allocation13 + $0x6f8] sm:$0xff]  ;;  %v949_v7 = vld [vmem:[#allocation13 + $0x730] sm:$0xff] }
 0x3cf   :  { %v3164_v28 = vpack.c.bf16 %v844_v22, %v836_v21  ;;  %v899_v21 = vld [vmem:[#allocation13 + $0x5a0] sm:$0xff]  ;;  %v3316_v54 = vpack.c.bf16 %v942_v46, %v934_v45  ;;  %v950_v59 = vld [vmem:[#allocation13 + $0x738] sm:$0xff]  ;;  %v981_v30 = vld [vmem:[#allocation13 + $0x830] sm:$0xff] }
 0x3d0   :  { %3147 = vmatpush1.bf16.msra.mxu0 %v3146_v33  ;;  %v845_v33 = vld [vmem:[#allocation13 + $0x3f0] sm:$0xff]  ;;  %v907_v22 = vld [vmem:[#allocation13 + $0x5e0] sm:$0xff]  ;;  %v958_v60 = vld [vmem:[#allocation13 + $0x778] sm:$0xff] }
 0x3d1   :  { %3275 = vmatpush1.bf16.msra.mxu1 %v3274_v34  ;;  %3149 = vmatprep.subr.bf16.mxu0 %v3148_v35  ;;  %v852_v34 = vld [vmem:[#allocation13 + $0x428] sm:$0xff]  ;;  %v3320_v3 = vpack.c.bf16 %v958_v60, %v950_v59  ;;  %v966_v9 = vld [vmem:[#allocation13 + $0x7b8] sm:$0xff]  ;;  %v1005_v46 = vld [vmem:[#allocation13 + $0x8f0] sm:$0xff] }
 0x3d2   :  { %3277 = vmatprep.subr.bf16.mxu1 %v3276_v40  ;;  %v860_v35 = vld [vmem:[#allocation13 + $0x468] sm:$0xff]  ;;  %v3294_v40 = vpack.c.bf16 %v845_v33, %v837_v31  ;;  %v3182_v31 = vpack.c.bf16 %v907_v22, %v899_v21  ;;  %v974_v10 = vld [vmem:[#allocation13 + $0x7f8] sm:$0xff]  ;;  %v1013_v59 = vld [vmem:[#allocation13 + $0x930] sm:$0xff] }
 0x3d3   :  { %v3168_v42 = vpack.c.bf16 %v860_v35, %v852_v34  ;;  %v915_v34 = vld [vmem:[#allocation13 + $0x620] sm:$0xff]  ;;  %v3324_v17 = vpack.c.bf16 %v974_v10, %v966_v9  ;;  %v982_v21 = vld [vmem:[#allocation13 + $0x838] sm:$0xff]  ;;  %v1044_v10 = vld [vmem:[#allocation13 + $0xa28] sm:$0xff] }
 0x3d4   :  { %3151 = vmatpush1.bf16.msra.mxu0 %v3150_v49  ;;  %v861_v49 = vld [vmem:[#allocation13 + $0x470] sm:$0xff]  ;;  %v923_v35 = vld [vmem:[#allocation13 + $0x660] sm:$0xff]  ;;  %v990_v22 = vld [vmem:[#allocation13 + $0x878] sm:$0xff] }
 0x3d5   :  { %3279 = vmatpush1.bf16.msra.mxu1 %v3278_v50  ;;  %3153 = vmatprep.subr.bf16.mxu0 %v3152_v52  ;;  %v868_v50 = vld [vmem:[#allocation13 + $0x4a8] sm:$0xff]  ;;  %v3328_v29 = vpack.c.bf16 %v990_v22, %v982_v21  ;;  %v1053_v21 = vld [vmem:[#allocation13 + $0xa70] sm:$0xff] }
 0x3d6   :  { %3281 = vmatprep.subr.bf16.mxu1 %v3280_v57  ;;  %v876_v52 = vld [vmem:[#allocation13 + $0x4e8] sm:$0xff]  ;;  %v3298_v57 = vpack.c.bf16 %v861_v49, %v853_v47  ;;  %v3186_v47 = vpack.c.bf16 %v923_v35, %v915_v34  ;;  %v998_v35 = vld [vmem:[#allocation13 + $0x8b8] sm:$0xff] }
 0x3d7   :  { %v3172_v58 = vpack.c.bf16 %v876_v52, %v868_v50  ;;  %v931_v50 = vld [vmem:[#allocation13 + $0x6a0] sm:$0xff]  ;;  %v1060_v22 = vld [vmem:[#allocation13 + $0xaa8] sm:$0xff] }
 0x3d8   :  { %3155 = vmatpush1.bf16.msra.mxu0 %v3154_v63  ;;  %v877_v63 = vld [vmem:[#allocation13 + $0x4f0] sm:$0xff]  ;;  %v939_v52 = vld [vmem:[#allocation13 + $0x6e0] sm:$0xff] }
 0x3d9   :  { %3283 = vmatpush1.bf16.msra.mxu1 %v3282_v1  ;;  %3157 = vmatprep.subr.bf16.mxu0 %v3156_v2  ;;  %v884_v1 = vld [vmem:[#allocation13 + $0x528] sm:$0xff] }
 0x3da   :  { %3285 = vmatprep.subr.bf16.mxu1 %v3284_v5  ;;  %v892_v2 = vld [vmem:[#allocation13 + $0x568] sm:$0xff]  ;;  %v3302_v5 = vpack.c.bf16 %v877_v63, %v869_v61  ;;  %v3190_v61 = vpack.c.bf16 %v939_v52, %v931_v50  ;;  %v1014_v50 = vld [vmem:[#allocation13 + $0x938] sm:$0xff] }
 0x3db   :  { %v3176_v8 = vpack.c.bf16 %v892_v2, %v884_v1  ;;  %v947_v1 = vld [vmem:[#allocation13 + $0x720] sm:$0xff]  ;;  %v1022_v52 = vld [vmem:[#allocation13 + $0x978] sm:$0xff] }
 0x3dc   :  { %3159 = vmatpush1.bf16.msra.mxu0 %v3158_v13  ;;  %v893_v13 = vld [vmem:[#allocation13 + $0x570] sm:$0xff]  ;;  %v955_v2 = vld [vmem:[#allocation13 + $0x760] sm:$0xff]  ;;  %v3336_v60 = vpack.c.bf16 %v1022_v52, %v1014_v50  ;;  %v1092_v52 = vld [vmem:[#allocation13 + $0xba8] sm:$0xff] }
 0x3dd   :  { %3287 = vmatpush1.bf16.msra.mxu1 %v3286_v14  ;;  %3161 = vmatprep.subr.bf16.mxu0 %v3160_v15  ;;  %v900_v14 = vld [vmem:[#allocation13 + $0x5a8] sm:$0xff]  ;;  %v1085_v50 = vld [vmem:[#allocation13 + $0xb70] sm:$0xff] }
 0x3de   :  { %3289 = vmatprep.subr.bf16.mxu1 %v3288_v19  ;;  %v908_v15 = vld [vmem:[#allocation13 + $0x5e8] sm:$0xff]  ;;  %v3306_v19 = vpack.c.bf16 %v893_v13, %v885_v11  ;;  %v3194_v11 = vpack.c.bf16 %v955_v2, %v947_v1  ;;  %v1030_v1 = vld [vmem:[#allocation13 + $0x9b8] sm:$0xff] }
 0x3df   :  { %v3180_v20 = vpack.c.bf16 %v908_v15, %v900_v14  ;;  %v963_v14 = vld [vmem:[#allocation13 + $0x7a0] sm:$0xff] }
 0x3e0   :  { %3163 = vmatpush1.bf16.msra.mxu0 %v3162_v26  ;;  %v909_v26 = vld [vmem:[#allocation13 + $0x5f0] sm:$0xff]  ;;  %v971_v15 = vld [vmem:[#allocation13 + $0x7e0] sm:$0xff] }
 0x3e1   :  { %3291 = vmatpush1.bf16.msra.mxu1 %v3290_v27  ;;  %3165 = vmatprep.subr.bf16.mxu0 %v3164_v28  ;;  %v916_v27 = vld [vmem:[#allocation13 + $0x628] sm:$0xff] }
 0x3e2   :  { %3293 = vmatprep.subr.bf16.mxu1 %v3292_v32  ;;  %v924_v28 = vld [vmem:[#allocation13 + $0x668] sm:$0xff]  ;;  %v3310_v32 = vpack.c.bf16 %v909_v26, %v901_v23  ;;  %v3198_v23 = vpack.c.bf16 %v971_v15, %v963_v14 }
 0x3e3   :  { %v3184_v33 = vpack.c.bf16 %v924_v28, %v916_v27  ;;  %v979_v27 = vld [vmem:[#allocation13 + $0x820] sm:$0xff] }
 0x3e4   :  { %3167 = vmatpush1.bf16.msra.mxu0 %v3166_v39  ;;  %v925_v39 = vld [vmem:[#allocation13 + $0x670] sm:$0xff]  ;;  %v987_v28 = vld [vmem:[#allocation13 + $0x860] sm:$0xff] }
 0x3e5   :  { %3295 = vmatpush1.bf16.msra.mxu1 %v3294_v40  ;;  %3169 = vmatprep.subr.bf16.mxu0 %v3168_v42  ;;  %v932_v40 = vld [vmem:[#allocation13 + $0x6a8] sm:$0xff]  ;;  %v3202_v34 = vpack.c.bf16 %v987_v28, %v979_v27 }
 0x3e6   :  { %3297 = vmatprep.subr.bf16.mxu1 %v3296_v48  ;;  %v940_v42 = vld [vmem:[#allocation13 + $0x6e8] sm:$0xff]  ;;  %v3314_v48 = vpack.c.bf16 %v925_v39, %v917_v38  ;;  %v1006_v38 = vld [vmem:[#allocation13 + $0x8f8] sm:$0xff]  ;;  %v995_v39 = vld [vmem:[#allocation13 + $0x8a0] sm:$0xff] }
 0x3e7   :  { %v3188_v49 = vpack.c.bf16 %v940_v42, %v932_v40  ;;  %v1003_v40 = vld [vmem:[#allocation13 + $0x8e0] sm:$0xff]  ;;  %v997_v42 = vld [vmem:[#allocation13 + $0x8b0] sm:$0xff] }
 0x3e8   :  { %3171 = vmatpush1.bf16.msra.mxu0 %v3170_v56  ;;  %v941_v56 = vld [vmem:[#allocation13 + $0x6f0] sm:$0xff] }
 0x3e9   :  { %3299 = vmatpush1.bf16.msra.mxu1 %v3298_v57  ;;  %3173 = vmatprep.subr.bf16.mxu0 %v3172_v58  ;;  %v948_v57 = vld [vmem:[#allocation13 + $0x728] sm:$0xff] }
 0x3ea   :  { %3301 = vmatprep.subr.bf16.mxu1 %v3300_v62  ;;  %v956_v58 = vld [vmem:[#allocation13 + $0x768] sm:$0xff]  ;;  %v3318_v62 = vpack.c.bf16 %v941_v56, %v933_v53  ;;  %v3206_v53 = vpack.c.bf16 %v1003_v40, %v995_v39  ;;  %v1086_v39 = vld [vmem:[#allocation13 + $0xb78] sm:$0xff] }
 0x3eb   :  { %v3192_v63 = vpack.c.bf16 %v956_v58, %v948_v57  ;;  %v1011_v57 = vld [vmem:[#allocation13 + $0x920] sm:$0xff] }
 0x3ec   :  { %3175 = vmatpush1.bf16.msra.mxu0 %v3174_v4  ;;  %v957_v4 = vld [vmem:[#allocation13 + $0x770] sm:$0xff]  ;;  %v1019_v58 = vld [vmem:[#allocation13 + $0x960] sm:$0xff] }
 0x3ed   :  { %3303 = vmatpush1.bf16.msra.mxu1 %v3302_v5  ;;  %3177 = vmatprep.subr.bf16.mxu0 %v3176_v8  ;;  %v964_v5 = vld [vmem:[#allocation13 + $0x7a8] sm:$0xff]  ;;  %v3210_v2 = vpack.c.bf16 %v1019_v58, %v1011_v57 }
 0x3ee   :  { %3305 = vmatprep.subr.bf16.mxu1 %v3304_v12  ;;  %v972_v8 = vld [vmem:[#allocation13 + $0x7e8] sm:$0xff]  ;;  %v3322_v12 = vpack.c.bf16 %v957_v4, %v949_v7  ;;  %v1027_v4 = vld [vmem:[#allocation13 + $0x9a0] sm:$0xff] }
 0x3ef   :  { %v3196_v13 = vpack.c.bf16 %v972_v8, %v964_v5  ;;  %v1035_v5 = vld [vmem:[#allocation13 + $0x9e0] sm:$0xff]  ;;  %v1029_v8 = vld [vmem:[#allocation13 + $0x9b0] sm:$0xff] }
 0x3f0   :  { %3179 = vmatpush1.bf16.msra.mxu0 %v3178_v18  ;;  %v973_v18 = vld [vmem:[#allocation13 + $0x7f0] sm:$0xff]  ;;  %v3214_v14 = vpack.c.bf16 %v1035_v5, %v1027_v4 }
 0x3f1   :  { %3307 = vmatpush1.bf16.msra.mxu1 %v3306_v19  ;;  %3181 = vmatprep.subr.bf16.mxu0 %v3180_v20  ;;  %v980_v19 = vld [vmem:[#allocation13 + $0x828] sm:$0xff] }
 0x3f2   :  { %3309 = vmatprep.subr.bf16.mxu1 %v3308_v24  ;;  %v988_v20 = vld [vmem:[#allocation13 + $0x868] sm:$0xff]  ;;  %v3326_v24 = vpack.c.bf16 %v973_v18, %v965_v16  ;;  %v1051_v18 = vld [vmem:[#allocation13 + $0xa60] sm:$0xff] }
 0x3f3   :  { %v3200_v26 = vpack.c.bf16 %v988_v20, %v980_v19  ;;  %v1045_v19 = vld [vmem:[#allocation13 + $0xa30] sm:$0xff] }
 0x3f4   :  { %3183 = vmatpush1.bf16.msra.mxu0 %v3182_v31  ;;  %v989_v31 = vld [vmem:[#allocation13 + $0x870] sm:$0xff]  ;;  %v3346_v28 = vpack.c.bf16 %v1053_v21, %v1045_v19  ;;  %v1131_v21 = vld [vmem:[#allocation13 + $0xce0] sm:$0xff] }
 0x3f5   :  { %3311 = vmatpush1.bf16.msra.mxu1 %v3310_v32  ;;  %3185 = vmatprep.subr.bf16.mxu0 %v3184_v33  ;;  %v996_v32 = vld [vmem:[#allocation13 + $0x8a8] sm:$0xff] }
 0x3f6   :  { %3313 = vmatprep.subr.bf16.mxu1 %v3312_v36  ;;  %v1004_v33 = vld [vmem:[#allocation13 + $0x8e8] sm:$0xff]  ;;  %v3330_v36 = vpack.c.bf16 %v989_v31, %v981_v30  ;;  %v1059_v30 = vld [vmem:[#allocation13 + $0xaa0] sm:$0xff] }
 0x3f7   :  { %v3204_v45 = vpack.c.bf16 %v1004_v33, %v996_v32  ;;  %v1067_v31 = vld [vmem:[#allocation13 + $0xae0] sm:$0xff]  ;;  %v1061_v32 = vld [vmem:[#allocation13 + $0xab0] sm:$0xff] }
 0x3f8   :  { %3187 = vmatpush1.bf16.msra.mxu0 %v3186_v47  ;;  %v1012_v47 = vld [vmem:[#allocation13 + $0x928] sm:$0xff]  ;;  %v3222_v40 = vpack.c.bf16 %v1067_v31, %v1059_v30 }
 0x3f9   :  { %3315 = vmatpush1.bf16.msra.mxu1 %v3314_v48  ;;  %3189 = vmatprep.subr.bf16.mxu0 %v3188_v49  ;;  %v1020_v48 = vld [vmem:[#allocation13 + $0x968] sm:$0xff]  ;;  %v3332_v49 = vpack.c.bf16 %v1006_v38, %v998_v35 }
 0x3fa   :  { %3317 = vmatprep.subr.bf16.mxu1 %v3316_v54  ;;  %v3334_v54 = vpack.c.bf16 %v1005_v46, %v997_v42  ;;  %v3208_v56 = vpack.c.bf16 %v1020_v48, %v1012_v47  ;;  %v1076_v35 = vld [vmem:[#allocation13 + $0xb28] sm:$0xff]  ;;  %v1075_v46 = vld [vmem:[#allocation13 + $0xb20] sm:$0xff]  ;;  %v1077_v48 = vld [vmem:[#allocation13 + $0xb30] sm:$0xff] }
 0x3fb   :  { %v1084_v38 = vld [vmem:[#allocation13 + $0xb68] sm:$0xff]  ;;  %v1083_v47 = vld [vmem:[#allocation13 + $0xb60] sm:$0xff]  ;;  %v3354_v58 = vpack.c.bf16 %v1085_v50, %v1077_v48 }
 0x3fc   :  { %3191 = vmatpush1.bf16.msra.mxu0 %v3190_v61  ;;  %v1021_v61 = vld [vmem:[#allocation13 + $0x970] sm:$0xff]  ;;  %v3226_v57 = vpack.c.bf16 %v1083_v47, %v1075_v46  ;;  %v1163_v50 = vld [vmem:[#allocation13 + $0xde0] sm:$0xff] }
 0x3fd   :  { %3319 = vmatpush1.bf16.msra.mxu1 %v3318_v62  ;;  %3193 = vmatprep.subr.bf16.mxu0 %v3192_v63  ;;  %v1028_v62 = vld [vmem:[#allocation13 + $0x9a8] sm:$0xff]  ;;  %v3338_v7 = vpack.c.bf16 %v1021_v61, %v1013_v59  ;;  %v1099_v61 = vld [vmem:[#allocation13 + $0xbe0] sm:$0xff] }
 0x3fe   :  { %3321 = vmatprep.subr.bf16.mxu1 %v3320_v3  ;;  %v1036_v63 = vld [vmem:[#allocation13 + $0x9e8] sm:$0xff] }
 0x3ff   :  { %v3212_v3 = vpack.c.bf16 %v1036_v63, %v1028_v62  ;;  %v1093_v62 = vld [vmem:[#allocation13 + $0xbb0] sm:$0xff] }
 0x400   :  { %3195 = vmatpush1.bf16.msra.mxu0 %v3194_v11  ;;  %v1052_v11 = vld [vmem:[#allocation13 + $0xa68] sm:$0xff] }
 0x401   :  { %3323 = vmatpush1.bf16.msra.mxu1 %v3322_v12  ;;  %3197 = vmatprep.subr.bf16.mxu0 %v3196_v13  ;;  %v1046_v12 = vld [vmem:[#allocation13 + $0xa38] sm:$0xff]  ;;  %v3216_v16 = vpack.c.bf16 %v1052_v11, %v1044_v10  ;;  %v1109_v10 = vld [vmem:[#allocation13 + $0xc30] sm:$0xff] }
 0x402   :  { %3325 = vmatprep.subr.bf16.mxu1 %v3324_v17  ;;  %v1054_v13 = vld [vmem:[#allocation13 + $0xa78] sm:$0xff]  ;;  %v1043_v17 = vld [vmem:[#allocation13 + $0xa20] sm:$0xff] }
 0x403   :  { %v3344_v20 = vpack.c.bf16 %v1054_v13, %v1046_v12  ;;  %v3218_v27 = vpack.c.bf16 %v1051_v18, %v1043_v17  ;;  %v1117_v12 = vld [vmem:[#allocation13 + $0xc70] sm:$0xff]  ;;  %v1124_v13 = vld [vmem:[#allocation13 + $0xca8] sm:$0xff] }
 0x404   :  { %3199 = vmatpush1.bf16.msra.mxu0 %v3198_v23  ;;  %v1068_v23 = vld [vmem:[#allocation13 + $0xae8] sm:$0xff]  ;;  %v3362_v18 = vpack.c.bf16 %v1117_v12, %v1109_v10  ;;  %v1195_v12 = vld [vmem:[#allocation13 + $0xee0] sm:$0xff] }
 0x405   :  { %3327 = vmatpush1.bf16.msra.mxu1 %v3326_v24  ;;  %3201 = vmatprep.subr.bf16.mxu0 %v3200_v26  ;;  %v1062_v24 = vld [vmem:[#allocation13 + $0xab8] sm:$0xff] }
 0x406   :  { %3329 = vmatprep.subr.bf16.mxu1 %v3328_v29  ;;  %v1070_v26 = vld [vmem:[#allocation13 + $0xaf8] sm:$0xff]  ;;  %v3220_v29 = vpack.c.bf16 %v1068_v23, %v1060_v22  ;;  %v1125_v22 = vld [vmem:[#allocation13 + $0xcb0] sm:$0xff] }
 0x407   :  { %1622 = vmatmul.mubr.f32.vlgmr.msra.gmra.mrb[2].mxu0 %v4425_v43  ;;  %v3348_v33 = vpack.c.bf16 %v1070_v26, %v1062_v24  ;;  %v1133_v24 = vld [vmem:[#allocation13 + $0xcf0] sm:$0xff]  ;;  %v1140_v26 = vld [vmem:[#allocation13 + $0xd28] sm:$0xff] }
 0x408   :  { %1764 = vmatmul.mubr.f32.vlgmr.msra.gmra.mrb[10].mxu1 %v4425_v43  ;;  %3203 = vmatpush1.bf16.msra.mxu0 %v3202_v34  ;;  %v1038_v43 = vld [vmem:[#allocation13 + $0x9f8] sm:$0xff]  ;;  %v1069_v34 = vld [vmem:[#allocation13 + $0xaf0] sm:$0xff]  ;;  %v3366_v31 = vpack.c.bf16 %v1133_v24, %v1125_v22  ;;  %v1211_v24 = vld [vmem:[#allocation13 + $0xf60] sm:$0xff] }
 0x409   :  { %1692 = vmatprep.mubr.f32.mxu0 %v4439_v6  ;;  %3331 = vmatpush1.bf16.msra.mxu1 %v3330_v36  ;;  %v3340_v9 = vpack.c.bf16 %v1038_v43, %v1030_v1  ;;  %v1078_v36 = vld [vmem:[#allocation13 + $0xb38] sm:$0xff]  ;;  %v3350_v42 = vpack.c.bf16 %v1069_v34, %v1061_v32  ;;  %v1101_v1 = vld [vmem:[#allocation13 + $0xbf0] sm:$0xff]  ;;  %v1108_v43 = vld [vmem:[#allocation13 + $0xc28] sm:$0xff] }
 0x40a   :  { %1834 = vmatprep.mubr.f32.mxu1 %v4439_v6  ;;  %3205 = vmatprep.subr.bf16.mxu0 %v3204_v45  ;;  %v1037_v6 = vld [vmem:[#allocation13 + $0x9f0] sm:$0xff]  ;;  %v3224_v45 = vpack.c.bf16 %v1084_v38, %v1076_v35  ;;  %v3358_v5 = vpack.c.bf16 %v1101_v1, %v1093_v62  ;;  %v1147_v34 = vld [vmem:[#allocation13 + $0xd60] sm:$0xff] }
 0x40b   :  { %3333 = vmatprep.subr.bf16.mxu1 %v3332_v49  ;;  %v3342_v15 = vpack.c.bf16 %v1037_v6, %v1029_v8  ;;  %v3352_v49 = vpack.c.bf16 %v1086_v39, %v1078_v36  ;;  %v1115_v6 = vld [vmem:[#allocation13 + $0xc60] sm:$0xff]  ;;  %v1141_v35 = vld [vmem:[#allocation13 + $0xd30] sm:$0xff]  ;;  %v1156_v39 = vld [vmem:[#allocation13 + $0xda8] sm:$0xff] }
 0x40c   :  { %3207 = vmatpush1.bf16.msra.mxu0 %v3206_v53  ;;  %v1100_v53 = vld [vmem:[#allocation13 + $0xbe8] sm:$0xff]  ;;  %v1149_v36 = vld [vmem:[#allocation13 + $0xd70] sm:$0xff]  ;;  %v1179_v1 = vld [vmem:[#allocation13 + $0xe60] sm:$0xff] }
 0x40d   :  { %3335 = vmatpush1.bf16.msra.mxu1 %v3334_v54  ;;  %3209 = vmatprep.subr.bf16.mxu0 %v3208_v56  ;;  %v1094_v54 = vld [vmem:[#allocation13 + $0xbb8] sm:$0xff]  ;;  %v3228_v59 = vpack.c.bf16 %v1100_v53, %v1092_v52  ;;  %v3370_v47 = vpack.c.bf16 %v1149_v36, %v1141_v35  ;;  %v1157_v52 = vld [vmem:[#allocation13 + $0xdb0] sm:$0xff]  ;;  %v1227_v36 = vld [vmem:[#allocation13 + $0xfe0] sm:$0xff] }
 0x40e   :  { %3337 = vmatprep.subr.bf16.mxu1 %v3336_v60  ;;  %v1102_v56 = vld [vmem:[#allocation13 + $0xbf8] sm:$0xff]  ;;  %v1091_v60 = vld [vmem:[#allocation13 + $0xba0] sm:$0xff] }
 0x40f   :  { %v3356_v63 = vpack.c.bf16 %v1102_v56, %v1094_v54  ;;  %v3230_v4 = vpack.c.bf16 %v1099_v61, %v1091_v60  ;;  %v1165_v54 = vld [vmem:[#allocation13 + $0xdf0] sm:$0xff]  ;;  %v1172_v56 = vld [vmem:[#allocation13 + $0xe28] sm:$0xff] }
 0x410   :  { %3211 = vmatpush1.bf16.msra.mxu0 %v3210_v2  ;;  %v1116_v2 = vld [vmem:[#allocation13 + $0xc68] sm:$0xff]  ;;  %v3374_v61 = vpack.c.bf16 %v1165_v54, %v1157_v52  ;;  %v1843_v52 = vld [vmem:[#allocation16 + $0x10] sm:$0xff]  ;;  %v1848_v54 = vld [vmem:[#allocation16 + $0x38] sm:$0xff] }
 0x411   :  { %3339 = vmatpush1.bf16.msra.mxu1 %v3338_v7  ;;  %3213 = vmatprep.subr.bf16.mxu0 %v3212_v3  ;;  %v1110_v7 = vld [vmem:[#allocation13 + $0xc38] sm:$0xff]  ;;  %v3232_v8 = vpack.c.bf16 %v1116_v2, %v1108_v43  ;;  %v1173_v43 = vld [vmem:[#allocation13 + $0xe30] sm:$0xff] }
 0x412   :  { %3341 = vmatprep.subr.bf16.mxu1 %v3340_v9  ;;  %v1118_v3 = vld [vmem:[#allocation13 + $0xc78] sm:$0xff]  ;;  %v1107_v9 = vld [vmem:[#allocation13 + $0xc20] sm:$0xff] }
 0x413   :  { %v3360_v11 = vpack.c.bf16 %v1118_v3, %v1110_v7  ;;  %v3234_v17 = vpack.c.bf16 %v1115_v6, %v1107_v9  ;;  %v1181_v7 = vld [vmem:[#allocation13 + $0xe70] sm:$0xff]  ;;  %v1188_v3 = vld [vmem:[#allocation13 + $0xea8] sm:$0xff] }
 0x414   :  { %3215 = vmatpush1.bf16.msra.mxu0 %v3214_v14  ;;  %v1132_v14 = vld [vmem:[#allocation13 + $0xce8] sm:$0xff]  ;;  %v3378_v6 = vpack.c.bf16 %v1181_v7, %v1173_v43  ;;  %v1851_v43 = vld [vmem:[#allocation16 + $0x50] sm:$0xff]  ;;  %v1856_v7 = vld [vmem:[#allocation16 + $0x78] sm:$0xff] }
 0x415   :  { %3343 = vmatpush1.bf16.msra.mxu1 %v3342_v15  ;;  %3217 = vmatprep.subr.bf16.mxu0 %v3216_v16  ;;  %v1126_v15 = vld [vmem:[#allocation13 + $0xcb8] sm:$0xff]  ;;  %v3236_v19 = vpack.c.bf16 %v1132_v14, %v1124_v13  ;;  %v1189_v13 = vld [vmem:[#allocation13 + $0xeb0] sm:$0xff] }
 0x416   :  { %3345 = vmatprep.subr.bf16.mxu1 %v3344_v20  ;;  %v1134_v16 = vld [vmem:[#allocation13 + $0xcf8] sm:$0xff]  ;;  %v1123_v20 = vld [vmem:[#allocation13 + $0xca0] sm:$0xff] }
 0x417   :  { %v3364_v23 = vpack.c.bf16 %v1134_v16, %v1126_v15  ;;  %v3238_v30 = vpack.c.bf16 %v1131_v21, %v1123_v20  ;;  %v1197_v15 = vld [vmem:[#allocation13 + $0xef0] sm:$0xff]  ;;  %v1204_v16 = vld [vmem:[#allocation13 + $0xf28] sm:$0xff] }
 0x418   :  { %3219 = vmatpush1.bf16.msra.mxu0 %v3218_v27  ;;  %v1148_v27 = vld [vmem:[#allocation13 + $0xd68] sm:$0xff]  ;;  %v3382_v21 = vpack.c.bf16 %v1197_v15, %v1189_v13  ;;  %v1862_v13 = vld [vmem:[#allocation16 + $0xa8] sm:$0xff] }
 0x419   :  { %3347 = vmatpush1.bf16.msra.mxu1 %v3346_v28  ;;  %3221 = vmatprep.subr.bf16.mxu0 %v3220_v29  ;;  %v1142_v28 = vld [vmem:[#allocation13 + $0xd38] sm:$0xff]  ;;  %v3240_v32 = vpack.c.bf16 %v1148_v27, %v1140_v26  ;;  %v1205_v26 = vld [vmem:[#allocation13 + $0xf30] sm:$0xff] }
 0x41a   :  { %3349 = vmatprep.subr.bf16.mxu1 %v3348_v33  ;;  %v1150_v29 = vld [vmem:[#allocation13 + $0xd78] sm:$0xff]  ;;  %v1139_v33 = vld [vmem:[#allocation13 + $0xd20] sm:$0xff] }
 0x41b   :  { %v3368_v38 = vpack.c.bf16 %v1150_v29, %v1142_v28  ;;  %v3242_v46 = vpack.c.bf16 %v1147_v34, %v1139_v33  ;;  %v1213_v28 = vld [vmem:[#allocation13 + $0xf70] sm:$0xff]  ;;  %v1220_v29 = vld [vmem:[#allocation13 + $0xfa8] sm:$0xff] }
 0x41c   :  { %3223 = vmatpush1.bf16.msra.mxu0 %v3222_v40  ;;  %v1164_v40 = vld [vmem:[#allocation13 + $0xde8] sm:$0xff]  ;;  %v3386_v34 = vpack.c.bf16 %v1213_v28, %v1205_v26  ;;  %v1870_v26 = vld [vmem:[#allocation16 + $0xe8] sm:$0xff] }
 0x41d   :  { %3351 = vmatpush1.bf16.msra.mxu1 %v3350_v42  ;;  %3225 = vmatprep.subr.bf16.mxu0 %v3224_v45  ;;  %v1158_v42 = vld [vmem:[#allocation13 + $0xdb8] sm:$0xff]  ;;  %v3244_v48 = vpack.c.bf16 %v1164_v40, %v1156_v39  ;;  %v1221_v39 = vld [vmem:[#allocation13 + $0xfb0] sm:$0xff] }
 0x41e   :  { %3353 = vmatprep.subr.bf16.mxu1 %v3352_v49  ;;  %v1166_v45 = vld [vmem:[#allocation13 + $0xdf8] sm:$0xff]  ;;  %v1155_v49 = vld [vmem:[#allocation13 + $0xda0] sm:$0xff] }
 0x41f   :  { %v3372_v53 = vpack.c.bf16 %v1166_v45, %v1158_v42  ;;  %v3246_v60 = vpack.c.bf16 %v1163_v50, %v1155_v49  ;;  %v1229_v42 = vld [vmem:[#allocation13 + $0xff0] sm:$0xff]  ;;  %v1841_v50 = vld [vmem:[#allocation16] sm:$0xff] }
 0x420   :  { %3227 = vmatpush1.bf16.msra.mxu0 %v3226_v57  ;;  %v1180_v57 = vld [vmem:[#allocation13 + $0xe68] sm:$0xff]  ;;  %v1842_v45 = vld [vmem:[#allocation16 + $0x8] sm:$0xff] }
 0x421   :  { %3355 = vmatpush1.bf16.msra.mxu1 %v3354_v58  ;;  %3229 = vmatprep.subr.bf16.mxu0 %v3228_v59  ;;  %v1174_v58 = vld [vmem:[#allocation13 + $0xe38] sm:$0xff]  ;;  %v3248_v62 = vpack.c.bf16 %v1180_v57, %v1172_v56  ;;  %v3394_v56 = vpack.c.bf16 %v1843_v52, %v1841_v50 }
 0x422   :  { %3357 = vmatprep.subr.bf16.mxu1 %v3356_v63  ;;  %v1182_v59 = vld [vmem:[#allocation13 + $0xe78] sm:$0xff]  ;;  %v1171_v63 = vld [vmem:[#allocation13 + $0xe20] sm:$0xff] }
 0x423   :  { %v3376_v2 = vpack.c.bf16 %v1182_v59, %v1174_v58  ;;  %v3250_v9 = vpack.c.bf16 %v1179_v1, %v1171_v63  ;;  %v1845_v58 = vld [vmem:[#allocation16 + $0x20] sm:$0xff]  ;;  %v1847_v59 = vld [vmem:[#allocation16 + $0x30] sm:$0xff] }
 0x424   :  { %3231 = vmatpush1.bf16.msra.mxu0 %v3230_v4  ;;  %v1196_v4 = vld [vmem:[#allocation13 + $0xee8] sm:$0xff] }
 0x425   :  { %3359 = vmatpush1.bf16.msra.mxu1 %v3358_v5  ;;  %3233 = vmatprep.subr.bf16.mxu0 %v3232_v8  ;;  %v1190_v5 = vld [vmem:[#allocation13 + $0xeb8] sm:$0xff]  ;;  %v3252_v10 = vpack.c.bf16 %v1196_v4, %v1188_v3  ;;  %v1849_v1 = vld [vmem:[#allocation16 + $0x40] sm:$0xff] }
 0x426   :  { %3361 = vmatprep.subr.bf16.mxu1 %v3360_v11  ;;  %v1198_v8 = vld [vmem:[#allocation13 + $0xef8] sm:$0xff]  ;;  %v1187_v11 = vld [vmem:[#allocation13 + $0xea0] sm:$0xff]  ;;  %v3402_v3 = vpack.c.bf16 %v1851_v43, %v1849_v1 }
 0x427   :  { %v3380_v14 = vpack.c.bf16 %v1198_v8, %v1190_v5  ;;  %v3254_v20 = vpack.c.bf16 %v1195_v12, %v1187_v11  ;;  %v1853_v5 = vld [vmem:[#allocation16 + $0x60] sm:$0xff]  ;;  %v1855_v8 = vld [vmem:[#allocation16 + $0x70] sm:$0xff] }
 0x428   :  { %3235 = vmatpush1.bf16.msra.mxu0 %v3234_v17  ;;  %v1212_v17 = vld [vmem:[#allocation13 + $0xf68] sm:$0xff]  ;;  %v1859_v12 = vld [vmem:[#allocation16 + $0x90] sm:$0xff] }
 0x429   :  { %3363 = vmatpush1.bf16.msra.mxu1 %v3362_v18  ;;  %3237 = vmatprep.subr.bf16.mxu0 %v3236_v19  ;;  %v1206_v18 = vld [vmem:[#allocation13 + $0xf38] sm:$0xff]  ;;  %v3256_v22 = vpack.c.bf16 %v1212_v17, %v1204_v16  ;;  %v1857_v11 = vld [vmem:[#allocation16 + $0x80] sm:$0xff] }
 0x42a   :  { %3365 = vmatprep.subr.bf16.mxu1 %v3364_v23  ;;  %v1214_v19 = vld [vmem:[#allocation13 + $0xf78] sm:$0xff]  ;;  %v1203_v23 = vld [vmem:[#allocation13 + $0xf20] sm:$0xff]  ;;  %v3410_v15 = vpack.c.bf16 %v1859_v12, %v1857_v11  ;;  %v1861_v17 = vld [vmem:[#allocation16 + $0xa0] sm:$0xff] }
 0x42b   :  { %v3384_v27 = vpack.c.bf16 %v1214_v19, %v1206_v18  ;;  %v3258_v33 = vpack.c.bf16 %v1211_v24, %v1203_v23  ;;  %v1863_v18 = vld [vmem:[#allocation16 + $0xb0] sm:$0xff]  ;;  %v1866_v19 = vld [vmem:[#allocation16 + $0xc8] sm:$0xff]  ;;  %v1865_v23 = vld [vmem:[#allocation16 + $0xc0] sm:$0xff] }
 0x42c   :  { %3239 = vmatpush1.bf16.msra.mxu0 %v3238_v30  ;;  %v1228_v30 = vld [vmem:[#allocation13 + $0xfe8] sm:$0xff]  ;;  %v1867_v24 = vld [vmem:[#allocation16 + $0xd0] sm:$0xff] }
 0x42d   :  { %3367 = vmatpush1.bf16.msra.mxu1 %v3366_v31  ;;  %3241 = vmatprep.subr.bf16.mxu0 %v3240_v32  ;;  %v1222_v31 = vld [vmem:[#allocation13 + $0xfb8] sm:$0xff]  ;;  %v3260_v35 = vpack.c.bf16 %v1228_v30, %v1220_v29  ;;  %v3418_v28 = vpack.c.bf16 %v1867_v24, %v1865_v23  ;;  %v1869_v30 = vld [vmem:[#allocation16 + $0xe0] sm:$0xff] }
 0x42e   :  { %3369 = vmatprep.subr.bf16.mxu1 %v3368_v38  ;;  %v1230_v32 = vld [vmem:[#allocation13 + $0xff8] sm:$0xff]  ;;  %v1219_v38 = vld [vmem:[#allocation13 + $0xfa0] sm:$0xff] }
 0x42f   :  { %v3388_v40 = vpack.c.bf16 %v1230_v32, %v1222_v31  ;;  %v1871_v31 = vld [vmem:[#allocation16 + $0xf0] sm:$0xff]  ;;  %v1874_v32 = vld [vmem:[#allocation16 + $0x108] sm:$0xff] }
 0x430   :  { %3243 = vmatpush1.bf16.msra.mxu0 %v3242_v46  ;;  %v1844_v46 = vld [vmem:[#allocation16 + $0x18] sm:$0xff] }
 0x431   :  { %3371 = vmatpush1.bf16.msra.mxu1 %v3370_v47  ;;  %3245 = vmatprep.subr.bf16.mxu0 %v3244_v48  ;;  %v3262_v47 = vpack.c.bf16 %v1227_v36, %v1219_v38  ;;  %v3390_v48 = vpack.c.bf16 %v1229_v42, %v1221_v39  ;;  %v3392_v49 = vpack.c.bf16 %v1844_v46, %v1842_v45  ;;  %v1873_v38 = vld [vmem:[#allocation16 + $0x100] sm:$0xff]  ;;  %v1875_v36 = vld [vmem:[#allocation16 + $0x110] sm:$0xff]  ;;  %v1878_v39 = vld [vmem:[#allocation16 + $0x128] sm:$0xff] }
 0x432   :  { %3373 = vmatprep.subr.bf16.mxu1 %v3372_v53  ;;  %v1846_v53 = vld [vmem:[#allocation16 + $0x28] sm:$0xff]  ;;  %v3426_v42 = vpack.c.bf16 %v1875_v36, %v1873_v38  ;;  %v1877_v46 = vld [vmem:[#allocation16 + $0x120] sm:$0xff] }
 0x433   :  { %v3396_v57 = vpack.c.bf16 %v1848_v54, %v1846_v53  ;;  %v1881_v53 = vld [vmem:[#allocation16 + $0x140] sm:$0xff]  ;;  %v1883_v54 = vld [vmem:[#allocation16 + $0x150] sm:$0xff] }
 0x434   :  { %3247 = vmatpush1.bf16.msra.mxu0 %v3246_v60  ;;  %v1850_v60 = vld [vmem:[#allocation16 + $0x48] sm:$0xff] }
 0x435   :  { %3375 = vmatpush1.bf16.msra.mxu1 %v3374_v61  ;;  %3249 = vmatprep.subr.bf16.mxu0 %v3248_v62  ;;  %v1852_v61 = vld [vmem:[#allocation16 + $0x58] sm:$0xff]  ;;  %v3398_v62 = vpack.c.bf16 %v1847_v59, %v1845_v58  ;;  %v3434_v58 = vpack.c.bf16 %v1883_v54, %v1881_v53  ;;  %v1913_v53 = vld [vmem:[#allocation16 + $0x240] sm:$0xff]  ;;  %v1915_v54 = vld [vmem:[#allocation16 + $0x250] sm:$0xff] }
 0x436   :  { %3377 = vmatprep.subr.bf16.mxu1 %v3376_v2  ;;  %v3400_v63 = vpack.c.bf16 %v1852_v61, %v1850_v60  ;;  %v1854_v2 = vld [vmem:[#allocation16 + $0x68] sm:$0xff]  ;;  %v1885_v60 = vld [vmem:[#allocation16 + $0x160] sm:$0xff]  ;;  %v1887_v61 = vld [vmem:[#allocation16 + $0x170] sm:$0xff] }
 0x437   :  { %v3404_v4 = vpack.c.bf16 %v1856_v7, %v1854_v2  ;;  %v3438_v1 = vpack.c.bf16 %v1887_v61, %v1885_v60  ;;  %v1889_v2 = vld [vmem:[#allocation16 + $0x180] sm:$0xff]  ;;  %v1891_v7 = vld [vmem:[#allocation16 + $0x190] sm:$0xff] }
 0x438   :  { %3251 = vmatpush1.bf16.msra.mxu0 %v3250_v9  ;;  %v1858_v9 = vld [vmem:[#allocation16 + $0x88] sm:$0xff]  ;;  %v1917_v60 = vld [vmem:[#allocation16 + $0x260] sm:$0xff]  ;;  %v1919_v61 = vld [vmem:[#allocation16 + $0x270] sm:$0xff] }
 0x439   :  { %3379 = vmatpush1.bf16.msra.mxu1 %v3378_v6  ;;  %3253 = vmatprep.subr.bf16.mxu0 %v3252_v10  ;;  %v1860_v6 = vld [vmem:[#allocation16 + $0x98] sm:$0xff]  ;;  %v3406_v10 = vpack.c.bf16 %v1855_v8, %v1853_v5  ;;  %v3442_v5 = vpack.c.bf16 %v1891_v7, %v1889_v2  ;;  %v1921_v2 = vld [vmem:[#allocation16 + $0x280] sm:$0xff]  ;;  %v1923_v7 = vld [vmem:[#allocation16 + $0x290] sm:$0xff] }
 0x43a   :  { %3381 = vmatprep.subr.bf16.mxu1 %v3380_v14  ;;  %v1864_v14 = vld [vmem:[#allocation16 + $0xb8] sm:$0xff] }
 0x43b   :  { %v3412_v16 = vpack.c.bf16 %v1864_v14, %v1862_v13  ;;  %v1897_v13 = vld [vmem:[#allocation16 + $0x1c0] sm:$0xff]  ;;  %v1899_v14 = vld [vmem:[#allocation16 + $0x1d0] sm:$0xff] }
 0x43c   :  { %3255 = vmatpush1.bf16.msra.mxu0 %v3254_v20  ;;  %v1868_v20 = vld [vmem:[#allocation16 + $0xd8] sm:$0xff] }
 0x43d   :  { %3383 = vmatpush1.bf16.msra.mxu1 %v3382_v21  ;;  %3257 = vmatprep.subr.bf16.mxu0 %v3256_v22  ;;  %v3414_v21 = vpack.c.bf16 %v1863_v18, %v1861_v17  ;;  %v3416_v22 = vpack.c.bf16 %v1868_v20, %v1866_v19  ;;  %v3450_v17 = vpack.c.bf16 %v1899_v14, %v1897_v13  ;;  %v1901_v19 = vld [vmem:[#allocation16 + $0x1e0] sm:$0xff]  ;;  %v1903_v20 = vld [vmem:[#allocation16 + $0x1f0] sm:$0xff] }
 0x43e   :  { %3385 = vmatprep.subr.bf16.mxu1 %v3384_v27  ;;  %v1872_v27 = vld [vmem:[#allocation16 + $0xf8] sm:$0xff]  ;;  %v3454_v23 = vpack.c.bf16 %v1903_v20, %v1901_v19  ;;  %v1929_v13 = vld [vmem:[#allocation16 + $0x2c0] sm:$0xff]  ;;  %v1931_v14 = vld [vmem:[#allocation16 + $0x2d0] sm:$0xff] }
 0x43f   :  { %v3420_v29 = vpack.c.bf16 %v1872_v27, %v1870_v26  ;;  %v4455_v26 = vld [vmem:[#allocation14] sm:$0xff]  ;;  %v1933_v19 = vld [vmem:[#allocation16 + $0x2e0] sm:$0xff]  ;;  %v1935_v20 = vld [vmem:[#allocation16 + $0x2f0] sm:$0xff] }
 0x440   :  { %3259 = vmatpush1.bf16.msra.mxu0 %v3258_v33  ;;  %v1876_v33 = vld [vmem:[#allocation16 + $0x118] sm:$0xff]  ;;  %v1240_v27 = vrot.slane %v4455_v26, %v4406_v51 }
 0x441   :  { %3387 = vmatpush1.bf16.msra.mxu1 %v3386_v34  ;;  %3261 = vmatprep.subr.bf16.mxu0 %v3260_v35  ;;  %v3422_v34 = vpack.c.bf16 %v1871_v31, %v1869_v30  ;;  %v3424_v35 = vpack.c.bf16 %v1876_v33, %v1874_v32  ;;  %v1907_v30 = vld [vmem:[#allocation16 + $0x210] sm:$0xff]  ;;  %v1248_v33 = vrot.slane %v4455_v26, %v571_v37 }
 0x442   :  { %3389 = vmatprep.subr.bf16.mxu1 %v3388_v40  ;;  %v1880_v40 = vld [vmem:[#allocation16 + $0x138] sm:$0xff] }
 0x443   :  { %v3428_v45 = vpack.c.bf16 %v1880_v40, %v1878_v39 }
 0x444   :  { %3263 = vmatpush1.bf16.msra.mxu0 %v3262_v47  ;;  %v1879_v47 = vld [vmem:[#allocation16 + $0x130] sm:$0xff] }
 0x445   :  { %3391 = vmatpush1.bf16.msra.mxu1 %v3390_v48  ;;  %3393 = vmatprep.subr.bf16.mxu0 %v3392_v49  ;;  %v1882_v48 = vld [vmem:[#allocation16 + $0x148] sm:$0xff]  ;;  %v1884_v49 = vld [vmem:[#allocation16 + $0x158] sm:$0xff]  ;;  %v3430_v50 = vpack.c.bf16 %v1879_v47, %v1877_v46  ;;  %v1909_v46 = vld [vmem:[#allocation16 + $0x220] sm:$0xff] }
 0x446   :  { %v3432_v52 = vpack.c.bf16 %v1884_v49, %v1882_v48  ;;  %v1911_v47 = vld [vmem:[#allocation16 + $0x230] sm:$0xff]  ;;  %v1914_v49 = vld [vmem:[#allocation16 + $0x248] sm:$0xff] }
 0x447   :  { %1693 = vmatmul.mubr.f32.vlgmr.msra.gmra.mrb[2].mxu0 %v4441_v25 }
 0x448   :  { %1835 = vmatmul.mubr.f32.vlgmr.msra.gmra.mrb[10].mxu1 %v4441_v25  ;;  %3395 = vmatpush1.bf16.msra.mxu0 %v3394_v56  ;;  %v3408_v25 = vpack.c.bf16 %v1860_v6, %v1858_v9  ;;  %v1886_v56 = vld [vmem:[#allocation16 + $0x168] sm:$0xff]  ;;  %v1893_v9 = vld [vmem:[#allocation16 + $0x1a0] sm:$0xff]  ;;  %v1895_v6 = vld [vmem:[#allocation16 + $0x1b0] sm:$0xff] }
 0x449   :  { %3397 = vmatprep.subr.bf16.mxu0 %v3396_v57  ;;  %v1888_v57 = vld [vmem:[#allocation16 + $0x178] sm:$0xff]  ;;  %v3446_v11 = vpack.c.bf16 %v1895_v6, %v1893_v9  ;;  %v1925_v9 = vld [vmem:[#allocation16 + $0x2a0] sm:$0xff]  ;;  %v1927_v6 = vld [vmem:[#allocation16 + $0x2b0] sm:$0xff] }
 0x44a   :  { %v3436_v59 = vpack.c.bf16 %v1888_v57, %v1886_v56  ;;  %v1918_v56 = vld [vmem:[#allocation16 + $0x268] sm:$0xff]  ;;  %v1920_v57 = vld [vmem:[#allocation16 + $0x278] sm:$0xff] }
 0x44c   :  { %3399 = vmatpush1.bf16.msra.mxu0 %v3398_v62  ;;  %v1890_v62 = vld [vmem:[#allocation16 + $0x188] sm:$0xff] }
 0x44d   :  { %3401 = vmatprep.subr.bf16.mxu0 %v3400_v63  ;;  %v1892_v63 = vld [vmem:[#allocation16 + $0x198] sm:$0xff] }
 0x44e   :  { %v3440_v43 = vpack.c.bf16 %v1892_v63, %v1890_v62  ;;  %v1922_v62 = vld [vmem:[#allocation16 + $0x288] sm:$0xff]  ;;  %v1924_v63 = vld [vmem:[#allocation16 + $0x298] sm:$0xff] }
 0x450   :  { %3403 = vmatpush1.bf16.msra.mxu0 %v3402_v3  ;;  %v1894_v3 = vld [vmem:[#allocation16 + $0x1a8] sm:$0xff] }
 0x451   :  { %3405 = vmatprep.subr.bf16.mxu0 %v3404_v4  ;;  %v1896_v4 = vld [vmem:[#allocation16 + $0x1b8] sm:$0xff] }
 0x452   :  { %v3444_v8 = vpack.c.bf16 %v1896_v4, %v1894_v3  ;;  %v1926_v3 = vld [vmem:[#allocation16 + $0x2a8] sm:$0xff]  ;;  %v1928_v4 = vld [vmem:[#allocation16 + $0x2b8] sm:$0xff] }
 0x454   :  { %3407 = vmatpush1.bf16.msra.mxu0 %v3406_v10  ;;  %v1898_v10 = vld [vmem:[#allocation16 + $0x1c8] sm:$0xff] }
 0x455   :  { %3409 = vmatprep.subr.bf16.mxu0 %v3408_v25  ;;  %v1900_v25 = vld [vmem:[#allocation16 + $0x1d8] sm:$0xff] }
 0x456   :  { %v3448_v12 = vpack.c.bf16 %v1900_v25, %v1898_v10  ;;  %v1930_v10 = vld [vmem:[#allocation16 + $0x2c8] sm:$0xff]  ;;  %v1932_v25 = vld [vmem:[#allocation16 + $0x2d8] sm:$0xff] }
 0x458   :  { %3411 = vmatpush1.bf16.msra.mxu0 %v3410_v15  ;;  %v1902_v15 = vld [vmem:[#allocation16 + $0x1e8] sm:$0xff] }
 0x459   :  { %3413 = vmatprep.subr.bf16.mxu0 %v3412_v16  ;;  %v1904_v16 = vld [vmem:[#allocation16 + $0x1f8] sm:$0xff] }
 0x45a   :  { %v3452_v18 = vpack.c.bf16 %v1904_v16, %v1902_v15  ;;  %v1934_v15 = vld [vmem:[#allocation16 + $0x2e8] sm:$0xff]  ;;  %v1936_v16 = vld [vmem:[#allocation16 + $0x2f8] sm:$0xff] }
 0x45c   :  { %3415 = vmatpush1.bf16.msra.mxu0 %v3414_v21  ;;  %v1906_v21 = vld [vmem:[#allocation16 + $0x208] sm:$0xff] }
 0x45d   :  { %3417 = vmatprep.subr.bf16.mxu0 %v3416_v22  ;;  %v1908_v22 = vld [vmem:[#allocation16 + $0x218] sm:$0xff] }
 0x45e   :  { %v3456_v24 = vpack.c.bf16 %v1908_v22, %v1906_v21  ;;  %v1938_v21 = vld [vmem:[#allocation16 + $0x308] sm:$0xff]  ;;  %v1940_v22 = vld [vmem:[#allocation16 + $0x318] sm:$0xff] }
 0x460   :  { %3419 = vmatpush1.bf16.msra.mxu0 %v3418_v28  ;;  %v1236_v28 = vrot.slane %v4455_v26, %v4409_v55 }
 0x461   :  { %3421 = vmatprep.subr.bf16.mxu0 %v3420_v29  ;;  %v1905_v29 = vld [vmem:[#allocation16 + $0x200] sm:$0xff] }
 0x462   :  { %v3458_v40 = vpack.c.bf16 %v1907_v30, %v1905_v29  ;;  %v1942_v29 = vld [vmem:[#allocation16 + $0x328] sm:$0xff]  ;;  %v1944_v30 = vld [vmem:[#allocation16 + $0x338] sm:$0xff] }
 0x464   :  { %3423 = vmatpush1.bf16.msra.mxu0 %v3422_v34  ;;  %v1910_v34 = vld [vmem:[#allocation16 + $0x228] sm:$0xff] }
 0x465   :  { %3425 = vmatprep.subr.bf16.mxu0 %v3424_v35  ;;  %v1912_v35 = vld [vmem:[#allocation16 + $0x238] sm:$0xff] }
 0x468   :  { %3427 = vmatpush1.bf16.msra.mxu0 %v3426_v42 }
 0x469   :  { %3429 = vmatprep.subr.bf16.mxu0 %v3428_v45  ;;  %v3460_v45 = vpack.c.bf16 %v1912_v35, %v1910_v34  ;;  %v1941_v34 = vld [vmem:[#allocation16 + $0x320] sm:$0xff]  ;;  %v1943_v35 = vld [vmem:[#allocation16 + $0x330] sm:$0xff] }
 0x46c   :  { %3431 = vmatpush1.bf16.msra.mxu0 %v3430_v50  ;;  %v1916_v50 = vld [vmem:[#allocation16 + $0x258] sm:$0xff] }
 0x46d   :  { %3433 = vmatprep.subr.bf16.mxu0 %v3432_v52  ;;  %v3462_v52 = vpack.c.bf16 %v1911_v47, %v1909_v46  ;;  %v3464_v37 = vpack.c.bf16 %v1916_v50, %v1914_v49  ;;  %v1950_v46 = vld [vmem:[#allocation16 + $0x368] sm:$0xff]  ;;  %v1952_v47 = vld [vmem:[#allocation16 + $0x378] sm:$0xff]  ;;  %v1949_v50 = vld [vmem:[#allocation16 + $0x360] sm:$0xff] }
 0x46e   :  { %v3500_v49 = vpack.c.bf16 %v1952_v47, %v1950_v46  ;;  %v2397_v46 = vld [vmem:[#allocation19 + $0x10] sm:$0xff]  ;;  %v2398_v47 = vld [vmem:[#allocation19 + $0x18] sm:$0xff] }
 0x470   :  { %3435 = vmatpush1.bf16.msra.mxu0 %v3434_v58  ;;  %v3466_v58 = vpack.c.bf16 %v1915_v54, %v1913_v53  ;;  %v1956_v53 = vld [vmem:[#allocation16 + $0x398] sm:$0xff] }
 0x471   :  { %3437 = vmatprep.subr.bf16.mxu0 %v3436_v59  ;;  %v3468_v59 = vpack.c.bf16 %v1920_v57, %v1918_v56  ;;  %v1953_v57 = vld [vmem:[#allocation16 + $0x380] sm:$0xff] }
 0x474   :  { %3439 = vmatpush1.bf16.msra.mxu0 %v3438_v1  ;;  %v3470_v1 = vpack.c.bf16 %v1919_v61, %v1917_v60  ;;  %v1960_v60 = vld [vmem:[#allocation16 + $0x3b8] sm:$0xff] }
 0x475   :  { %3441 = vmatprep.subr.bf16.mxu0 %v3440_v43  ;;  %v3472_v43 = vpack.c.bf16 %v1924_v63, %v1922_v62  ;;  %v1957_v63 = vld [vmem:[#allocation16 + $0x3a0] sm:$0xff] }
 0x478   :  { %3443 = vmatpush1.bf16.msra.mxu0 %v3442_v5  ;;  %v3474_v5 = vpack.c.bf16 %v1923_v7, %v1921_v2  ;;  %v1964_v2 = vld [vmem:[#allocation16 + $0x3d8] sm:$0xff] }
 0x479   :  { %3445 = vmatprep.subr.bf16.mxu0 %v3444_v8  ;;  %v3476_v8 = vpack.c.bf16 %v1928_v4, %v1926_v3  ;;  %v1961_v4 = vld [vmem:[#allocation16 + $0x3c0] sm:$0xff] }
 0x47c   :  { %3447 = vmatpush1.bf16.msra.mxu0 %v3446_v11  ;;  %v3478_v11 = vpack.c.bf16 %v1927_v6, %v1925_v9  ;;  %v1968_v9 = vld [vmem:[#allocation16 + $0x3f8] sm:$0xff] }
 0x47d   :  { %3449 = vmatprep.subr.bf16.mxu0 %v3448_v12  ;;  %v3480_v12 = vpack.c.bf16 %v1932_v25, %v1930_v10  ;;  %v1965_v25 = vld [vmem:[#allocation16 + $0x3e0] sm:$0xff] }
 0x480   :  { %3451 = vmatpush1.bf16.msra.mxu0 %v3450_v17  ;;  %v3482_v17 = vpack.c.bf16 %v1931_v14, %v1929_v13  ;;  %v1972_v13 = vld [vmem:[#allocation16 + $0x418] sm:$0xff] }
 0x481   :  { %3453 = vmatprep.subr.bf16.mxu0 %v3452_v18  ;;  %v3484_v18 = vpack.c.bf16 %v1936_v16, %v1934_v15  ;;  %v1244_v15 = vrot.slane %v4455_v26, %v567_v41  ;;  %v2411_v41 = vld [vmem:[#allocation19 + $0x80] sm:$0xff] }
 0x484   :  { %3455 = vmatpush1.bf16.msra.mxu0 %v3454_v23  ;;  %v3486_v23 = vpack.c.bf16 %v1935_v20, %v1933_v19  ;;  %v1974_v19 = vld [vmem:[#allocation16 + $0x428] sm:$0xff]  ;;  %v1976_v20 = vld [vmem:[#allocation16 + $0x438] sm:$0xff] }
 0x485   :  { %3457 = vmatprep.subr.bf16.mxu0 %v3456_v24  ;;  %v3488_v24 = vpack.c.bf16 %v1940_v22, %v1938_v21 }
 0x49a   :  { %v1410_v31 = vpop.f32.mrb[0].mxu0  ;;  %v4461_v32 = vpop.f32.mrb[8].mxu1 }
 0x49b   :  { %v1412_v38 = vpop.f32.mrb[1].mxu0  ;;  %v1554_v36 = vpop.f32.mrb[9].mxu1  ;;  %v3704_v42 = vadd.f32 %v1410_v31, %v1236_v28  ;;  %v1939_v28 = vld [vmem:[#allocation16 + $0x310] sm:$0xff]  ;;  %v3706_v22 = vadd.f32 %v4461_v32, %v1244_v15 }
 0x49c   :  { %v3705_v39 = vadd.f32 %v1412_v38, %v1240_v27  ;;  %v3707_v48 = vadd.f32 %v1554_v36, %v1248_v33  ;;  %v1937_v27 = vld [vmem:[#allocation16 + $0x300] sm:$0xff]  ;;  %v3492_v33 = vpack.c.bf16 %v1944_v30, %v1942_v29  ;;  %v1946_v38 = vld [vmem:[#allocation16 + $0x348] sm:$0xff]  ;;  %v1948_v36 = vld [vmem:[#allocation16 + $0x358] sm:$0xff] }
 0x49d   :  { %v3490_v31 = vpack.c.bf16 %v1939_v28, %v1937_v27  ;;  %v1975_v27 = vld [vmem:[#allocation16 + $0x430] sm:$0xff]  ;;  %v1978_v28 = vld [vmem:[#allocation16 + $0x448] sm:$0xff]  ;;  %v1980_v29 = vld [vmem:[#allocation16 + $0x458] sm:$0xff] }
 0x49e   :  { %2173 = vmatprep.mubr.f32.mxu0 %v3705_v39  ;;  %v3494_v39 = vpack.c.bf16 %v1943_v35, %v1941_v34  ;;  %v1977_v30 = vld [vmem:[#allocation16 + $0x440] sm:$0xff]  ;;  %v3528_v32 = vpack.c.bf16 %v1980_v29, %v1978_v28 }
 0x49f   :  { %2174 = vmatmul.mubr.f32.vlgmr.msra.gmra.mrb[4].mxu0 %v3704_v42  ;;  %v1945_v42 = vld [vmem:[#allocation16 + $0x340] sm:$0xff] }
 0x4a0   :  { %3459 = vmatpush1.bf16.msra.mxu0 %v3458_v40  ;;  %2244 = vmatprep.mubr.f32.mxu0 %v3707_v48  ;;  %v3496_v40 = vpack.c.bf16 %v1948_v36, %v1946_v38  ;;  %v2395_v34 = vld [vmem:[#allocation19] sm:$0xff]  ;;  %v2396_v36 = vld [vmem:[#allocation19 + $0x8] sm:$0xff] }
 0x4a1   :  { %3461 = vmatprep.subr.bf16.mxu0 %v3460_v45  ;;  %v1947_v45 = vld [vmem:[#allocation16 + $0x350] sm:$0xff]  ;;  %v1993_v28 = vld [vmem:[#allocation16 + $0x4c0] sm:$0xff] }
 0x4a2   :  { %v3498_v48 = vpack.c.bf16 %v1947_v45, %v1945_v42  ;;  %v3650_v42 = vpack.c.bf16 %v2396_v36, %v2395_v34  ;;  %v2423_v34 = vld [vmem:[#allocation19 + $0xe0] sm:$0xff]  ;;  %v2000_v36 = vld [vmem:[#allocation16 + $0x4f8] sm:$0xff] }
 0x4a4   :  { %3463 = vmatpush1.bf16.msra.mxu0 %v3462_v52  ;;  %v1951_v52 = vld [vmem:[#allocation16 + $0x370] sm:$0xff] }
 0x4a5   :  { %3465 = vmatprep.subr.bf16.mxu0 %v3464_v37  ;;  %v1954_v37 = vld [vmem:[#allocation16 + $0x388] sm:$0xff]  ;;  %v3502_v54 = vpack.c.bf16 %v1951_v52, %v1949_v50  ;;  %v1984_v50 = vld [vmem:[#allocation16 + $0x478] sm:$0xff] }
 0x4a6   :  { %v3504_v56 = vpack.c.bf16 %v1956_v53, %v1954_v37  ;;  %v2416_v52 = vld [vmem:[#allocation19 + $0xa8] sm:$0xff]  ;;  %v3654_v37 = vpack.c.bf16 %v2398_v47, %v2397_v46 }
 0x4a7   :  { %v1999_v46 = vld [vmem:[#allocation16 + $0x4f0] sm:$0xff]  ;;  %v2002_v47 = vld [vmem:[#allocation16 + $0x508] sm:$0xff] }
 0x4a8   :  { %3467 = vmatpush1.bf16.msra.mxu0 %v3466_v58  ;;  %v1955_v58 = vld [vmem:[#allocation16 + $0x390] sm:$0xff] }
 0x4a9   :  { %3469 = vmatprep.subr.bf16.mxu0 %v3468_v59  ;;  %v1958_v59 = vld [vmem:[#allocation16 + $0x3a8] sm:$0xff]  ;;  %v3506_v61 = vpack.c.bf16 %v1955_v58, %v1953_v57 }
 0x4aa   :  { %v3508_v62 = vpack.c.bf16 %v1960_v60, %v1958_v59  ;;  %v2399_v57 = vld [vmem:[#allocation19 + $0x20] sm:$0xff]  ;;  %v2400_v58 = vld [vmem:[#allocation19 + $0x28] sm:$0xff] }
 0x4ab   :  { %v1983_v60 = vld [vmem:[#allocation16 + $0x470] sm:$0xff] }
 0x4ac   :  { %3471 = vmatpush1.bf16.msra.mxu0 %v3470_v1  ;;  %v1959_v1 = vld [vmem:[#allocation16 + $0x3b0] sm:$0xff] }
 0x4ad   :  { %3473 = vmatprep.subr.bf16.mxu0 %v3472_v43  ;;  %v1962_v43 = vld [vmem:[#allocation16 + $0x3c8] sm:$0xff]  ;;  %v3510_v7 = vpack.c.bf16 %v1959_v1, %v1957_v63  ;;  %v1988_v1 = vld [vmem:[#allocation16 + $0x498] sm:$0xff] }
 0x4ae   :  { %v3512_v3 = vpack.c.bf16 %v1964_v2, %v1962_v43  ;;  %v1986_v63 = vld [vmem:[#allocation16 + $0x488] sm:$0xff]  ;;  %v3658_v43 = vpack.c.bf16 %v2400_v58, %v2399_v57  ;;  %v2005_v58 = vld [vmem:[#allocation16 + $0x520] sm:$0xff] }
 0x4b0   :  { %3475 = vmatpush1.bf16.msra.mxu0 %v3474_v5  ;;  %v1963_v5 = vld [vmem:[#allocation16 + $0x3d0] sm:$0xff] }
 0x4b1   :  { %3477 = vmatprep.subr.bf16.mxu0 %v3476_v8  ;;  %v1966_v8 = vld [vmem:[#allocation16 + $0x3e8] sm:$0xff]  ;;  %v3514_v6 = vpack.c.bf16 %v1963_v5, %v1961_v4  ;;  %v2401_v4 = vld [vmem:[#allocation19 + $0x30] sm:$0xff]  ;;  %v2402_v5 = vld [vmem:[#allocation19 + $0x38] sm:$0xff] }
 0x4b2   :  { %v3516_v10 = vpack.c.bf16 %v1968_v9, %v1966_v8  ;;  %v3536_v8 = vpack.c.bf16 %v1988_v1, %v1986_v63  ;;  %v1987_v9 = vld [vmem:[#allocation16 + $0x490] sm:$0xff]  ;;  %v2009_v1 = vld [vmem:[#allocation16 + $0x540] sm:$0xff] }
 0x4b4   :  { %3479 = vmatpush1.bf16.msra.mxu0 %v3478_v11  ;;  %v1967_v11 = vld [vmem:[#allocation16 + $0x3f0] sm:$0xff] }
 0x4b5   :  { %3481 = vmatprep.subr.bf16.mxu0 %v3480_v12  ;;  %v1970_v12 = vld [vmem:[#allocation16 + $0x408] sm:$0xff]  ;;  %v3518_v14 = vpack.c.bf16 %v1967_v11, %v1965_v25  ;;  %v1992_v11 = vld [vmem:[#allocation16 + $0x4b8] sm:$0xff] }
 0x4b6   :  { %v3520_v16 = vpack.c.bf16 %v1972_v13, %v1970_v12  ;;  %v1990_v25 = vld [vmem:[#allocation16 + $0x4a8] sm:$0xff]  ;;  %v3662_v12 = vpack.c.bf16 %v2402_v5, %v2401_v4  ;;  %v2013_v5 = vld [vmem:[#allocation16 + $0x560] sm:$0xff] }
 0x4b8   :  { %3483 = vmatpush1.bf16.msra.mxu0 %v3482_v17  ;;  %v1969_v17 = vld [vmem:[#allocation16 + $0x400] sm:$0xff] }
 0x4b9   :  { %3485 = vmatprep.subr.bf16.mxu0 %v3484_v18  ;;  %v1971_v18 = vld [vmem:[#allocation16 + $0x410] sm:$0xff] }
 0x4ba   :  { %v3522_v21 = vpack.c.bf16 %v1971_v18, %v1969_v17  ;;  %v2404_v17 = vld [vmem:[#allocation19 + $0x48] sm:$0xff]  ;;  %v3540_v18 = vpack.c.bf16 %v1992_v11, %v1990_v25  ;;  %v2017_v11 = vld [vmem:[#allocation16 + $0x580] sm:$0xff] }
 0x4bc   :  { %3487 = vmatpush1.bf16.msra.mxu0 %v3486_v23  ;;  %v3524_v23 = vpack.c.bf16 %v1976_v20, %v1974_v19  ;;  %v1991_v19 = vld [vmem:[#allocation16 + $0x4b0] sm:$0xff] }
 0x4bd   :  { %3489 = vmatprep.subr.bf16.mxu0 %v3488_v24  ;;  %v1973_v24 = vld [vmem:[#allocation16 + $0x420] sm:$0xff]  ;;  %v2421_v20 = vld [vmem:[#allocation19 + $0xd0] sm:$0xff] }
 0x4be   :  { %v3526_v35 = vpack.c.bf16 %v1975_v27, %v1973_v24 }
 0x4c0   :  { %3491 = vmatpush1.bf16.msra.mxu0 %v3490_v31  ;;  %v1979_v31 = vld [vmem:[#allocation16 + $0x450] sm:$0xff] }
 0x4c1   :  { %3493 = vmatprep.subr.bf16.mxu0 %v3492_v33  ;;  %v2412_v33 = vld [vmem:[#allocation19 + $0x88] sm:$0xff]  ;;  %v3530_v53 = vpack.c.bf16 %v1979_v31, %v1977_v30  ;;  %v2405_v30 = vld [vmem:[#allocation19 + $0x50] sm:$0xff]  ;;  %v2406_v31 = vld [vmem:[#allocation19 + $0x58] sm:$0xff] }
 0x4c2   :  { %v3648_v38 = vpack.c.bf16 %v2412_v33, %v2411_v41  ;;  %v1995_v33 = vld [vmem:[#allocation16 + $0x4d0] sm:$0xff] }
 0x4c4   :  { %3495 = vmatpush1.bf16.msra.mxu0 %v3494_v39  ;;  %v2413_v39 = vld [vmem:[#allocation19 + $0x90] sm:$0xff]  ;;  %3649 = vmatprep.subr.bf16.mxu1 %v3648_v38  ;;  %v1998_v38 = vld [vmem:[#allocation16 + $0x4e8] sm:$0xff] }
 0x4c5   :  { %3497 = vmatprep.subr.bf16.mxu0 %v3496_v40  ;;  %v2414_v40 = vld [vmem:[#allocation19 + $0x98] sm:$0xff]  ;;  %3651 = vmatpush3.bf16.msra.mxu1 %v3650_v42  ;;  %v3548_v42 = vpack.c.bf16 %v2000_v36, %v1998_v38  ;;  %v2034_v38 = vld [vmem:[#allocation16 + $0x608] sm:$0xff] }
 0x4c6   :  { %v3652_v45 = vpack.c.bf16 %v2414_v40, %v2413_v39  ;;  %v3670_v39 = vpack.c.bf16 %v2406_v31, %v2405_v30  ;;  %v3546_v40 = vpack.c.bf16 %v1995_v33, %v1993_v28  ;;  %v2032_v28 = vld [vmem:[#allocation16 + $0x5f8] sm:$0xff]  ;;  %v1255_v30 = vsub.s32 5, %v4403_v44  ;;  %v2029_v33 = vld [vmem:[#allocation16 + $0x5e0] sm:$0xff] }
 0x4c7   :  { %v1251_v31 = vsub.s32 4, %v4403_v44  ;;  %v2036_v36 = vld [vmem:[#allocation16 + $0x618] sm:$0xff] }
 0x4c8   :  { %3499 = vmatpush1.bf16.msra.mxu0 %v3498_v48  ;;  %v2415_v48 = vld [vmem:[#allocation19 + $0xa0] sm:$0xff]  ;;  %3653 = vmatprep.subr.bf16.mxu1 %v3652_v45 }
 0x4c9   :  { %3501 = vmatprep.subr.bf16.mxu0 %v3500_v49  ;;  %v1982_v49 = vld [vmem:[#allocation16 + $0x468] sm:$0xff]  ;;  %3655 = vmatpush3.bf16.msra.mxu1 %v3654_v37  ;;  %v1997_v45 = vld [vmem:[#allocation16 + $0x4e0] sm:$0xff]  ;;  %v2003_v37 = vld [vmem:[#allocation16 + $0x510] sm:$0xff] }
 0x4ca   :  { %v3532_v59 = vpack.c.bf16 %v1984_v50, %v1982_v49  ;;  %v3550_v49 = vpack.c.bf16 %v1999_v46, %v1997_v45  ;;  %v2033_v45 = vld [vmem:[#allocation16 + $0x600] sm:$0xff]  ;;  %v2035_v46 = vld [vmem:[#allocation16 + $0x610] sm:$0xff] }
 0x4cc   :  { %3503 = vmatpush1.bf16.msra.mxu0 %v3502_v54  ;;  %v1981_v54 = vld [vmem:[#allocation16 + $0x460] sm:$0xff] }
 0x4cd   :  { %3505 = vmatprep.subr.bf16.mxu0 %v3504_v56  ;;  %v3656_v56 = vpack.c.bf16 %v2416_v52, %v2415_v48  ;;  %v3534_v2 = vpack.c.bf16 %v1983_v60, %v1981_v54  ;;  %v2004_v48 = vld [vmem:[#allocation16 + $0x518] sm:$0xff]  ;;  %v2001_v52 = vld [vmem:[#allocation16 + $0x500] sm:$0xff]  ;;  %v2010_v60 = vld [vmem:[#allocation16 + $0x548] sm:$0xff] }
 0x4ce   :  { %v3552_v50 = vpack.c.bf16 %v2004_v48, %v2002_v47  ;;  %v2008_v54 = vld [vmem:[#allocation16 + $0x538] sm:$0xff] }
 0x4cf   :  { %3657 = vmatprep.subr.bf16.mxu1 %v3656_v56  ;;  %v3554_v56 = vpack.c.bf16 %v2003_v37, %v2001_v52 }
 0x4d0   :  { %3507 = vmatpush1.bf16.msra.mxu0 %v3506_v61  ;;  %v2417_v61 = vld [vmem:[#allocation19 + $0xb0] sm:$0xff]  ;;  %3659 = vmatpush3.bf16.msra.mxu1 %v3658_v43 }
 0x4d1   :  { %3509 = vmatprep.subr.bf16.mxu0 %v3508_v62  ;;  %v2418_v62 = vld [vmem:[#allocation19 + $0xb8] sm:$0xff]  ;;  %v2011_v43 = vld [vmem:[#allocation16 + $0x550] sm:$0xff] }
 0x4d4   :  { %3511 = vmatpush1.bf16.msra.mxu0 %v3510_v7  ;;  %v1985_v7 = vld [vmem:[#allocation16 + $0x480] sm:$0xff] }
 0x4d5   :  { %3513 = vmatprep.subr.bf16.mxu0 %v3512_v3  ;;  %v3660_v3 = vpack.c.bf16 %v2418_v62, %v2417_v61  ;;  %v3538_v13 = vpack.c.bf16 %v1987_v9, %v1985_v7  ;;  %v2012_v61 = vld [vmem:[#allocation16 + $0x558] sm:$0xff]  ;;  %v2018_v9 = vld [vmem:[#allocation16 + $0x588] sm:$0xff] }
 0x4d6   :  { %v3560_v63 = vpack.c.bf16 %v2012_v61, %v2010_v60  ;;  %v2016_v7 = vld [vmem:[#allocation16 + $0x578] sm:$0xff]  ;;  %v2039_v60 = vld [vmem:[#allocation16 + $0x630] sm:$0xff] }
 0x4d7   :  { %3661 = vmatprep.subr.bf16.mxu1 %v3660_v3  ;;  %v3562_v3 = vpack.c.bf16 %v2011_v43, %v2009_v1 }
 0x4d8   :  { %3515 = vmatpush1.bf16.msra.mxu0 %v3514_v6  ;;  %v2419_v6 = vld [vmem:[#allocation19 + $0xc0] sm:$0xff]  ;;  %3663 = vmatpush3.bf16.msra.mxu1 %v3662_v12  ;;  %v2019_v12 = vld [vmem:[#allocation16 + $0x590] sm:$0xff] }
 0x4d9   :  { %3517 = vmatprep.subr.bf16.mxu0 %v3516_v10  ;;  %v2420_v10 = vld [vmem:[#allocation19 + $0xc8] sm:$0xff] }
 0x4da   :  { %v3664_v15 = vpack.c.bf16 %v2420_v10, %v2419_v6  ;;  %v2020_v6 = vld [vmem:[#allocation16 + $0x598] sm:$0xff] }
 0x4db   :  { %v3568_v25 = vpack.c.bf16 %v2020_v6, %v2018_v9  ;;  %v2045_v9 = vld [vmem:[#allocation16 + $0x660] sm:$0xff]  ;;  %v2047_v6 = vld [vmem:[#allocation16 + $0x670] sm:$0xff] }
 0x4dc   :  { %3519 = vmatpush1.bf16.msra.mxu0 %v3518_v14  ;;  %v1989_v14 = vld [vmem:[#allocation16 + $0x4a0] sm:$0xff]  ;;  %3665 = vmatprep.subr.bf16.mxu1 %v3664_v15  ;;  %v3570_v15 = vpack.c.bf16 %v2019_v12, %v2017_v11  ;;  %v3598_v11 = vpack.c.bf16 %v2047_v6, %v2045_v9 }
 0x4dd   :  { %3521 = vmatprep.subr.bf16.mxu0 %v3520_v16  ;;  %v2403_v16 = vld [vmem:[#allocation19 + $0x40] sm:$0xff]  ;;  %v3542_v27 = vpack.c.bf16 %v1991_v19, %v1989_v14  ;;  %v2024_v14 = vld [vmem:[#allocation16 + $0x5b8] sm:$0xff] }
 0x4de   :  { %v3666_v24 = vpack.c.bf16 %v2404_v17, %v2403_v16  ;;  %v2021_v17 = vld [vmem:[#allocation16 + $0x5a0] sm:$0xff]  ;;  %v2026_v19 = vld [vmem:[#allocation16 + $0x5c8] sm:$0xff] }
 0x4df   :  { %2245 = vmatmul.mubr.f32.vlgmr.msra.gmra.mrb[4].mxu0 %v3706_v22  ;;  %v1994_v22 = vld [vmem:[#allocation16 + $0x4c8] sm:$0xff] }
 0x4e0   :  { %3523 = vmatpush1.bf16.msra.mxu0 %v3522_v21  ;;  %v2422_v21 = vld [vmem:[#allocation19 + $0xd8] sm:$0xff]  ;;  %3667 = vmatpush3.bf16.msra.mxu1 %v3666_v24  ;;  %v2027_v24 = vld [vmem:[#allocation16 + $0x5d0] sm:$0xff] }
 0x4e1   :  { %3525 = vmatprep.subr.bf16.mxu0 %v3524_v23  ;;  %v1996_v23 = vld [vmem:[#allocation16 + $0x4d8] sm:$0xff]  ;;  %v3668_v29 = vpack.c.bf16 %v2422_v21, %v2421_v20 }
 0x4e2   :  { %v3544_v41 = vpack.c.bf16 %v1996_v23, %v1994_v22  ;;  %v2028_v20 = vld [vmem:[#allocation16 + $0x5d8] sm:$0xff]  ;;  %v2025_v23 = vld [vmem:[#allocation16 + $0x5c0] sm:$0xff] }
 0x4e3   :  { %3669 = vmatprep.subr.bf16.mxu1 %v3668_v29  ;;  %v3576_v22 = vpack.c.bf16 %v2028_v20, %v2026_v19  ;;  %v3578_v29 = vpack.c.bf16 %v2027_v24, %v2025_v23  ;;  %v2053_v19 = vld [vmem:[#allocation16 + $0x6a0] sm:$0xff]  ;;  %v2055_v20 = vld [vmem:[#allocation16 + $0x6b0] sm:$0xff] }
 0x4e4   :  { %3527 = vmatpush1.bf16.msra.mxu0 %v3526_v35  ;;  %v2424_v35 = vld [vmem:[#allocation19 + $0xe8] sm:$0xff]  ;;  %3671 = vmatpush3.bf16.msra.mxu1 %v3670_v39  ;;  %v1256_v39 = vrot.slane %v4455_v26, %v1255_v30  ;;  %v3606_v23 = vpack.c.bf16 %v2055_v20, %v2053_v19  ;;  %v2064_v30 = vld [vmem:[#allocation16 + $0x6f8] sm:$0xff]  ;;  %v1259_v20 = vsub.s32 6, %v4403_v44 }
 0x4e5   :  { %3529 = vmatprep.subr.bf16.mxu0 %v3528_v32  ;;  %v3672_v32 = vpack.c.bf16 %v2424_v35, %v2423_v34  ;;  %v2031_v34 = vld [vmem:[#allocation16 + $0x5f0] sm:$0xff]  ;;  %v1263_v35 = vsub.s32 7, %v4403_v44 }
 0x4e7   :  { %3673 = vmatprep.subr.bf16.mxu1 %v3672_v32  ;;  %v1252_v32 = vrot.slane %v4455_v26, %v1251_v31  ;;  %v1264_v48 = vrot.slane %v4455_v26, %v1263_v35  ;;  %v2066_v35 = vld [vmem:[#allocation16 + $0x708] sm:$0xff] }
 0x4e8   :  { %3531 = vmatpush1.bf16.msra.mxu0 %v3530_v53  ;;  %v2006_v53 = vld [vmem:[#allocation16 + $0x528] sm:$0xff] }
 0x4e9   :  { %3533 = vmatprep.subr.bf16.mxu0 %v3532_v59  ;;  %v3556_v57 = vpack.c.bf16 %v2008_v54, %v2006_v53  ;;  %v2007_v59 = vld [vmem:[#allocation16 + $0x530] sm:$0xff] }
 0x4ea   :  { %v3558_v62 = vpack.c.bf16 %v2007_v59, %v2005_v58  ;;  %v2037_v59 = vld [vmem:[#allocation16 + $0x620] sm:$0xff] }
 0x4eb   :  { %v3590_v1 = vpack.c.bf16 %v2039_v60, %v2037_v59  ;;  %v2080_v59 = vld [vmem:[#allocation16 + $0x778] sm:$0xff] }
 0x4ec   :  { %3535 = vmatpush1.bf16.msra.mxu0 %v3534_v2  ;;  %v2014_v2 = vld [vmem:[#allocation16 + $0x568] sm:$0xff] }
 0x4ed   :  { %3537 = vmatprep.subr.bf16.mxu0 %v3536_v8  ;;  %v3564_v4 = vpack.c.bf16 %v2016_v7, %v2014_v2  ;;  %v2015_v8 = vld [vmem:[#allocation16 + $0x570] sm:$0xff]  ;;  %v2041_v2 = vld [vmem:[#allocation16 + $0x640] sm:$0xff] }
 0x4ee   :  { %v3566_v10 = vpack.c.bf16 %v2015_v8, %v2013_v5  ;;  %v2043_v7 = vld [vmem:[#allocation16 + $0x650] sm:$0xff] }
 0x4ef   :  { %v3594_v5 = vpack.c.bf16 %v2043_v7, %v2041_v2 }
 0x4f0   :  { %3539 = vmatpush1.bf16.msra.mxu0 %v3538_v13  ;;  %v2022_v13 = vld [vmem:[#allocation16 + $0x5a8] sm:$0xff] }
 0x4f1   :  { %3541 = vmatprep.subr.bf16.mxu0 %v3540_v18  ;;  %v3572_v16 = vpack.c.bf16 %v2024_v14, %v2022_v13  ;;  %v2023_v18 = vld [vmem:[#allocation16 + $0x5b0] sm:$0xff]  ;;  %v2049_v13 = vld [vmem:[#allocation16 + $0x680] sm:$0xff] }
 0x4f2   :  { %v3574_v21 = vpack.c.bf16 %v2023_v18, %v2021_v17  ;;  %v2051_v14 = vld [vmem:[#allocation16 + $0x690] sm:$0xff] }
 0x4f3   :  { %v3602_v17 = vpack.c.bf16 %v2051_v14, %v2049_v13 }
 0x4f4   :  { %3543 = vmatpush1.bf16.msra.mxu0 %v3542_v27  ;;  %v2030_v27 = vld [vmem:[#allocation16 + $0x5e8] sm:$0xff] }
 0x4f5   :  { %3545 = vmatprep.subr.bf16.mxu0 %v3544_v41  ;;  %v3580_v41 = vpack.c.bf16 %v2032_v28, %v2030_v27  ;;  %v2057_v27 = vld [vmem:[#allocation16 + $0x6c0] sm:$0xff]  ;;  %v2059_v28 = vld [vmem:[#allocation16 + $0x6d0] sm:$0xff] }
 0x4f6   :  { %v3610_v31 = vpack.c.bf16 %v2059_v28, %v2057_v27  ;;  %v1260_v27 = vrot.slane %v4455_v26, %v1259_v20  ;;  %v2097_v26 = vld [vmem:[#allocation17] sm:$0x3] }
 0x4f8   :  { %3547 = vmatpush1.bf16.msra.mxu0 %v3546_v40  ;;  %v3582_v40 = vpack.c.bf16 %v2031_v34, %v2029_v33  ;;  %v2061_v33 = vld [vmem:[#allocation16 + $0x6e0] sm:$0xff]  ;;  %v2063_v34 = vld [vmem:[#allocation16 + $0x6f0] sm:$0xff] }
 0x4f9   :  { %3549 = vmatprep.subr.bf16.mxu0 %v3548_v42  ;;  %v3584_v42 = vpack.c.bf16 %v2036_v36, %v2034_v38  ;;  %v2068_v38 = vld [vmem:[#allocation16 + $0x718] sm:$0xff]  ;;  %v3614_v36 = vpack.c.bf16 %v2063_v34, %v2061_v33 }
 0x4fa   :  { %v2426_v33 = vld [vmem:[#allocation19 + $0xf8] sm:$0xff]  ;;  %v2409_v34 = vld [vmem:[#allocation19 + $0x70] sm:$0xff] }
 0x4fc   :  { %3551 = vmatpush1.bf16.msra.mxu0 %v3550_v49  ;;  %v2038_v49 = vld [vmem:[#allocation16 + $0x628] sm:$0xff] }
 0x4fd   :  { %3553 = vmatprep.subr.bf16.mxu0 %v3552_v50  ;;  %v2040_v50 = vld [vmem:[#allocation16 + $0x638] sm:$0xff] }
 0x4fe   :  { %v3588_v58 = vpack.c.bf16 %v2040_v50, %v2038_v49  ;;  %v2071_v49 = vld [vmem:[#allocation16 + $0x730] sm:$0xff]  ;;  %v2074_v50 = vld [vmem:[#allocation16 + $0x748] sm:$0xff] }
 0x500   :  { %3555 = vmatpush1.bf16.msra.mxu0 %v3554_v56  ;;  %v3586_v56 = vpack.c.bf16 %v2035_v46, %v2033_v45  ;;  %v2072_v45 = vld [vmem:[#allocation16 + $0x738] sm:$0xff] }
 0x501   :  { %3557 = vmatprep.subr.bf16.mxu0 %v3556_v57 }
 0x504   :  { %3559 = vmatpush1.bf16.msra.mxu0 %v3558_v62  ;;  %v2042_v62 = vld [vmem:[#allocation16 + $0x648] sm:$0xff] }
 0x505   :  { %3561 = vmatprep.subr.bf16.mxu0 %v3560_v63  ;;  %v2044_v63 = vld [vmem:[#allocation16 + $0x658] sm:$0xff] }
 0x506   :  { %v3592_v43 = vpack.c.bf16 %v2044_v63, %v2042_v62  ;;  %v2077_v62 = vld [vmem:[#allocation16 + $0x760] sm:$0xff]  ;;  %v2079_v63 = vld [vmem:[#allocation16 + $0x770] sm:$0xff] }
 0x507   :  { %v3630_v2 = vpack.c.bf16 %v2079_v63, %v2077_v62  ;;  %v2515_v63 = vld [vmem:[#allocation22 + $0x50] sm:$0xff] }
 0x508   :  { %3563 = vmatpush1.bf16.msra.mxu0 %v3562_v3  ;;  %v2046_v3 = vld [vmem:[#allocation16 + $0x668] sm:$0xff] }
 0x509   :  { %3565 = vmatprep.subr.bf16.mxu0 %v3564_v4  ;;  %v2048_v4 = vld [vmem:[#allocation16 + $0x678] sm:$0xff] }
 0x50a   :  { %v3596_v8 = vpack.c.bf16 %v2048_v4, %v2046_v3  ;;  %v2081_v3 = vld [vmem:[#allocation16 + $0x780] sm:$0xff]  ;;  %v2083_v4 = vld [vmem:[#allocation16 + $0x790] sm:$0xff] }
 0x50b   :  { %v3634_v9 = vpack.c.bf16 %v2083_v4, %v2081_v3  ;;  %v2519_v3 = vld [vmem:[#allocation22 + $0x70] sm:$0xff]  ;;  %v2520_v4 = vld [vmem:[#allocation22 + $0x78] sm:$0xff] }
 0x50c   :  { %3567 = vmatpush1.bf16.msra.mxu0 %v3566_v10  ;;  %v2050_v10 = vld [vmem:[#allocation16 + $0x688] sm:$0xff] }
 0x50d   :  { %3569 = vmatprep.subr.bf16.mxu0 %v3568_v25  ;;  %v2052_v25 = vld [vmem:[#allocation16 + $0x698] sm:$0xff] }
 0x50e   :  { %v3600_v12 = vpack.c.bf16 %v2052_v25, %v2050_v10  ;;  %v2085_v10 = vld [vmem:[#allocation16 + $0x7a0] sm:$0xff]  ;;  %v2087_v25 = vld [vmem:[#allocation16 + $0x7b0] sm:$0xff] }
 0x50f   :  { %v3638_v13 = vpack.c.bf16 %v2087_v25, %v2085_v10 }
 0x510   :  { %3571 = vmatpush1.bf16.msra.mxu0 %v3570_v15  ;;  %v2054_v15 = vld [vmem:[#allocation16 + $0x6a8] sm:$0xff] }
 0x511   :  { %3573 = vmatprep.subr.bf16.mxu0 %v3572_v16  ;;  %v2056_v16 = vld [vmem:[#allocation16 + $0x6b8] sm:$0xff] }
 0x512   :  { %v3604_v18 = vpack.c.bf16 %v2056_v16, %v2054_v15  ;;  %v2089_v15 = vld [vmem:[#allocation16 + $0x7c0] sm:$0xff]  ;;  %v2091_v16 = vld [vmem:[#allocation16 + $0x7d0] sm:$0xff] }
 0x513   :  { %v3642_v19 = vpack.c.bf16 %v2091_v16, %v2089_v15 }
 0x514   :  { %3575 = vmatpush1.bf16.msra.mxu0 %v3574_v21  ;;  %v2058_v21 = vld [vmem:[#allocation16 + $0x6c8] sm:$0xff] }
 0x515   :  { %3577 = vmatprep.subr.bf16.mxu0 %v3576_v22  ;;  %v2060_v22 = vld [vmem:[#allocation16 + $0x6d8] sm:$0xff] }
 0x516   :  { %v3608_v24 = vpack.c.bf16 %v2060_v22, %v2058_v21  ;;  %v2093_v22 = vld [vmem:[#allocation16 + $0x7e0] sm:$0xff] }
 0x518   :  { %3579 = vmatpush1.bf16.msra.mxu0 %v3578_v29  ;;  %v2062_v29 = vld [vmem:[#allocation16 + $0x6e8] sm:$0xff] }
 0x519   :  { %3581 = vmatprep.subr.bf16.mxu0 %v3580_v41  ;;  %v3612_v41 = vpack.c.bf16 %v2064_v30, %v2062_v29  ;;  %v2407_v29 = vld [vmem:[#allocation19 + $0x60] sm:$0xff]  ;;  %v2408_v30 = vld [vmem:[#allocation19 + $0x68] sm:$0xff] }
 0x51a   :  { %v1694_v47 = vpop.f32.mrb[2].mxu0 }
 0x51b   :  { %v4476_v52 = vpop.f32.mrb[10].mxu1  ;;  %v1696_v37 = vpop.f32.mrb[3].mxu0  ;;  %v3708_v57 = vadd.f32 %v1694_v47, %v1252_v32  ;;  %v2067_v32 = vld [vmem:[#allocation16 + $0x710] sm:$0xff] }
 0x51c   :  { %v3709_v53 = vadd.f32 %v1696_v37, %v1256_v39  ;;  %v1838_v54 = vpop.f32.mrb[11].mxu1  ;;  %3583 = vmatpush1.bf16.msra.mxu0 %v3582_v40  ;;  %v3616_v39 = vpack.c.bf16 %v2068_v38, %v2066_v35  ;;  %v2065_v40 = vld [vmem:[#allocation16 + $0x700] sm:$0xff]  ;;  %v2076_v37 = vld [vmem:[#allocation16 + $0x758] sm:$0xff]  ;;  %v3710_v28 = vadd.f32 %v4476_v52, %v1260_v27  ;;  %v2106_v52 = vrot.slane %v2097_v26, %v4406_v51 }
 0x51d   :  { %3585 = vmatprep.subr.bf16.mxu0 %v3584_v42  ;;  %v3711_v61 = vadd.f32 %v1838_v54, %v1264_v48  ;;  %v2070_v42 = vld [vmem:[#allocation16 + $0x728] sm:$0xff]  ;;  %v3618_v46 = vpack.c.bf16 %v2067_v32, %v2065_v40  ;;  %v2069_v48 = vld [vmem:[#allocation16 + $0x720] sm:$0xff]  ;;  %v3624_v54 = vpack.c.bf16 %v2076_v37, %v2074_v50  ;;  %v2507_v37 = vld [vmem:[#allocation22 + $0x10] sm:$0xff] }
 0x51e   :  { %2315 = vmatprep.mubr.f32.mxu0 %v3709_v53  ;;  %v3620_v47 = vpack.c.bf16 %v2072_v45, %v2070_v42  ;;  %v3622_v53 = vpack.c.bf16 %v2071_v49, %v2069_v48  ;;  %v2410_v35 = vld [vmem:[#allocation19 + $0x78] sm:$0xff]  ;;  %v2505_v45 = vld [vmem:[#allocation22] sm:$0xff] }
 0x51f   :  { %2316 = vmatmul.mubr.f32.vlgmr.msra.gmra.mrb[4].mxu0 %v3708_v57  ;;  %v2075_v57 = vld [vmem:[#allocation16 + $0x750] sm:$0xff]  ;;  %v3678_v38 = vpack.c.bf16 %v2410_v35, %v2409_v34  ;;  %v2509_v51 = vld [vmem:[#allocation22 + $0x20] sm:$0xff] }
 0x520   :  { %3587 = vmatpush1.bf16.msra.mxu0 %v3586_v56  ;;  %2386 = vmatprep.mubr.f32.mxu0 %v3711_v61  ;;  %v2073_v56 = vld [vmem:[#allocation16 + $0x740] sm:$0xff] }
 0x521   :  { %3589 = vmatprep.subr.bf16.mxu0 %v3588_v58  ;;  %v2078_v58 = vld [vmem:[#allocation16 + $0x768] sm:$0xff]  ;;  %v3626_v60 = vpack.c.bf16 %v2075_v57, %v2073_v56  ;;  %v2511_v57 = vld [vmem:[#allocation22 + $0x30] sm:$0xff] }
 0x522   :  { %v3628_v61 = vpack.c.bf16 %v2080_v59, %v2078_v58  ;;  %v2512_v58 = vld [vmem:[#allocation22 + $0x38] sm:$0xff] }
 0x523   :  { %v3690_v59 = vpack.c.bf16 %v2512_v58, %v2511_v57 }
 0x524   :  { %3591 = vmatpush1.bf16.msra.mxu0 %v3590_v1  ;;  %v2082_v1 = vld [vmem:[#allocation16 + $0x788] sm:$0xff] }
 0x525   :  { %3593 = vmatprep.subr.bf16.mxu0 %v3592_v43  ;;  %v2084_v43 = vld [vmem:[#allocation16 + $0x798] sm:$0xff] }
 0x526   :  { %v3632_v7 = vpack.c.bf16 %v2084_v43, %v2082_v1  ;;  %v2516_v1 = vld [vmem:[#allocation22 + $0x58] sm:$0xff]  ;;  %v2517_v43 = vld [vmem:[#allocation22 + $0x60] sm:$0xff] }
 0x528   :  { %3595 = vmatpush1.bf16.msra.mxu0 %v3594_v5  ;;  %v2086_v5 = vld [vmem:[#allocation16 + $0x7a8] sm:$0xff] }
 0x529   :  { %3597 = vmatprep.subr.bf16.mxu0 %v3596_v8  ;;  %v2088_v8 = vld [vmem:[#allocation16 + $0x7b8] sm:$0xff] }
 0x52a   :  { %v3636_v6 = vpack.c.bf16 %v2088_v8, %v2086_v5  ;;  %v3702_v5 = vpack.c.bf16 %v2520_v4, %v2519_v3 }
 0x52c   :  { %3599 = vmatpush1.bf16.msra.mxu0 %v3598_v11  ;;  %v2090_v11 = vld [vmem:[#allocation16 + $0x7c8] sm:$0xff] }
 0x52d   :  { %3601 = vmatprep.subr.bf16.mxu0 %v3600_v12  ;;  %v2092_v12 = vld [vmem:[#allocation16 + $0x7d8] sm:$0xff] }
 0x52e   :  { %v3640_v14 = vpack.c.bf16 %v2092_v12, %v2090_v11  ;;  %v2625_v12 = vld [vmem:[#allocation23] ss:$0 sm:$0xff] }
 0x530   :  { %3603 = vmatpush1.bf16.msra.mxu0 %v3602_v17  ;;  %v2094_v17 = vld [vmem:[#allocation16 + $0x7e8] sm:$0xff] }
 0x531   :  { %3605 = vmatprep.subr.bf16.mxu0 %v3604_v18  ;;  %v2096_v18 = vld [vmem:[#allocation16 + $0x7f8] sm:$0xff] }
 0x532   :  { %v3644_v21 = vpack.c.bf16 %v2096_v18, %v2094_v17 }
 0x534   :  { %3607 = vmatpush1.bf16.msra.mxu0 %v3606_v23  ;;  %v2095_v23 = vld [vmem:[#allocation16 + $0x7f0] sm:$0xff] }
 0x535   :  { %3609 = vmatprep.subr.bf16.mxu0 %v3608_v24  ;;  %v3646_v24 = vpack.c.bf16 %v2095_v23, %v2093_v22 }
 0x538   :  { %3611 = vmatpush1.bf16.msra.mxu0 %v3610_v31  ;;  %v3674_v31 = vpack.c.bf16 %v2408_v30, %v2407_v29 }
 0x539   :  { %3613 = vmatprep.subr.bf16.mxu0 %v3612_v41  ;;  %v2425_v41 = vld [vmem:[#allocation19 + $0xf0] sm:$0xff] }
 0x53a   :  { %3675 = vmatpush3.bf16.msra.mxu1 %v3674_v31  ;;  %v3676_v44 = vpack.c.bf16 %v2426_v33, %v2425_v41 }
 0x53c   :  { %3615 = vmatpush1.bf16.msra.mxu0 %v3614_v36  ;;  %3677 = vmatprep.subr.bf16.mxu1 %v3676_v44  ;;  %v4126_v36 = vmov 0.0|0.0  }
 0x53d   :  { %3617 = vmatprep.subr.bf16.mxu0 %v3616_v39  ;;  %v2102_v39 = vrot.slane %v2097_v26, %v4409_v55  ;;  %v2510_v55 = vld [vmem:[#allocation22 + $0x28] sm:$0xff] }
 0x53e   :  { %3679 = vmatpush3.bf16.msra.mxu1 %v3678_v38  ;;  %v3687_v56 = vpack.c.bf16 %v2510_v55, %v2509_v51 }
 0x53f   :  { %3680 = vmatprep.subr.bf16.mxu1 %v4126_v36 }
 0x540   :  { %3619 = vmatpush1.bf16.msra.mxu0 %v3618_v46  ;;  %v2506_v46 = vld [vmem:[#allocation22 + $0x8] sm:$0xff] }
 0x541   :  { %3621 = vmatprep.subr.bf16.mxu0 %v3620_v47  ;;  %v3681_v49 = vpack.c.bf16 %v2506_v46, %v2505_v45 }
 0x544   :  { %3623 = vmatpush1.bf16.msra.mxu0 %v3622_v53  ;;  %v2508_v53 = vld [vmem:[#allocation22 + $0x18] sm:$0xff] }
 0x545   :  { %3625 = vmatprep.subr.bf16.mxu0 %v3624_v54  ;;  %v3684_v54 = vpack.c.bf16 %v2508_v53, %v2507_v37 }
 0x548   :  { %3627 = vmatpush1.bf16.msra.mxu0 %v3626_v60  ;;  %v2513_v60 = vld [vmem:[#allocation22 + $0x40] sm:$0xff] }
 0x549   :  { %3629 = vmatprep.subr.bf16.mxu0 %v3628_v61  ;;  %v2514_v61 = vld [vmem:[#allocation22 + $0x48] sm:$0xff] }
 0x54a   :  { %v3693_v62 = vpack.c.bf16 %v2514_v61, %v2513_v60 }
 0x54c   :  { %3631 = vmatpush1.bf16.msra.mxu0 %v3630_v2  ;;  %v2518_v2 = vld [vmem:[#allocation22 + $0x68] sm:$0xff] }
 0x54d   :  { %3633 = vmatprep.subr.bf16.mxu0 %v3632_v7  ;;  %v3699_v7 = vpack.c.bf16 %v2518_v2, %v2517_v43 }
 0x550   :  { %3635 = vmatpush1.bf16.msra.mxu0 %v3634_v9  ;;  %v2624_v9 = vld [vmem:[#allocation20] ss:$0 sm:$0xff] }
 0x551   :  { %3637 = vmatprep.subr.bf16.mxu0 %v3636_v6 }
 0x554   :  { %3639 = vmatpush1.bf16.msra.mxu0 %v3638_v13 }
 0x555   :  { %3641 = vmatprep.subr.bf16.mxu0 %v3640_v14 }
 0x558   :  { %3643 = vmatpush1.bf16.msra.mxu0 %v3642_v19 }
 0x559   :  { %3645 = vmatprep.subr.bf16.mxu0 %v3644_v21 }
 0x55c   :  { %3647 = vmatpush1.bf16.msra.mxu0 %v3646_v24 }
 0x55f   :  { %2387 = vmatmul.mubr.f32.vlgmr.msra.gmra.mrb[4].mxu0 %v3710_v28 }
 0x632   :  { %v2388_v40 = vpop.f32.mrb[4].mxu0 }
 0x633   :  { %v3712_v32 = vadd.f32 %v2388_v40, %v2102_v39  ;;  %v2390_v42 = vpop.f32.mrb[5].mxu0 }
 0x634   :  { %v3713_v47 = vadd.f32 %v2390_v42, %v2106_v52 }
 0x635   :  { %v2393_v50 = vmax.f32 %v3712_v32, 0.0 }
 0x636   :  { %v2394_v48 = vmax.f32 %v3713_v47, 0.0 }
 0x638   :  { %2498 = vmatprep.mubr.f32.mxu1 %v2394_v48 }
 0x639   :  { %2499 = vmatmul.mubr.f32.vlgmr.msra.gmra.mrb[12].mxu1 %v2393_v50 }
 0x63a   :  { %3682 = vmatpush3.bf16.msra.mxu1 %v3681_v49  ;;  %2717 = vmatprep.mubr.msk.f32.mxu1 %vm4125_vm0, %v4124_v0  ;;  %v3696_v0 = vpack.c.bf16 %v2516_v1, %v2515_v63 }
 0x63b   :  { %3683 = vmatprep.subr.bf16.mxu1 %v4126_v36 }
 0x63e   :  { %3685 = vmatpush3.bf16.msra.mxu1 %v3684_v54 }
 0x63f   :  { %3686 = vmatprep.subr.bf16.mxu1 %v4126_v36 }
 0x642   :  { %3688 = vmatpush3.bf16.msra.mxu1 %v3687_v56 }
 0x643   :  { %3689 = vmatprep.subr.bf16.mxu1 %v4126_v36 }
 0x646   :  { %3691 = vmatpush3.bf16.msra.mxu1 %v3690_v59 }
 0x647   :  { %3692 = vmatprep.subr.bf16.mxu1 %v4126_v36 }
 0x64a   :  { %3694 = vmatpush3.bf16.msra.mxu1 %v3693_v62 }
 0x64b   :  { %3695 = vmatprep.subr.bf16.mxu1 %v4126_v36 }
 0x64e   :  { %3697 = vmatpush3.bf16.msra.mxu1 %v3696_v0 }
 0x64f   :  { %3698 = vmatprep.subr.bf16.mxu1 %v4126_v36 }
 0x652   :  { %3700 = vmatpush3.bf16.msra.mxu1 %v3699_v7 }
 0x653   :  { %3701 = vmatprep.subr.bf16.mxu1 %v4126_v36 }
 0x656   :  { %3703 = vmatpush3.bf16.msra.mxu1 %v3702_v5 }
 0x70c   :  { %v2660_v8 = vpop.f32.mrb[12].mxu1 }
 0x70d   :  { %v2661_v6 = vpop.f32.mrb[13].mxu1 }
 0x70e   :  { %v2662_v10 = vadd.f32 %v2661_v6, %v2660_v8 }
 0x710   :  { %v2501_v25 = vadd.f32 %v2662_v10, %v2624_v9 }
 0x712   :  { %v2504_v11 = vmax.f32 %v2501_v25, 0.0 }
 0x714   :  { %2718 = vmatmul.mubr.f32.vlgmr.msra.gmra.mrb[14].mxu1 %v2504_v11 }
 0x7e7   :  { %v2594_v13 = vpop.f32.mrb[14].mxu1 }
 0x7e8   :  { %v2595_v14 = vadd.f32 %v2625_v12, %v2594_v13  ;;  %v2719_v15 = vpop.f32.mrb[15].mxu1 }
 0x7ea   :  { %2598 = vst [vmem:[#allocation25] sm:$0x3] %v2595_v14 }
 0x7eb   :  { %4073 = shalt.err (!%p4070_p4)
}
 0x7ec   :  { %s4074_s6 = scalar_lea.hbm %s4512_s15, 32 }
 0x7ed   :  { %p4075_p5 = scmp.ne.s32.totalorder %s4512_s15, %s4074_s6  ;;  %p4078_p6 = scmp.lt.u32.totalorder %s4074_s6, %s4512_s15 }
 0x7ef   :  { %p4080_p7 = pnand %p4078_p6, %p4075_p5 }
 0x7f1   :  { %4083 = shalt.err (!%p4080_p7)
}
 0x7f2   :  { %2608 = dma.vmem_to_hbm [thread:$0]  %s2606_s27, 32, %s4512_s15, [#allocation4]  }
 0x7f3   :  { %4100 = dma.done.wait [#allocation4], 32  }
 0x7f4   :  { %4101 = vsyncadd [#allocation4], 4294967264 }
 0x7f5   :  { %2612 = vsyncpa [#allocation3], 1 }
 0x7f6   :  { %2613 = vsyncpa [#allocation6], 1 }
 0x7f7   :  { %2614 = vsyncpa [#allocation9], 1 }
 0x7f8   :  { %2615 = vsyncpa [#allocation12], 1 }
 0x7f9   :  { %2616 = vsyncpa [#allocation15], 1 }
 0x7fa   :  { %2617 = vsyncpa [#allocation18], 1 }
 0x7fb   :  { %2618 = vsyncpa [#allocation21], 1 }
 0x7fc   :  { %2619 = vsyncpa [#allocation24], 1 }
 0x7fd   :  { %2620 = vsyncpa [#allocation4], 1 }

</bundles_post_ra>
